<compile_context>
chip_gen: v5e
topology: v5e:2x2
jax: 0.10.0
libtpu: 0.0.40
codegen_flags: <defaults>
</compile_context>

<pallas_src>
import functools

import numpy as np
import jax
import jax.numpy as jnp
from jax.experimental import pallas as pl
from jax.experimental.pallas import tpu as pltpu

# Out-of-window fill for the max pool (PyTorch MaxPool2d padding never wins the max).
_MAXPOOL_PAD = -1.0e30


# ------------------------------ static geometry ------------------------------

def _geometry(H, W, n_freqs):
    """Spatial sizes after each stage (all convs use padding=1)."""
    h1, w1 = H + 3 - n_freqs, W + 3 - n_freqs            # conv11 out; conv12 keeps it
    hp1, wp1 = (h1 - 1) // 2 + 1, (w1 - 1) // 2 + 1      # after mp1 (3x3 / s2 / p1)
    hp2, wp2 = (hp1 - 1) // 2 + 1, (wp1 - 1) // 2 + 1    # after mp2
    hp3, wp3 = (hp2 - 1) // 2 + 1, (wp2 - 1) // 2 + 1    # after mp3
    return (h1, w1), (hp1, wp1), (hp2, wp2), (hp3, wp3)


def _tap_masks(hv, wv, ws, L, k):
    """(k*k, L) f32 tap-validity masks for a pad-1 conv / 3x3 pool window in the flat
    channels-first layout.  Lane q maps to (h, w) = (q // ws, q % ws); tap (kh, kw)
    is valid iff the source pixel (h+kh-1, w+kw-1) lies inside the hv x wv valid
    region.  The masks implement both zero padding and junk-column hygiene, so the
    activation scratch never needs to be zeroed."""
    q = np.arange(L)
    h, w = q // ws, q % ws
    rows = []
    for kh in range(k):
        for kw in range(k):
            dh, dw = kh - 1, kw - 1
            rows.append((h + dh >= 0) & (h + dh < hv) &
                        (w + dw >= 0) & (w + dw < wv))
    return jnp.asarray(np.stack(rows).astype(np.float32))


def _pool_selector(hv, wv, ws, L):
    """0/1 (L, hpo*wpo) matrix compacting the stride-2 pool centres (2i, 2j) of a
    flat stride-ws layout into the next block's dense flat layout (one MXU dot)."""
    hpo, wpo = (hv - 1) // 2 + 1, (wv - 1) // 2 + 1
    s = np.zeros((L, hpo * wpo), np.float32)
    for i in range(hpo):
        for j in range(wpo):
            s[(2 * i) * ws + 2 * j, i * wpo + j] = 1.0
    return jnp.asarray(s)


# ------------------------------ parameters ------------------------------

def init_params(key, n_features, n_freqs, H, W):
    """Deterministic synthetic parameters in the kernel-ready layout (p_bias=False =>
    no conv/fc biases).  Eval-mode BatchNorm is folded to per-channel (scale, shift)
    packed as (C, 2); conv weights are (Cout, K*K*Cin) bf16 in the kernel's tap order
    (kh, kw, cin); fc1 is pre-split per block-3 spatial position so the kernel never
    flattens or transposes."""
    nf = n_features
    (h1, w1), (hp1, wp1), (hp2, wp2), (hp3, wp3) = _geometry(H, W, n_freqs)
    L1, L2, L3 = H * W, hp1 * wp1, hp2 * wp2
    keys = iter(jax.random.split(key, 40))
    params = {}

    def bn(name, c):
        gamma = 1.0 + 0.1 * jax.random.normal(next(keys), (c,), jnp.float32)
        beta = 0.1 * jax.random.normal(next(keys), (c,), jnp.float32)
        mean = 0.1 * jax.random.normal(next(keys), (c,), jnp.float32)
        var = 1.0 + 0.1 * jax.random.uniform(next(keys), (c,), jnp.float32)
        scale = gamma / jnp.sqrt(var + 1e-5)
        params[name] = jnp.stack([scale, beta - mean * scale], axis=1)   # (C, 2) f32

    def conv(name, k, cin, cout):
        std = 1.0 / np.sqrt(k * k * cin)
        w = std * jax.random.normal(next(keys), (k, k, cin, cout), jnp.float32)
        # Fold to (Cout, K*K*Cin) in the kernel's (kh, kw, cin) tap order and
        # pre-cast to bf16 ONCE here (not per grid step inside the kernel).
        params[name] = (jnp.transpose(w, (3, 0, 1, 2))
                        .reshape(cout, k * k * cin).astype(jnp.bfloat16))

    bn("bn11", 1);      conv("conv11", n_freqs, 1, nf)
    bn("bn12", nf);     conv("conv12", 3, nf, nf)
    bn("bn21", nf);     conv("conv21", 3, nf, 2 * nf)
    bn("bn22", 2 * nf); conv("conv22", 3, 2 * nf, 2 * nf)
    bn("bn31", 2 * nf); conv("conv31", 3, 2 * nf, 4 * nf)
    bn("bn32", 4 * nf); conv("conv32", 3, 4 * nf, 4 * nf)

    # Static 0/1 tap masks and pool-centre selectors (shared where geometry matches:
    # conv12/mp1, conv21/conv22/mp2, conv31/conv32/mp3).
    params["m11"] = _tap_masks(H, W, W, L1, n_freqs)
    params["mg1"] = _tap_masks(h1, w1, W, L1, 3)
    params["mg2"] = _tap_masks(hp1, wp1, wp1, L2, 3)
    params["mg3"] = _tap_masks(hp2, wp2, wp2, L3, 3)
    params["sel1"] = _pool_selector(h1, w1, W, L1)          # (L1, L2)
    params["sel2"] = _pool_selector(hp1, wp1, wp1, L2)      # (L2, L3)

    # FC head.  TODO(synk): the original module hardcodes fc1 = Linear(7920, 256),
    # tied to the training input resolution; here fc1 is sized to the actual flatten
    # dimension of the demo shapes.
    n_pos = hp3 * wp3
    flat_dim = 4 * nf * n_pos
    fc1 = (1.0 / np.sqrt(flat_dim)) * jax.random.normal(
        next(keys), (flat_dim, 256), jnp.float32)
    # torch.flatten(NCHW) index = c * n_pos + p  ->  split per spatial position p.
    params["fc1"] = jnp.transpose(fc1.reshape(4 * nf, n_pos, 256), (1, 0, 2))
    params["fc2"] = (1.0 / 16.0) * jax.random.normal(next(keys), (1, 256), jnp.float32)
    return params


# ------------------------------ in-kernel helpers ------------------------------

def _elu(v):
    # ELU(alpha=1); exp only on the clamped negative branch (no overflow, no wasted
    # EUP work on the positive branch).
    # TODO(synk): switch to jnp.expm1 for better small-|v| precision once verified to
    # lower on all targeted Mosaic versions.
    return jnp.where(v > 0.0, v, jnp.exp(jnp.minimum(v, 0.0)) - 1.0)


def _bn_elu(v, bn_ref):
    # Folded inference BatchNorm (per-channel scale/shift broadcast over lanes) + ELU.
    return _elu(v * bn_ref[:, 0:1] + bn_ref[:, 1:2])


# ------------------------------ forward ------------------------------

@functools.partial(jax.jit, static_argnames=("n_freqs",))
def sconv_forward(x_nchw, params, *, n_freqs):
    """Eval-mode SConv forward: x (N, 1, H, W) f32 NCHW -> sigmoid output (N, 1)."""
    N, cx, H, W = x_nchw.shape
    assert cx == 1, "SConv takes single-channel input"
    nf = params["conv11"].shape[0]
    (h1, w1), (hp1, wp1), (hp2, wp2), (hp3, wp3) = _geometry(H, W, n_freqs)
    L1, L2, L3 = H * W, hp1 * wp1, hp2 * wp2
    centres = tuple(2 * i * wp2 + 2 * j for i in range(hp3) for j in range(wp3))

    # Activation scratch: every stage stores its activation once at BASE (lane
    # aligned) and reads taps / pool neighbours as contiguous lane-offset loads.
    base = ((W + 1 + 127) // 128) * 128
    d_max = max((n_freqs - 2) * (W + 1), W + 1)
    scr_width = ((base + L1 + d_max + 127) // 128) * 128
    scr_rows = 4 * nf
    # Tap-matrix scratch: (K*K*Cin, L), sized for the largest conv.
    tap_rows = max(n_freqs * n_freqs, 36 * nf)
    tap_cols = L1

    def kernel(x_ref,
               bn11_ref, w11_ref, bn12_ref, w12_ref,
               bn21_ref, w21_ref, bn22_ref, w22_ref,
               bn31_ref, w31_ref, bn32_ref, w32_ref,
               m11_ref, mg1_ref, mg2_ref, mg3_ref, sel1_ref, sel2_ref,
               fc1_ref, fc2_ref,
               o_ref, scr, tap):

        def conv(a, w_ref, m_ref, cin, k, ws, L):
            # One contiguous store of the activation; k*k masked lane-offset tap
            # loads fill the (k*k*cin, L) tap matrix; ONE bf16 MXU dot (f32 acc).
            scr[0:cin, base:base + L] = a
            for kh in range(k):
                for kw in range(k):
                    d = (kh - 1) * ws + (kw - 1)
                    i = kh * k + kw
                    src = scr[0:cin, base + d:base + d + L]
                    ok = m_ref[i:i + 1, :] != 0.0          # pad=1 zeros + junk guard
                    tap[i * cin:(i + 1) * cin, 0:L] = jnp.where(ok, src, 0.0)
            t = tap[0:k * k * cin, 0:L].astype(jnp.bfloat16)
            return jnp.dot(w_ref[...], t, preferred_element_type=jnp.float32)

        def maxpool(a, m_ref, sel_ref, c, ws, L):
            # 3x3 / stride-2 / pad-1 max pool: 8 masked neighbour loads + max, then a
            # 0/1 selection matmul compacts the stride-2 centres for the next block.
            scr[0:c, base:base + L] = a
            m = a                                          # centre tap (always valid)
            for dh in (-1, 0, 1):
                for dw in (-1, 0, 1):
                    if dh == 0 and dw == 0:
                        continue
                    d = dh * ws + dw
                    i = (dh + 1) * 3 + (dw + 1)
                    nb = scr[0:c, base + d:base + d + L]
                    ok = m_ref[i:i + 1, :] != 0.0
                    m = jnp.maximum(m, jnp.where(ok, nb, _MAXPOOL_PAD))
            if sel_ref is None:
                return m
            return jnp.dot(m, sel_ref[...], preferred_element_type=jnp.float32)

        # ---- block 1 (do1 = identity in eval) ----
        a = _bn_elu(x_ref[...], bn11_ref)                        # (1, L1)
        a = conv(a, w11_ref, m11_ref, 1, n_freqs, W, L1)         # (nf, L1)
        a = _bn_elu(a, bn12_ref)
        a = conv(a, w12_ref, mg1_ref, nf, 3, W, L1)              # (nf, L1)
        a = maxpool(a, mg1_ref, sel1_ref, nf, W, L1)             # (nf, L2)
        # ---- block 2 (do2 = identity) ----
        a = _bn_elu(a, bn21_ref)
        a = conv(a, w21_ref, mg2_ref, nf, 3, wp1, L2)            # (2nf, L2)
        a = _bn_elu(a, bn22_ref)
        a = conv(a, w22_ref, mg2_ref, 2 * nf, 3, wp1, L2)        # (2nf, L2)
        a = maxpool(a, mg2_ref, sel2_ref, 2 * nf, wp1, L2)       # (2nf, L3)
        # ---- block 3 (do3 = identity) ----
        a = _bn_elu(a, bn31_ref)
        a = conv(a, w31_ref, mg3_ref, 2 * nf, 3, wp2, L3)        # (4nf, L3)
        a = _bn_elu(a, bn32_ref)
        a = conv(a, w32_ref, mg3_ref, 4 * nf, 3, wp2, L3)        # (4nf, L3)
        m3 = maxpool(a, mg3_ref, None, 4 * nf, wp2, L3)          # pooled values at the
                                                                 # stride-2 centres
        # ---- head: flatten (NCHW) -> elu(fc1) -> [do6 = id] -> sigmoid(fc2) ----
        # fc1 as per-position broadcast-MAC + sublane reduction: the channels-first
        # layout already matches torch.flatten's NCHW order (no reshape/transpose).
        z = jnp.zeros((4 * nf, 256), jnp.float32)
        for p, q in enumerate(centres):
            z = z + m3[:, q:q + 1] * fc1_ref[p]                  # (4nf,1) * (4nf,256)
        h = _elu(jnp.sum(z, axis=0, keepdims=True))              # (1, 256)
        y = jnp.sum(h * fc2_ref[...], axis=1, keepdims=True)     # (1, 1) VPU dot
        o_ref[...] = pl.reciprocal(1.0 + jnp.exp(-y), approx=True)   # sigmoid

    ordered = [
        params["bn11"], params["conv11"], params["bn12"], params["conv12"],
        params["bn21"], params["conv21"], params["bn22"], params["conv22"],
        params["bn31"], params["conv31"], params["bn32"], params["conv32"],
        params["m11"], params["mg1"], params["mg2"], params["mg3"],
        params["sel1"], params["sel2"], params["fc1"], params["fc2"],
    ]

    def _const_spec(a):
        zeros = (0,) * a.ndim
        return pl.BlockSpec(a.shape, lambda n, _z=zeros: _z)   # resident across grid

    out = pl.pallas_call(
        kernel,
        out_shape=jax.ShapeDtypeStruct((N, 1, 1), jnp.float32),
        grid=(N,),
        in_specs=[pl.BlockSpec((None, 1, L1), lambda n: (n, 0, 0))]
                 + [_const_spec(a) for a in ordered],
        out_specs=pl.BlockSpec((None, 1, 1), lambda n: (n, 0, 0)),
        scratch_shapes=[
            pltpu.VMEM((scr_rows, scr_width), jnp.float32),   # activation + slack
            pltpu.VMEM((tap_rows, tap_cols), jnp.float32),    # (K*K*Cin, L) tap matrix
        ],
        compiler_params=pltpu.CompilerParams(
            dimension_semantics=("parallel",),   # one sample per core on v7x megacore
            vmem_limit_bytes=32 * 1024 * 1024,
        ),
    )(x_nchw.reshape(N, 1, L1).astype(jnp.float32), *ordered)
    return out.reshape(N, 1)


if __name__ == "__main__":
    n_features, n_freqs = 4, 5           # p_bias=False => module has no conv/fc biases
    N, H, W = 2, 16, 16                  # even N keeps both v7x TensorCores busy

    key = jax.random.PRNGKey(0)
    kx, kp = jax.random.split(key)
    x = jax.random.normal(kx, (N, 1, H, W), jnp.float32)      # NCHW, like PyTorch
    params = init_params(kp, n_features, n_freqs, H, W)

    y = sconv_forward(x, params, n_freqs=n_freqs)
    jax.block_until_ready(y)
    assert y.shape == (N, 1)
    assert bool(jnp.all(jnp.isfinite(y)))
    print("KERNEL_OK")
</pallas_src>

<mosaic_0001>
module attributes {stable_mosaic.version = 11 : i64} {
  func.func @kernel(%arg0: i32, %arg1: memref<1x1x256xf32, #tpu.memory_space<vmem>>, %arg2: memref<1x2xf32, #tpu.memory_space<vmem>>, %arg3: memref<4x25xbf16, #tpu.memory_space<vmem>>, %arg4: memref<4x2xf32, #tpu.memory_space<vmem>>, %arg5: memref<4x36xbf16, #tpu.memory_space<vmem>>, %arg6: memref<4x2xf32, #tpu.memory_space<vmem>>, %arg7: memref<8x36xbf16, #tpu.memory_space<vmem>>, %arg8: memref<8x2xf32, #tpu.memory_space<vmem>>, %arg9: memref<8x72xbf16, #tpu.memory_space<vmem>>, %arg10: memref<8x2xf32, #tpu.memory_space<vmem>>, %arg11: memref<16x72xbf16, #tpu.memory_space<vmem>>, %arg12: memref<16x2xf32, #tpu.memory_space<vmem>>, %arg13: memref<16x144xbf16, #tpu.memory_space<vmem>>, %arg14: memref<25x256xf32, #tpu.memory_space<vmem>>, %arg15: memref<9x256xf32, #tpu.memory_space<vmem>>, %arg16: memref<9x49xf32, #tpu.memory_space<vmem>>, %arg17: memref<9x16xf32, #tpu.memory_space<vmem>>, %arg18: memref<256x49xf32, #tpu.memory_space<vmem>>, %arg19: memref<49x16xf32, #tpu.memory_space<vmem>>, %arg20: memref<4x16x256xf32, #tpu.memory_space<vmem>>, %arg21: memref<1x256xf32, #tpu.memory_space<vmem>>, %arg22: memref<1x1x1xf32, #tpu.memory_space<vmem>>, %arg23: memref<16x512xf32, #tpu.memory_space<vmem>>, %arg24: memref<144x256xf32, #tpu.memory_space<vmem>>) attributes {dimension_semantics = [#tpu.dimension_semantics<parallel>], iteration_bounds = array<i64: 2>, scalar_prefetch = 0 : i64, scratch_operands = 2 : i64, tpu.core_type = #tpu.core_type<tc>, window_params = [{transform_indices = @transform_0, window_bounds = array<i64: 1, 1, 256>}, {pipeline_mode = #tpu.pipeline_mode<synchronous>, transform_indices = @transform_1, window_bounds = array<i64: 1, 2>}, {pipeline_mode = #tpu.pipeline_mode<synchronous>, transform_indices = @transform_2, window_bounds = array<i64: 4, 25>}, {pipeline_mode = #tpu.pipeline_mode<synchronous>, transform_indices = @transform_3, window_bounds = array<i64: 4, 2>}, {pipeline_mode = #tpu.pipeline_mode<synchronous>, transform_indices = @transform_4, window_bounds = array<i64: 4, 36>}, {pipeline_mode = #tpu.pipeline_mode<synchronous>, transform_indices = @transform_5, window_bounds = array<i64: 4, 2>}, {pipeline_mode = #tpu.pipeline_mode<synchronous>, transform_indices = @transform_6, window_bounds = array<i64: 8, 36>}, {pipeline_mode = #tpu.pipeline_mode<synchronous>, transform_indices = @transform_7, window_bounds = array<i64: 8, 2>}, {pipeline_mode = #tpu.pipeline_mode<synchronous>, transform_indices = @transform_8, window_bounds = array<i64: 8, 72>}, {pipeline_mode = #tpu.pipeline_mode<synchronous>, transform_indices = @transform_9, window_bounds = array<i64: 8, 2>}, {pipeline_mode = #tpu.pipeline_mode<synchronous>, transform_indices = @transform_10, window_bounds = array<i64: 16, 72>}, {pipeline_mode = #tpu.pipeline_mode<synchronous>, transform_indices = @transform_11, window_bounds = array<i64: 16, 2>}, {pipeline_mode = #tpu.pipeline_mode<synchronous>, transform_indices = @transform_12, window_bounds = array<i64: 16, 144>}, {pipeline_mode = #tpu.pipeline_mode<synchronous>, transform_indices = @transform_13, window_bounds = array<i64: 25, 256>}, {pipeline_mode = #tpu.pipeline_mode<synchronous>, transform_indices = @transform_14, window_bounds = array<i64: 9, 256>}, {pipeline_mode = #tpu.pipeline_mode<synchronous>, transform_indices = @transform_15, window_bounds = array<i64: 9, 49>}, {pipeline_mode = #tpu.pipeline_mode<synchronous>, transform_indices = @transform_16, window_bounds = array<i64: 9, 16>}, {pipeline_mode = #tpu.pipeline_mode<synchronous>, transform_indices = @transform_17, window_bounds = array<i64: 256, 49>}, {pipeline_mode = #tpu.pipeline_mode<synchronous>, transform_indices = @transform_18, window_bounds = array<i64: 49, 16>}, {pipeline_mode = #tpu.pipeline_mode<synchronous>, transform_indices = @transform_19, window_bounds = array<i64: 4, 16, 256>}, {pipeline_mode = #tpu.pipeline_mode<synchronous>, transform_indices = @transform_20, window_bounds = array<i64: 1, 256>}, {transform_indices = @transform_21, window_bounds = array<i64: 1, 1, 1>}]} {
    %c0 = arith.constant 0 : index
    %c0_0 = arith.constant 0 : index
    %c0_1 = arith.constant 0 : index
    %0 = vector.load %arg1[%c0, %c0_0, %c0_1] : memref<1x1x256xf32, #tpu.memory_space<vmem>>, vector<1x1x256xf32>
    %1 = vector.shape_cast %0 : vector<1x1x256xf32> to vector<1x256xf32>
    %c0_2 = arith.constant 0 : index
    %c0_3 = arith.constant 0 : index
    %2 = vector.load %arg2[%c0_2, %c0_3] : memref<1x2xf32, #tpu.memory_space<vmem>>, vector<1x1xf32>
    %3 = vector.broadcast %2 : vector<1x1xf32> to vector<1x256xf32>
    %4 = arith.mulf %1, %3 : vector<1x256xf32>
    %c0_4 = arith.constant 0 : index
    %c1 = arith.constant 1 : index
    %5 = vector.load %arg2[%c0_4, %c1] : memref<1x2xf32, #tpu.memory_space<vmem>>, vector<1x1xf32>
    %6 = vector.broadcast %5 : vector<1x1xf32> to vector<1x256xf32>
    %7 = arith.addf %4, %6 : vector<1x256xf32>
    %cst = arith.constant 0.000000e+00 : f32
    %8 = vector.broadcast %cst : f32 to vector<1x256xf32>
    %9 = arith.cmpf ogt, %7, %8 : vector<1x256xf32>
    %cst_5 = arith.constant 0.000000e+00 : f32
    %10 = vector.broadcast %cst_5 : f32 to vector<1x256xf32>
    %11 = arith.minimumf %7, %10 : vector<1x256xf32>
    %12 = math.exp %11 : vector<1x256xf32>
    %cst_6 = arith.constant 1.000000e+00 : f32
    %13 = vector.broadcast %cst_6 : f32 to vector<1x256xf32>
    %14 = arith.subf %12, %13 : vector<1x256xf32>
    %15 = arith.select %9, %7, %14 : vector<1x256xi1>, vector<1x256xf32>
    %c0_7 = arith.constant 0 : index
    %c128 = arith.constant 128 : index
    %16 = vector.load %arg23[%c0_7, %c128] : memref<16x512xf32, #tpu.memory_space<vmem>>, vector<1x256xf32>
    tpu.vector_store %arg23[%c0_7, %c128], %15 {strides = array<i32>} : memref<16x512xf32, #tpu.memory_space<vmem>>, vector<1x256xf32>,
    %c0_8 = arith.constant 0 : index
    %c111 = arith.constant 111 : index
    %17 = vector.load %arg23[%c0_8, %c111] : memref<16x512xf32, #tpu.memory_space<vmem>>, vector<1x256xf32>
    %c0_9 = arith.constant 0 : index
    %c0_10 = arith.constant 0 : index
    %18 = vector.load %arg14[%c0_9, %c0_10] : memref<25x256xf32, #tpu.memory_space<vmem>>, vector<1x256xf32>
    %cst_11 = arith.constant 0.000000e+00 : f32
    %19 = vector.broadcast %cst_11 : f32 to vector<1x256xf32>
    %20 = arith.cmpf one, %18, %19 : vector<1x256xf32>
    %cst_12 = arith.constant 0.000000e+00 : f32
    %21 = vector.broadcast %cst_12 : f32 to vector<1x256xf32>
    %22 = arith.select %20, %17, %21 : vector<1x256xi1>, vector<1x256xf32>
    %c0_13 = arith.constant 0 : index
    %c0_14 = arith.constant 0 : index
    %23 = vector.load %arg24[%c0_13, %c0_14] : memref<144x256xf32, #tpu.memory_space<vmem>>, vector<1x256xf32>
    tpu.vector_store %arg24[%c0_13, %c0_14], %22 {strides = array<i32>} : memref<144x256xf32, #tpu.memory_space<vmem>>, vector<1x256xf32>,
    %c0_15 = arith.constant 0 : index
    %c112 = arith.constant 112 : index
    %24 = vector.load %arg23[%c0_15, %c112] : memref<16x512xf32, #tpu.memory_space<vmem>>, vector<1x256xf32>
    %c1_16 = arith.constant 1 : index
    %c0_17 = arith.constant 0 : index
    %25 = vector.load %arg14[%c1_16, %c0_17] : memref<25x256xf32, #tpu.memory_space<vmem>>, vector<1x256xf32>
    %cst_18 = arith.constant 0.000000e+00 : f32
    %26 = vector.broadcast %cst_18 : f32 to vector<1x256xf32>
    %27 = arith.cmpf one, %25, %26 : vector<1x256xf32>
    %cst_19 = arith.constant 0.000000e+00 : f32
    %28 = vector.broadcast %cst_19 : f32 to vector<1x256xf32>
    %29 = arith.select %27, %24, %28 : vector<1x256xi1>, vector<1x256xf32>
    %c1_20 = arith.constant 1 : index
    %c0_21 = arith.constant 0 : index
    %30 = vector.load %arg24[%c1_20, %c0_21] : memref<144x256xf32, #tpu.memory_space<vmem>>, vector<1x256xf32>
    tpu.vector_store %arg24[%c1_20, %c0_21], %29 {strides = array<i32>} : memref<144x256xf32, #tpu.memory_space<vmem>>, vector<1x256xf32>,
    %c0_22 = arith.constant 0 : index
    %c113 = arith.constant 113 : index
    %31 = vector.load %arg23[%c0_22, %c113] : memref<16x512xf32, #tpu.memory_space<vmem>>, vector<1x256xf32>
    %c2 = arith.constant 2 : index
    %c0_23 = arith.constant 0 : index
    %32 = vector.load %arg14[%c2, %c0_23] : memref<25x256xf32, #tpu.memory_space<vmem>>, vector<1x256xf32>
    %cst_24 = arith.constant 0.000000e+00 : f32
    %33 = vector.broadcast %cst_24 : f32 to vector<1x256xf32>
    %34 = arith.cmpf one, %32, %33 : vector<1x256xf32>
    %cst_25 = arith.constant 0.000000e+00 : f32
    %35 = vector.broadcast %cst_25 : f32 to vector<1x256xf32>
    %36 = arith.select %34, %31, %35 : vector<1x256xi1>, vector<1x256xf32>
    %c2_26 = arith.constant 2 : index
    %c0_27 = arith.constant 0 : index
    %37 = vector.load %arg24[%c2_26, %c0_27] : memref<144x256xf32, #tpu.memory_space<vmem>>, vector<1x256xf32>
    tpu.vector_store %arg24[%c2_26, %c0_27], %36 {strides = array<i32>} : memref<144x256xf32, #tpu.memory_space<vmem>>, vector<1x256xf32>,
    %c0_28 = arith.constant 0 : index
    %c114 = arith.constant 114 : index
    %38 = vector.load %arg23[%c0_28, %c114] : memref<16x512xf32, #tpu.memory_space<vmem>>, vector<1x256xf32>
    %c3 = arith.constant 3 : index
    %c0_29 = arith.constant 0 : index
    %39 = vector.load %arg14[%c3, %c0_29] : memref<25x256xf32, #tpu.memory_space<vmem>>, vector<1x256xf32>
    %cst_30 = arith.constant 0.000000e+00 : f32
    %40 = vector.broadcast %cst_30 : f32 to vector<1x256xf32>
    %41 = arith.cmpf one, %39, %40 : vector<1x256xf32>
    %cst_31 = arith.constant 0.000000e+00 : f32
    %42 = vector.broadcast %cst_31 : f32 to vector<1x256xf32>
    %43 = arith.select %41, %38, %42 : vector<1x256xi1>, vector<1x256xf32>
    %c3_32 = arith.constant 3 : index
    %c0_33 = arith.constant 0 : index
    %44 = vector.load %arg24[%c3_32, %c0_33] : memref<144x256xf32, #tpu.memory_space<vmem>>, vector<1x256xf32>
    tpu.vector_store %arg24[%c3_32, %c0_33], %43 {strides = array<i32>} : memref<144x256xf32, #tpu.memory_space<vmem>>, vector<1x256xf32>,
    %c0_34 = arith.constant 0 : index
    %c115 = arith.constant 115 : index
    %45 = vector.load %arg23[%c0_34, %c115] : memref<16x512xf32, #tpu.memory_space<vmem>>, vector<1x256xf32>
    %c4 = arith.constant 4 : index
    %c0_35 = arith.constant 0 : index
    %46 = vector.load %arg14[%c4, %c0_35] : memref<25x256xf32, #tpu.memory_space<vmem>>, vector<1x256xf32>
    %cst_36 = arith.constant 0.000000e+00 : f32
    %47 = vector.broadcast %cst_36 : f32 to vector<1x256xf32>
    %48 = arith.cmpf one, %46, %47 : vector<1x256xf32>
    %cst_37 = arith.constant 0.000000e+00 : f32
    %49 = vector.broadcast %cst_37 : f32 to vector<1x256xf32>
    %50 = arith.select %48, %45, %49 : vector<1x256xi1>, vector<1x256xf32>
    %c4_38 = arith.constant 4 : index
    %c0_39 = arith.constant 0 : index
    %51 = vector.load %arg24[%c4_38, %c0_39] : memref<144x256xf32, #tpu.memory_space<vmem>>, vector<1x256xf32>
    tpu.vector_store %arg24[%c4_38, %c0_39], %50 {strides = array<i32>} : memref<144x256xf32, #tpu.memory_space<vmem>>, vector<1x256xf32>,
    %c0_40 = arith.constant 0 : index
    %c127 = arith.constant 127 : index
    %52 = vector.load %arg23[%c0_40, %c127] : memref<16x512xf32, #tpu.memory_space<vmem>>, vector<1x256xf32>
    %c5 = arith.constant 5 : index
    %c0_41 = arith.constant 0 : index
    %53 = vector.load %arg14[%c5, %c0_41] : memref<25x256xf32, #tpu.memory_space<vmem>>, vector<1x256xf32>
    %cst_42 = arith.constant 0.000000e+00 : f32
    %54 = vector.broadcast %cst_42 : f32 to vector<1x256xf32>
    %55 = arith.cmpf one, %53, %54 : vector<1x256xf32>
    %cst_43 = arith.constant 0.000000e+00 : f32
    %56 = vector.broadcast %cst_43 : f32 to vector<1x256xf32>
    %57 = arith.select %55, %52, %56 : vector<1x256xi1>, vector<1x256xf32>
    %c5_44 = arith.constant 5 : index
    %c0_45 = arith.constant 0 : index
    %58 = vector.load %arg24[%c5_44, %c0_45] : memref<144x256xf32, #tpu.memory_space<vmem>>, vector<1x256xf32>
    tpu.vector_store %arg24[%c5_44, %c0_45], %57 {strides = array<i32>} : memref<144x256xf32, #tpu.memory_space<vmem>>, vector<1x256xf32>,
    %c0_46 = arith.constant 0 : index
    %c128_47 = arith.constant 128 : index
    %59 = vector.load %arg23[%c0_46, %c128_47] : memref<16x512xf32, #tpu.memory_space<vmem>>, vector<1x256xf32>
    %c6 = arith.constant 6 : index
    %c0_48 = arith.constant 0 : index
    %60 = vector.load %arg14[%c6, %c0_48] : memref<25x256xf32, #tpu.memory_space<vmem>>, vector<1x256xf32>
    %cst_49 = arith.constant 0.000000e+00 : f32
    %61 = vector.broadcast %cst_49 : f32 to vector<1x256xf32>
    %62 = arith.cmpf one, %60, %61 : vector<1x256xf32>
    %cst_50 = arith.constant 0.000000e+00 : f32
    %63 = vector.broadcast %cst_50 : f32 to vector<1x256xf32>
    %64 = arith.select %62, %59, %63 : vector<1x256xi1>, vector<1x256xf32>
    %c6_51 = arith.constant 6 : index
    %c0_52 = arith.constant 0 : index
    %65 = vector.load %arg24[%c6_51, %c0_52] : memref<144x256xf32, #tpu.memory_space<vmem>>, vector<1x256xf32>
    tpu.vector_store %arg24[%c6_51, %c0_52], %64 {strides = array<i32>} : memref<144x256xf32, #tpu.memory_space<vmem>>, vector<1x256xf32>,
    %c0_53 = arith.constant 0 : index
    %c129 = arith.constant 129 : index
    %66 = vector.load %arg23[%c0_53, %c129] : memref<16x512xf32, #tpu.memory_space<vmem>>, vector<1x256xf32>
    %c7 = arith.constant 7 : index
    %c0_54 = arith.constant 0 : index
    %67 = vector.load %arg14[%c7, %c0_54] : memref<25x256xf32, #tpu.memory_space<vmem>>, vector<1x256xf32>
    %cst_55 = arith.constant 0.000000e+00 : f32
    %68 = vector.broadcast %cst_55 : f32 to vector<1x256xf32>
    %69 = arith.cmpf one, %67, %68 : vector<1x256xf32>
    %cst_56 = arith.constant 0.000000e+00 : f32
    %70 = vector.broadcast %cst_56 : f32 to vector<1x256xf32>
    %71 = arith.select %69, %66, %70 : vector<1x256xi1>, vector<1x256xf32>
    %c7_57 = arith.constant 7 : index
    %c0_58 = arith.constant 0 : index
    %72 = vector.load %arg24[%c7_57, %c0_58] : memref<144x256xf32, #tpu.memory_space<vmem>>, vector<1x256xf32>
    tpu.vector_store %arg24[%c7_57, %c0_58], %71 {strides = array<i32>} : memref<144x256xf32, #tpu.memory_space<vmem>>, vector<1x256xf32>,
    %c0_59 = arith.constant 0 : index
    %c130 = arith.constant 130 : index
    %73 = vector.load %arg23[%c0_59, %c130] : memref<16x512xf32, #tpu.memory_space<vmem>>, vector<1x256xf32>
    %c8 = arith.constant 8 : index
    %c0_60 = arith.constant 0 : index
    %74 = vector.load %arg14[%c8, %c0_60] : memref<25x256xf32, #tpu.memory_space<vmem>>, vector<1x256xf32>
    %cst_61 = arith.constant 0.000000e+00 : f32
    %75 = vector.broadcast %cst_61 : f32 to vector<1x256xf32>
    %76 = arith.cmpf one, %74, %75 : vector<1x256xf32>
    %cst_62 = arith.constant 0.000000e+00 : f32
    %77 = vector.broadcast %cst_62 : f32 to vector<1x256xf32>
    %78 = arith.select %76, %73, %77 : vector<1x256xi1>, vector<1x256xf32>
    %c8_63 = arith.constant 8 : index
    %c0_64 = arith.constant 0 : index
    %79 = vector.load %arg24[%c8_63, %c0_64] : memref<144x256xf32, #tpu.memory_space<vmem>>, vector<1x256xf32>
    tpu.vector_store %arg24[%c8_63, %c0_64], %78 {strides = array<i32>} : memref<144x256xf32, #tpu.memory_space<vmem>>, vector<1x256xf32>,
    %c0_65 = arith.constant 0 : index
    %c131 = arith.constant 131 : index
    %80 = vector.load %arg23[%c0_65, %c131] : memref<16x512xf32, #tpu.memory_space<vmem>>, vector<1x256xf32>
    %c9 = arith.constant 9 : index
    %c0_66 = arith.constant 0 : index
    %81 = vector.load %arg14[%c9, %c0_66] : memref<25x256xf32, #tpu.memory_space<vmem>>, vector<1x256xf32>
    %cst_67 = arith.constant 0.000000e+00 : f32
    %82 = vector.broadcast %cst_67 : f32 to vector<1x256xf32>
    %83 = arith.cmpf one, %81, %82 : vector<1x256xf32>
    %cst_68 = arith.constant 0.000000e+00 : f32
    %84 = vector.broadcast %cst_68 : f32 to vector<1x256xf32>
    %85 = arith.select %83, %80, %84 : vector<1x256xi1>, vector<1x256xf32>
    %c9_69 = arith.constant 9 : index
    %c0_70 = arith.constant 0 : index
    %86 = vector.load %arg24[%c9_69, %c0_70] : memref<144x256xf32, #tpu.memory_space<vmem>>, vector<1x256xf32>
    tpu.vector_store %arg24[%c9_69, %c0_70], %85 {strides = array<i32>} : memref<144x256xf32, #tpu.memory_space<vmem>>, vector<1x256xf32>,
    %c0_71 = arith.constant 0 : index
    %c143 = arith.constant 143 : index
    %87 = vector.load %arg23[%c0_71, %c143] : memref<16x512xf32, #tpu.memory_space<vmem>>, vector<1x256xf32>
    %c10 = arith.constant 10 : index
    %c0_72 = arith.constant 0 : index
    %88 = vector.load %arg14[%c10, %c0_72] : memref<25x256xf32, #tpu.memory_space<vmem>>, vector<1x256xf32>
    %cst_73 = arith.constant 0.000000e+00 : f32
    %89 = vector.broadcast %cst_73 : f32 to vector<1x256xf32>
    %90 = arith.cmpf one, %88, %89 : vector<1x256xf32>
    %cst_74 = arith.constant 0.000000e+00 : f32
    %91 = vector.broadcast %cst_74 : f32 to vector<1x256xf32>
    %92 = arith.select %90, %87, %91 : vector<1x256xi1>, vector<1x256xf32>
    %c10_75 = arith.constant 10 : index
    %c0_76 = arith.constant 0 : index
    %93 = vector.load %arg24[%c10_75, %c0_76] : memref<144x256xf32, #tpu.memory_space<vmem>>, vector<1x256xf32>
    tpu.vector_store %arg24[%c10_75, %c0_76], %92 {strides = array<i32>} : memref<144x256xf32, #tpu.memory_space<vmem>>, vector<1x256xf32>,
    %c0_77 = arith.constant 0 : index
    %c144 = arith.constant 144 : index
    %94 = vector.load %arg23[%c0_77, %c144] : memref<16x512xf32, #tpu.memory_space<vmem>>, vector<1x256xf32>
    %c11 = arith.constant 11 : index
    %c0_78 = arith.constant 0 : index
    %95 = vector.load %arg14[%c11, %c0_78] : memref<25x256xf32, #tpu.memory_space<vmem>>, vector<1x256xf32>
    %cst_79 = arith.constant 0.000000e+00 : f32
    %96 = vector.broadcast %cst_79 : f32 to vector<1x256xf32>
    %97 = arith.cmpf one, %95, %96 : vector<1x256xf32>
    %cst_80 = arith.constant 0.000000e+00 : f32
    %98 = vector.broadcast %cst_80 : f32 to vector<1x256xf32>
    %99 = arith.select %97, %94, %98 : vector<1x256xi1>, vector<1x256xf32>
    %c11_81 = arith.constant 11 : index
    %c0_82 = arith.constant 0 : index
    %100 = vector.load %arg24[%c11_81, %c0_82] : memref<144x256xf32, #tpu.memory_space<vmem>>, vector<1x256xf32>
    tpu.vector_store %arg24[%c11_81, %c0_82], %99 {strides = array<i32>} : memref<144x256xf32, #tpu.memory_space<vmem>>, vector<1x256xf32>,
    %c0_83 = arith.constant 0 : index
    %c145 = arith.constant 145 : index
    %101 = vector.load %arg23[%c0_83, %c145] : memref<16x512xf32, #tpu.memory_space<vmem>>, vector<1x256xf32>
    %c12 = arith.constant 12 : index
    %c0_84 = arith.constant 0 : index
    %102 = vector.load %arg14[%c12, %c0_84] : memref<25x256xf32, #tpu.memory_space<vmem>>, vector<1x256xf32>
    %cst_85 = arith.constant 0.000000e+00 : f32
    %103 = vector.broadcast %cst_85 : f32 to vector<1x256xf32>
    %104 = arith.cmpf one, %102, %103 : vector<1x256xf32>
    %cst_86 = arith.constant 0.000000e+00 : f32
    %105 = vector.broadcast %cst_86 : f32 to vector<1x256xf32>
    %106 = arith.select %104, %101, %105 : vector<1x256xi1>, vector<1x256xf32>
    %c12_87 = arith.constant 12 : index
    %c0_88 = arith.constant 0 : index
    %107 = vector.load %arg24[%c12_87, %c0_88] : memref<144x256xf32, #tpu.memory_space<vmem>>, vector<1x256xf32>
    tpu.vector_store %arg24[%c12_87, %c0_88], %106 {strides = array<i32>} : memref<144x256xf32, #tpu.memory_space<vmem>>, vector<1x256xf32>,
    %c0_89 = arith.constant 0 : index
    %c146 = arith.constant 146 : index
    %108 = vector.load %arg23[%c0_89, %c146] : memref<16x512xf32, #tpu.memory_space<vmem>>, vector<1x256xf32>
    %c13 = arith.constant 13 : index
    %c0_90 = arith.constant 0 : index
    %109 = vector.load %arg14[%c13, %c0_90] : memref<25x256xf32, #tpu.memory_space<vmem>>, vector<1x256xf32>
    %cst_91 = arith.constant 0.000000e+00 : f32
    %110 = vector.broadcast %cst_91 : f32 to vector<1x256xf32>
    %111 = arith.cmpf one, %109, %110 : vector<1x256xf32>
    %cst_92 = arith.constant 0.000000e+00 : f32
    %112 = vector.broadcast %cst_92 : f32 to vector<1x256xf32>
    %113 = arith.select %111, %108, %112 : vector<1x256xi1>, vector<1x256xf32>
    %c13_93 = arith.constant 13 : index
    %c0_94 = arith.constant 0 : index
    %114 = vector.load %arg24[%c13_93, %c0_94] : memref<144x256xf32, #tpu.memory_space<vmem>>, vector<1x256xf32>
    tpu.vector_store %arg24[%c13_93, %c0_94], %113 {strides = array<i32>} : memref<144x256xf32, #tpu.memory_space<vmem>>, vector<1x256xf32>,
    %c0_95 = arith.constant 0 : index
    %c147 = arith.constant 147 : index
    %115 = vector.load %arg23[%c0_95, %c147] : memref<16x512xf32, #tpu.memory_space<vmem>>, vector<1x256xf32>
    %c14 = arith.constant 14 : index
    %c0_96 = arith.constant 0 : index
    %116 = vector.load %arg14[%c14, %c0_96] : memref<25x256xf32, #tpu.memory_space<vmem>>, vector<1x256xf32>
    %cst_97 = arith.constant 0.000000e+00 : f32
    %117 = vector.broadcast %cst_97 : f32 to vector<1x256xf32>
    %118 = arith.cmpf one, %116, %117 : vector<1x256xf32>
    %cst_98 = arith.constant 0.000000e+00 : f32
    %119 = vector.broadcast %cst_98 : f32 to vector<1x256xf32>
    %120 = arith.select %118, %115, %119 : vector<1x256xi1>, vector<1x256xf32>
    %c14_99 = arith.constant 14 : index
    %c0_100 = arith.constant 0 : index
    %121 = vector.load %arg24[%c14_99, %c0_100] : memref<144x256xf32, #tpu.memory_space<vmem>>, vector<1x256xf32>
    tpu.vector_store %arg24[%c14_99, %c0_100], %120 {strides = array<i32>} : memref<144x256xf32, #tpu.memory_space<vmem>>, vector<1x256xf32>,
    %c0_101 = arith.constant 0 : index
    %c159 = arith.constant 159 : index
    %122 = vector.load %arg23[%c0_101, %c159] : memref<16x512xf32, #tpu.memory_space<vmem>>, vector<1x256xf32>
    %c15 = arith.constant 15 : index
    %c0_102 = arith.constant 0 : index
    %123 = vector.load %arg14[%c15, %c0_102] : memref<25x256xf32, #tpu.memory_space<vmem>>, vector<1x256xf32>
    %cst_103 = arith.constant 0.000000e+00 : f32
    %124 = vector.broadcast %cst_103 : f32 to vector<1x256xf32>
    %125 = arith.cmpf one, %123, %124 : vector<1x256xf32>
    %cst_104 = arith.constant 0.000000e+00 : f32
    %126 = vector.broadcast %cst_104 : f32 to vector<1x256xf32>
    %127 = arith.select %125, %122, %126 : vector<1x256xi1>, vector<1x256xf32>
    %c15_105 = arith.constant 15 : index
    %c0_106 = arith.constant 0 : index
    %128 = vector.load %arg24[%c15_105, %c0_106] : memref<144x256xf32, #tpu.memory_space<vmem>>, vector<1x256xf32>
    tpu.vector_store %arg24[%c15_105, %c0_106], %127 {strides = array<i32>} : memref<144x256xf32, #tpu.memory_space<vmem>>, vector<1x256xf32>,
    %c0_107 = arith.constant 0 : index
    %c160 = arith.constant 160 : index
    %129 = vector.load %arg23[%c0_107, %c160] : memref<16x512xf32, #tpu.memory_space<vmem>>, vector<1x256xf32>
    %c16 = arith.constant 16 : index
    %c0_108 = arith.constant 0 : index
    %130 = vector.load %arg14[%c16, %c0_108] : memref<25x256xf32, #tpu.memory_space<vmem>>, vector<1x256xf32>
    %cst_109 = arith.constant 0.000000e+00 : f32
    %131 = vector.broadcast %cst_109 : f32 to vector<1x256xf32>
    %132 = arith.cmpf one, %130, %131 : vector<1x256xf32>
    %cst_110 = arith.constant 0.000000e+00 : f32
    %133 = vector.broadcast %cst_110 : f32 to vector<1x256xf32>
    %134 = arith.select %132, %129, %133 : vector<1x256xi1>, vector<1x256xf32>
    %c16_111 = arith.constant 16 : index
    %c0_112 = arith.constant 0 : index
    %135 = vector.load %arg24[%c16_111, %c0_112] : memref<144x256xf32, #tpu.memory_space<vmem>>, vector<1x256xf32>
    tpu.vector_store %arg24[%c16_111, %c0_112], %134 {strides = array<i32>} : memref<144x256xf32, #tpu.memory_space<vmem>>, vector<1x256xf32>,
    %c0_113 = arith.constant 0 : index
    %c161 = arith.constant 161 : index
    %136 = vector.load %arg23[%c0_113, %c161] : memref<16x512xf32, #tpu.memory_space<vmem>>, vector<1x256xf32>
    %c17 = arith.constant 17 : index
    %c0_114 = arith.constant 0 : index
    %137 = vector.load %arg14[%c17, %c0_114] : memref<25x256xf32, #tpu.memory_space<vmem>>, vector<1x256xf32>
    %cst_115 = arith.constant 0.000000e+00 : f32
    %138 = vector.broadcast %cst_115 : f32 to vector<1x256xf32>
    %139 = arith.cmpf one, %137, %138 : vector<1x256xf32>
    %cst_116 = arith.constant 0.000000e+00 : f32
    %140 = vector.broadcast %cst_116 : f32 to vector<1x256xf32>
    %141 = arith.select %139, %136, %140 : vector<1x256xi1>, vector<1x256xf32>
    %c17_117 = arith.constant 17 : index
    %c0_118 = arith.constant 0 : index
    %142 = vector.load %arg24[%c17_117, %c0_118] : memref<144x256xf32, #tpu.memory_space<vmem>>, vector<1x256xf32>
    tpu.vector_store %arg24[%c17_117, %c0_118], %141 {strides = array<i32>} : memref<144x256xf32, #tpu.memory_space<vmem>>, vector<1x256xf32>,
    %c0_119 = arith.constant 0 : index
    %c162 = arith.constant 162 : index
    %143 = vector.load %arg23[%c0_119, %c162] : memref<16x512xf32, #tpu.memory_space<vmem>>, vector<1x256xf32>
    %c18 = arith.constant 18 : index
    %c0_120 = arith.constant 0 : index
    %144 = vector.load %arg14[%c18, %c0_120] : memref<25x256xf32, #tpu.memory_space<vmem>>, vector<1x256xf32>
    %cst_121 = arith.constant 0.000000e+00 : f32
    %145 = vector.broadcast %cst_121 : f32 to vector<1x256xf32>
    %146 = arith.cmpf one, %144, %145 : vector<1x256xf32>
    %cst_122 = arith.constant 0.000000e+00 : f32
    %147 = vector.broadcast %cst_122 : f32 to vector<1x256xf32>
    %148 = arith.select %146, %143, %147 : vector<1x256xi1>, vector<1x256xf32>
    %c18_123 = arith.constant 18 : index
    %c0_124 = arith.constant 0 : index
    %149 = vector.load %arg24[%c18_123, %c0_124] : memref<144x256xf32, #tpu.memory_space<vmem>>, vector<1x256xf32>
    tpu.vector_store %arg24[%c18_123, %c0_124], %148 {strides = array<i32>} : memref<144x256xf32, #tpu.memory_space<vmem>>, vector<1x256xf32>,
    %c0_125 = arith.constant 0 : index
    %c163 = arith.constant 163 : index
    %150 = vector.load %arg23[%c0_125, %c163] : memref<16x512xf32, #tpu.memory_space<vmem>>, vector<1x256xf32>
    %c19 = arith.constant 19 : index
    %c0_126 = arith.constant 0 : index
    %151 = vector.load %arg14[%c19, %c0_126] : memref<25x256xf32, #tpu.memory_space<vmem>>, vector<1x256xf32>
    %cst_127 = arith.constant 0.000000e+00 : f32
    %152 = vector.broadcast %cst_127 : f32 to vector<1x256xf32>
    %153 = arith.cmpf one, %151, %152 : vector<1x256xf32>
    %cst_128 = arith.constant 0.000000e+00 : f32
    %154 = vector.broadcast %cst_128 : f32 to vector<1x256xf32>
    %155 = arith.select %153, %150, %154 : vector<1x256xi1>, vector<1x256xf32>
    %c19_129 = arith.constant 19 : index
    %c0_130 = arith.constant 0 : index
    %156 = vector.load %arg24[%c19_129, %c0_130] : memref<144x256xf32, #tpu.memory_space<vmem>>, vector<1x256xf32>
    tpu.vector_store %arg24[%c19_129, %c0_130], %155 {strides = array<i32>} : memref<144x256xf32, #tpu.memory_space<vmem>>, vector<1x256xf32>,
    %c0_131 = arith.constant 0 : index
    %c175 = arith.constant 175 : index
    %157 = vector.load %arg23[%c0_131, %c175] : memref<16x512xf32, #tpu.memory_space<vmem>>, vector<1x256xf32>
    %c20 = arith.constant 20 : index
    %c0_132 = arith.constant 0 : index
    %158 = vector.load %arg14[%c20, %c0_132] : memref<25x256xf32, #tpu.memory_space<vmem>>, vector<1x256xf32>
    %cst_133 = arith.constant 0.000000e+00 : f32
    %159 = vector.broadcast %cst_133 : f32 to vector<1x256xf32>
    %160 = arith.cmpf one, %158, %159 : vector<1x256xf32>
    %cst_134 = arith.constant 0.000000e+00 : f32
    %161 = vector.broadcast %cst_134 : f32 to vector<1x256xf32>
    %162 = arith.select %160, %157, %161 : vector<1x256xi1>, vector<1x256xf32>
    %c20_135 = arith.constant 20 : index
    %c0_136 = arith.constant 0 : index
    %163 = vector.load %arg24[%c20_135, %c0_136] : memref<144x256xf32, #tpu.memory_space<vmem>>, vector<1x256xf32>
    tpu.vector_store %arg24[%c20_135, %c0_136], %162 {strides = array<i32>} : memref<144x256xf32, #tpu.memory_space<vmem>>, vector<1x256xf32>,
    %c0_137 = arith.constant 0 : index
    %c176 = arith.constant 176 : index
    %164 = vector.load %arg23[%c0_137, %c176] : memref<16x512xf32, #tpu.memory_space<vmem>>, vector<1x256xf32>
    %c21 = arith.constant 21 : index
    %c0_138 = arith.constant 0 : index
    %165 = vector.load %arg14[%c21, %c0_138] : memref<25x256xf32, #tpu.memory_space<vmem>>, vector<1x256xf32>
    %cst_139 = arith.constant 0.000000e+00 : f32
    %166 = vector.broadcast %cst_139 : f32 to vector<1x256xf32>
    %167 = arith.cmpf one, %165, %166 : vector<1x256xf32>
    %cst_140 = arith.constant 0.000000e+00 : f32
    %168 = vector.broadcast %cst_140 : f32 to vector<1x256xf32>
    %169 = arith.select %167, %164, %168 : vector<1x256xi1>, vector<1x256xf32>
    %c21_141 = arith.constant 21 : index
    %c0_142 = arith.constant 0 : index
    %170 = vector.load %arg24[%c21_141, %c0_142] : memref<144x256xf32, #tpu.memory_space<vmem>>, vector<1x256xf32>
    tpu.vector_store %arg24[%c21_141, %c0_142], %169 {strides = array<i32>} : memref<144x256xf32, #tpu.memory_space<vmem>>, vector<1x256xf32>,
    %c0_143 = arith.constant 0 : index
    %c177 = arith.constant 177 : index
    %171 = vector.load %arg23[%c0_143, %c177] : memref<16x512xf32, #tpu.memory_space<vmem>>, vector<1x256xf32>
    %c22 = arith.constant 22 : index
    %c0_144 = arith.constant 0 : index
    %172 = vector.load %arg14[%c22, %c0_144] : memref<25x256xf32, #tpu.memory_space<vmem>>, vector<1x256xf32>
    %cst_145 = arith.constant 0.000000e+00 : f32
    %173 = vector.broadcast %cst_145 : f32 to vector<1x256xf32>
    %174 = arith.cmpf one, %172, %173 : vector<1x256xf32>
    %cst_146 = arith.constant 0.000000e+00 : f32
    %175 = vector.broadcast %cst_146 : f32 to vector<1x256xf32>
    %176 = arith.select %174, %171, %175 : vector<1x256xi1>, vector<1x256xf32>
    %c22_147 = arith.constant 22 : index
    %c0_148 = arith.constant 0 : index
    %177 = vector.load %arg24[%c22_147, %c0_148] : memref<144x256xf32, #tpu.memory_space<vmem>>, vector<1x256xf32>
    tpu.vector_store %arg24[%c22_147, %c0_148], %176 {strides = array<i32>} : memref<144x256xf32, #tpu.memory_space<vmem>>, vector<1x256xf32>,
    %c0_149 = arith.constant 0 : index
    %c178 = arith.constant 178 : index
    %178 = vector.load %arg23[%c0_149, %c178] : memref<16x512xf32, #tpu.memory_space<vmem>>, vector<1x256xf32>
    %c23 = arith.constant 23 : index
    %c0_150 = arith.constant 0 : index
    %179 = vector.load %arg14[%c23, %c0_150] : memref<25x256xf32, #tpu.memory_space<vmem>>, vector<1x256xf32>
    %cst_151 = arith.constant 0.000000e+00 : f32
    %180 = vector.broadcast %cst_151 : f32 to vector<1x256xf32>
    %181 = arith.cmpf one, %179, %180 : vector<1x256xf32>
    %cst_152 = arith.constant 0.000000e+00 : f32
    %182 = vector.broadcast %cst_152 : f32 to vector<1x256xf32>
    %183 = arith.select %181, %178, %182 : vector<1x256xi1>, vector<1x256xf32>
    %c23_153 = arith.constant 23 : index
    %c0_154 = arith.constant 0 : index
    %184 = vector.load %arg24[%c23_153, %c0_154] : memref<144x256xf32, #tpu.memory_space<vmem>>, vector<1x256xf32>
    tpu.vector_store %arg24[%c23_153, %c0_154], %183 {strides = array<i32>} : memref<144x256xf32, #tpu.memory_space<vmem>>, vector<1x256xf32>,
    %c0_155 = arith.constant 0 : index
    %c179 = arith.constant 179 : index
    %185 = vector.load %arg23[%c0_155, %c179] : memref<16x512xf32, #tpu.memory_space<vmem>>, vector<1x256xf32>
    %c24 = arith.constant 24 : index
    %c0_156 = arith.constant 0 : index
    %186 = vector.load %arg14[%c24, %c0_156] : memref<25x256xf32, #tpu.memory_space<vmem>>, vector<1x256xf32>
    %cst_157 = arith.constant 0.000000e+00 : f32
    %187 = vector.broadcast %cst_157 : f32 to vector<1x256xf32>
    %188 = arith.cmpf one, %186, %187 : vector<1x256xf32>
    %cst_158 = arith.constant 0.000000e+00 : f32
    %189 = vector.broadcast %cst_158 : f32 to vector<1x256xf32>
    %190 = arith.select %188, %185, %189 : vector<1x256xi1>, vector<1x256xf32>
    %c24_159 = arith.constant 24 : index
    %c0_160 = arith.constant 0 : index
    %191 = vector.load %arg24[%c24_159, %c0_160] : memref<144x256xf32, #tpu.memory_space<vmem>>, vector<1x256xf32>
    tpu.vector_store %arg24[%c24_159, %c0_160], %190 {strides = array<i32>} : memref<144x256xf32, #tpu.memory_space<vmem>>, vector<1x256xf32>,
    %c0_161 = arith.constant 0 : index
    %c0_162 = arith.constant 0 : index
    %192 = vector.load %arg24[%c0_161, %c0_162] : memref<144x256xf32, #tpu.memory_space<vmem>>, vector<25x256xf32>
    %193 = arith.truncf %192 : vector<25x256xf32> to vector<25x256xbf16>
    %c0_163 = arith.constant 0 : index
    %c0_164 = arith.constant 0 : index
    %194 = vector.load %arg3[%c0_163, %c0_164] : memref<4x25xbf16, #tpu.memory_space<vmem>>, vector<4x25xbf16>
    %cst_165 = arith.constant dense<0.000000e+00> : vector<4x256xf32>
    %195 = tpu.matmul %194, %193, %cst_165 {dimension_numbers = #tpu.dot_dimension_numbers<[1], [0], [0], [1], [0, 0, 1, 1], [], []>} : vector<4x25xbf16>, vector<25x256xbf16>, vector<4x256xf32> -> vector<4x256xf32>
    %c0_166 = arith.constant 0 : index
    %c0_167 = arith.constant 0 : index
    %196 = vector.load %arg4[%c0_166, %c0_167] : memref<4x2xf32, #tpu.memory_space<vmem>>, vector<4x1xf32>
    %197 = vector.broadcast %196 : vector<4x1xf32> to vector<4x256xf32>
    %198 = arith.mulf %195, %197 : vector<4x256xf32>
    %c0_168 = arith.constant 0 : index
    %c1_169 = arith.constant 1 : index
    %199 = vector.load %arg4[%c0_168, %c1_169] : memref<4x2xf32, #tpu.memory_space<vmem>>, vector<4x1xf32>
    %200 = vector.broadcast %199 : vector<4x1xf32> to vector<4x256xf32>
    %201 = arith.addf %198, %200 : vector<4x256xf32>
    %cst_170 = arith.constant 0.000000e+00 : f32
    %202 = vector.broadcast %cst_170 : f32 to vector<4x256xf32>
    %203 = arith.cmpf ogt, %201, %202 : vector<4x256xf32>
    %cst_171 = arith.constant 0.000000e+00 : f32
    %204 = vector.broadcast %cst_171 : f32 to vector<4x256xf32>
    %205 = arith.minimumf %201, %204 : vector<4x256xf32>
    %206 = math.exp %205 : vector<4x256xf32>
    %cst_172 = arith.constant 1.000000e+00 : f32
    %207 = vector.broadcast %cst_172 : f32 to vector<4x256xf32>
    %208 = arith.subf %206, %207 : vector<4x256xf32>
    %209 = arith.select %203, %201, %208 : vector<4x256xi1>, vector<4x256xf32>
    %c0_173 = arith.constant 0 : index
    %c128_174 = arith.constant 128 : index
    %210 = vector.load %arg23[%c0_173, %c128_174] : memref<16x512xf32, #tpu.memory_space<vmem>>, vector<4x256xf32>
    tpu.vector_store %arg23[%c0_173, %c128_174], %209 {strides = array<i32>} : memref<16x512xf32, #tpu.memory_space<vmem>>, vector<4x256xf32>,
    %c0_175 = arith.constant 0 : index
    %c111_176 = arith.constant 111 : index
    %211 = vector.load %arg23[%c0_175, %c111_176] : memref<16x512xf32, #tpu.memory_space<vmem>>, vector<4x256xf32>
    %c0_177 = arith.constant 0 : index
    %c0_178 = arith.constant 0 : index
    %212 = vector.load %arg15[%c0_177, %c0_178] : memref<9x256xf32, #tpu.memory_space<vmem>>, vector<1x256xf32>
    %cst_179 = arith.constant 0.000000e+00 : f32
    %213 = vector.broadcast %cst_179 : f32 to vector<1x256xf32>
    %214 = arith.cmpf one, %212, %213 : vector<1x256xf32>
    %cst_180 = arith.constant 0.000000e+00 : f32
    %215 = vector.shape_cast %214 : vector<1x256xi1> to vector<1x256xi1>
    %216 = vector.broadcast %215 : vector<1x256xi1> to vector<4x256xi1>
    %217 = vector.broadcast %cst_180 : f32 to vector<4x256xf32>
    %218 = arith.select %216, %211, %217 : vector<4x256xi1>, vector<4x256xf32>
    %c0_181 = arith.constant 0 : index
    %c0_182 = arith.constant 0 : index
    %219 = vector.load %arg24[%c0_181, %c0_182] : memref<144x256xf32, #tpu.memory_space<vmem>>, vector<4x256xf32>
    tpu.vector_store %arg24[%c0_181, %c0_182], %218 {strides = array<i32>} : memref<144x256xf32, #tpu.memory_space<vmem>>, vector<4x256xf32>,
    %c0_183 = arith.constant 0 : index
    %c112_184 = arith.constant 112 : index
    %220 = vector.load %arg23[%c0_183, %c112_184] : memref<16x512xf32, #tpu.memory_space<vmem>>, vector<4x256xf32>
    %c1_185 = arith.constant 1 : index
    %c0_186 = arith.constant 0 : index
    %221 = vector.load %arg15[%c1_185, %c0_186] : memref<9x256xf32, #tpu.memory_space<vmem>>, vector<1x256xf32>
    %cst_187 = arith.constant 0.000000e+00 : f32
    %222 = vector.broadcast %cst_187 : f32 to vector<1x256xf32>
    %223 = arith.cmpf one, %221, %222 : vector<1x256xf32>
    %cst_188 = arith.constant 0.000000e+00 : f32
    %224 = vector.shape_cast %223 : vector<1x256xi1> to vector<1x256xi1>
    %225 = vector.broadcast %224 : vector<1x256xi1> to vector<4x256xi1>
    %226 = vector.broadcast %cst_188 : f32 to vector<4x256xf32>
    %227 = arith.select %225, %220, %226 : vector<4x256xi1>, vector<4x256xf32>
    %c4_189 = arith.constant 4 : index
    %c0_190 = arith.constant 0 : index
    %228 = vector.load %arg24[%c4_189, %c0_190] : memref<144x256xf32, #tpu.memory_space<vmem>>, vector<4x256xf32>
    tpu.vector_store %arg24[%c4_189, %c0_190], %227 {strides = array<i32>} : memref<144x256xf32, #tpu.memory_space<vmem>>, vector<4x256xf32>,
    %c0_191 = arith.constant 0 : index
    %c113_192 = arith.constant 113 : index
    %229 = vector.load %arg23[%c0_191, %c113_192] : memref<16x512xf32, #tpu.memory_space<vmem>>, vector<4x256xf32>
    %c2_193 = arith.constant 2 : index
    %c0_194 = arith.constant 0 : index
    %230 = vector.load %arg15[%c2_193, %c0_194] : memref<9x256xf32, #tpu.memory_space<vmem>>, vector<1x256xf32>
    %cst_195 = arith.constant 0.000000e+00 : f32
    %231 = vector.broadcast %cst_195 : f32 to vector<1x256xf32>
    %232 = arith.cmpf one, %230, %231 : vector<1x256xf32>
    %cst_196 = arith.constant 0.000000e+00 : f32
    %233 = vector.shape_cast %232 : vector<1x256xi1> to vector<1x256xi1>
    %234 = vector.broadcast %233 : vector<1x256xi1> to vector<4x256xi1>
    %235 = vector.broadcast %cst_196 : f32 to vector<4x256xf32>
    %236 = arith.select %234, %229, %235 : vector<4x256xi1>, vector<4x256xf32>
    %c8_197 = arith.constant 8 : index
    %c0_198 = arith.constant 0 : index
    %237 = vector.load %arg24[%c8_197, %c0_198] : memref<144x256xf32, #tpu.memory_space<vmem>>, vector<4x256xf32>
    tpu.vector_store %arg24[%c8_197, %c0_198], %236 {strides = array<i32>} : memref<144x256xf32, #tpu.memory_space<vmem>>, vector<4x256xf32>,
    %c0_199 = arith.constant 0 : index
    %c127_200 = arith.constant 127 : index
    %238 = vector.load %arg23[%c0_199, %c127_200] : memref<16x512xf32, #tpu.memory_space<vmem>>, vector<4x256xf32>
    %c3_201 = arith.constant 3 : index
    %c0_202 = arith.constant 0 : index
    %239 = vector.load %arg15[%c3_201, %c0_202] : memref<9x256xf32, #tpu.memory_space<vmem>>, vector<1x256xf32>
    %cst_203 = arith.constant 0.000000e+00 : f32
    %240 = vector.broadcast %cst_203 : f32 to vector<1x256xf32>
    %241 = arith.cmpf one, %239, %240 : vector<1x256xf32>
    %cst_204 = arith.constant 0.000000e+00 : f32
    %242 = vector.shape_cast %241 : vector<1x256xi1> to vector<1x256xi1>
    %243 = vector.broadcast %242 : vector<1x256xi1> to vector<4x256xi1>
    %244 = vector.broadcast %cst_204 : f32 to vector<4x256xf32>
    %245 = arith.select %243, %238, %244 : vector<4x256xi1>, vector<4x256xf32>
    %c12_205 = arith.constant 12 : index
    %c0_206 = arith.constant 0 : index
    %246 = vector.load %arg24[%c12_205, %c0_206] : memref<144x256xf32, #tpu.memory_space<vmem>>, vector<4x256xf32>
    tpu.vector_store %arg24[%c12_205, %c0_206], %245 {strides = array<i32>} : memref<144x256xf32, #tpu.memory_space<vmem>>, vector<4x256xf32>,
    %c0_207 = arith.constant 0 : index
    %c128_208 = arith.constant 128 : index
    %247 = vector.load %arg23[%c0_207, %c128_208] : memref<16x512xf32, #tpu.memory_space<vmem>>, vector<4x256xf32>
    %c4_209 = arith.constant 4 : index
    %c0_210 = arith.constant 0 : index
    %248 = vector.load %arg15[%c4_209, %c0_210] : memref<9x256xf32, #tpu.memory_space<vmem>>, vector<1x256xf32>
    %cst_211 = arith.constant 0.000000e+00 : f32
    %249 = vector.broadcast %cst_211 : f32 to vector<1x256xf32>
    %250 = arith.cmpf one, %248, %249 : vector<1x256xf32>
    %cst_212 = arith.constant 0.000000e+00 : f32
    %251 = vector.shape_cast %250 : vector<1x256xi1> to vector<1x256xi1>
    %252 = vector.broadcast %251 : vector<1x256xi1> to vector<4x256xi1>
    %253 = vector.broadcast %cst_212 : f32 to vector<4x256xf32>
    %254 = arith.select %252, %247, %253 : vector<4x256xi1>, vector<4x256xf32>
    %c16_213 = arith.constant 16 : index
    %c0_214 = arith.constant 0 : index
    %255 = vector.load %arg24[%c16_213, %c0_214] : memref<144x256xf32, #tpu.memory_space<vmem>>, vector<4x256xf32>
    tpu.vector_store %arg24[%c16_213, %c0_214], %254 {strides = array<i32>} : memref<144x256xf32, #tpu.memory_space<vmem>>, vector<4x256xf32>,
    %c0_215 = arith.constant 0 : index
    %c129_216 = arith.constant 129 : index
    %256 = vector.load %arg23[%c0_215, %c129_216] : memref<16x512xf32, #tpu.memory_space<vmem>>, vector<4x256xf32>
    %c5_217 = arith.constant 5 : index
    %c0_218 = arith.constant 0 : index
    %257 = vector.load %arg15[%c5_217, %c0_218] : memref<9x256xf32, #tpu.memory_space<vmem>>, vector<1x256xf32>
    %cst_219 = arith.constant 0.000000e+00 : f32
    %258 = vector.broadcast %cst_219 : f32 to vector<1x256xf32>
    %259 = arith.cmpf one, %257, %258 : vector<1x256xf32>
    %cst_220 = arith.constant 0.000000e+00 : f32
    %260 = vector.shape_cast %259 : vector<1x256xi1> to vector<1x256xi1>
    %261 = vector.broadcast %260 : vector<1x256xi1> to vector<4x256xi1>
    %262 = vector.broadcast %cst_220 : f32 to vector<4x256xf32>
    %263 = arith.select %261, %256, %262 : vector<4x256xi1>, vector<4x256xf32>
    %c20_221 = arith.constant 20 : index
    %c0_222 = arith.constant 0 : index
    %264 = vector.load %arg24[%c20_221, %c0_222] : memref<144x256xf32, #tpu.memory_space<vmem>>, vector<4x256xf32>
    tpu.vector_store %arg24[%c20_221, %c0_222], %263 {strides = array<i32>} : memref<144x256xf32, #tpu.memory_space<vmem>>, vector<4x256xf32>,
    %c0_223 = arith.constant 0 : index
    %c143_224 = arith.constant 143 : index
    %265 = vector.load %arg23[%c0_223, %c143_224] : memref<16x512xf32, #tpu.memory_space<vmem>>, vector<4x256xf32>
    %c6_225 = arith.constant 6 : index
    %c0_226 = arith.constant 0 : index
    %266 = vector.load %arg15[%c6_225, %c0_226] : memref<9x256xf32, #tpu.memory_space<vmem>>, vector<1x256xf32>
    %cst_227 = arith.constant 0.000000e+00 : f32
    %267 = vector.broadcast %cst_227 : f32 to vector<1x256xf32>
    %268 = arith.cmpf one, %266, %267 : vector<1x256xf32>
    %cst_228 = arith.constant 0.000000e+00 : f32
    %269 = vector.shape_cast %268 : vector<1x256xi1> to vector<1x256xi1>
    %270 = vector.broadcast %269 : vector<1x256xi1> to vector<4x256xi1>
    %271 = vector.broadcast %cst_228 : f32 to vector<4x256xf32>
    %272 = arith.select %270, %265, %271 : vector<4x256xi1>, vector<4x256xf32>
    %c24_229 = arith.constant 24 : index
    %c0_230 = arith.constant 0 : index
    %273 = vector.load %arg24[%c24_229, %c0_230] : memref<144x256xf32, #tpu.memory_space<vmem>>, vector<4x256xf32>
    tpu.vector_store %arg24[%c24_229, %c0_230], %272 {strides = array<i32>} : memref<144x256xf32, #tpu.memory_space<vmem>>, vector<4x256xf32>,
    %c0_231 = arith.constant 0 : index
    %c144_232 = arith.constant 144 : index
    %274 = vector.load %arg23[%c0_231, %c144_232] : memref<16x512xf32, #tpu.memory_space<vmem>>, vector<4x256xf32>
    %c7_233 = arith.constant 7 : index
    %c0_234 = arith.constant 0 : index
    %275 = vector.load %arg15[%c7_233, %c0_234] : memref<9x256xf32, #tpu.memory_space<vmem>>, vector<1x256xf32>
    %cst_235 = arith.constant 0.000000e+00 : f32
    %276 = vector.broadcast %cst_235 : f32 to vector<1x256xf32>
    %277 = arith.cmpf one, %275, %276 : vector<1x256xf32>
    %cst_236 = arith.constant 0.000000e+00 : f32
    %278 = vector.shape_cast %277 : vector<1x256xi1> to vector<1x256xi1>
    %279 = vector.broadcast %278 : vector<1x256xi1> to vector<4x256xi1>
    %280 = vector.broadcast %cst_236 : f32 to vector<4x256xf32>
    %281 = arith.select %279, %274, %280 : vector<4x256xi1>, vector<4x256xf32>
    %c28 = arith.constant 28 : index
    %c0_237 = arith.constant 0 : index
    %282 = vector.load %arg24[%c28, %c0_237] : memref<144x256xf32, #tpu.memory_space<vmem>>, vector<4x256xf32>
    tpu.vector_store %arg24[%c28, %c0_237], %281 {strides = array<i32>} : memref<144x256xf32, #tpu.memory_space<vmem>>, vector<4x256xf32>,
    %c0_238 = arith.constant 0 : index
    %c145_239 = arith.constant 145 : index
    %283 = vector.load %arg23[%c0_238, %c145_239] : memref<16x512xf32, #tpu.memory_space<vmem>>, vector<4x256xf32>
    %c8_240 = arith.constant 8 : index
    %c0_241 = arith.constant 0 : index
    %284 = vector.load %arg15[%c8_240, %c0_241] : memref<9x256xf32, #tpu.memory_space<vmem>>, vector<1x256xf32>
    %cst_242 = arith.constant 0.000000e+00 : f32
    %285 = vector.broadcast %cst_242 : f32 to vector<1x256xf32>
    %286 = arith.cmpf one, %284, %285 : vector<1x256xf32>
    %cst_243 = arith.constant 0.000000e+00 : f32
    %287 = vector.shape_cast %286 : vector<1x256xi1> to vector<1x256xi1>
    %288 = vector.broadcast %287 : vector<1x256xi1> to vector<4x256xi1>
    %289 = vector.broadcast %cst_243 : f32 to vector<4x256xf32>
    %290 = arith.select %288, %283, %289 : vector<4x256xi1>, vector<4x256xf32>
    %c32 = arith.constant 32 : index
    %c0_244 = arith.constant 0 : index
    %291 = vector.load %arg24[%c32, %c0_244] : memref<144x256xf32, #tpu.memory_space<vmem>>, vector<4x256xf32>
    tpu.vector_store %arg24[%c32, %c0_244], %290 {strides = array<i32>} : memref<144x256xf32, #tpu.memory_space<vmem>>, vector<4x256xf32>,
    %c0_245 = arith.constant 0 : index
    %c0_246 = arith.constant 0 : index
    %292 = vector.load %arg24[%c0_245, %c0_246] : memref<144x256xf32, #tpu.memory_space<vmem>>, vector<36x256xf32>
    %293 = arith.truncf %292 : vector<36x256xf32> to vector<36x256xbf16>
    %c0_247 = arith.constant 0 : index
    %c0_248 = arith.constant 0 : index
    %294 = vector.load %arg5[%c0_247, %c0_248] : memref<4x36xbf16, #tpu.memory_space<vmem>>, vector<4x36xbf16>
    %cst_249 = arith.constant dense<0.000000e+00> : vector<4x256xf32>
    %295 = tpu.matmul %294, %293, %cst_249 {dimension_numbers = #tpu.dot_dimension_numbers<[1], [0], [0], [1], [0, 0, 1, 1], [], []>} : vector<4x36xbf16>, vector<36x256xbf16>, vector<4x256xf32> -> vector<4x256xf32>
    %c0_250 = arith.constant 0 : index
    %c128_251 = arith.constant 128 : index
    %296 = vector.load %arg23[%c0_250, %c128_251] : memref<16x512xf32, #tpu.memory_space<vmem>>, vector<4x256xf32>
    tpu.vector_store %arg23[%c0_250, %c128_251], %295 {strides = array<i32>} : memref<16x512xf32, #tpu.memory_space<vmem>>, vector<4x256xf32>,
    %c0_252 = arith.constant 0 : index
    %c111_253 = arith.constant 111 : index
    %297 = vector.load %arg23[%c0_252, %c111_253] : memref<16x512xf32, #tpu.memory_space<vmem>>, vector<4x256xf32>
    %c0_254 = arith.constant 0 : index
    %c0_255 = arith.constant 0 : index
    %298 = vector.load %arg15[%c0_254, %c0_255] : memref<9x256xf32, #tpu.memory_space<vmem>>, vector<1x256xf32>
    %cst_256 = arith.constant 0.000000e+00 : f32
    %299 = vector.broadcast %cst_256 : f32 to vector<1x256xf32>
    %300 = arith.cmpf one, %298, %299 : vector<1x256xf32>
    %cst_257 = arith.constant -1.000000e+30 : f32
    %301 = vector.shape_cast %300 : vector<1x256xi1> to vector<1x256xi1>
    %302 = vector.broadcast %301 : vector<1x256xi1> to vector<4x256xi1>
    %303 = vector.broadcast %cst_257 : f32 to vector<4x256xf32>
    %304 = arith.select %302, %297, %303 : vector<4x256xi1>, vector<4x256xf32>
    %305 = arith.maximumf %295, %304 : vector<4x256xf32>
    %c0_258 = arith.constant 0 : index
    %c112_259 = arith.constant 112 : index
    %306 = vector.load %arg23[%c0_258, %c112_259] : memref<16x512xf32, #tpu.memory_space<vmem>>, vector<4x256xf32>
    %c1_260 = arith.constant 1 : index
    %c0_261 = arith.constant 0 : index
    %307 = vector.load %arg15[%c1_260, %c0_261] : memref<9x256xf32, #tpu.memory_space<vmem>>, vector<1x256xf32>
    %cst_262 = arith.constant 0.000000e+00 : f32
    %308 = vector.broadcast %cst_262 : f32 to vector<1x256xf32>
    %309 = arith.cmpf one, %307, %308 : vector<1x256xf32>
    %cst_263 = arith.constant -1.000000e+30 : f32
    %310 = vector.shape_cast %309 : vector<1x256xi1> to vector<1x256xi1>
    %311 = vector.broadcast %310 : vector<1x256xi1> to vector<4x256xi1>
    %312 = vector.broadcast %cst_263 : f32 to vector<4x256xf32>
    %313 = arith.select %311, %306, %312 : vector<4x256xi1>, vector<4x256xf32>
    %314 = arith.maximumf %305, %313 : vector<4x256xf32>
    %c0_264 = arith.constant 0 : index
    %c113_265 = arith.constant 113 : index
    %315 = vector.load %arg23[%c0_264, %c113_265] : memref<16x512xf32, #tpu.memory_space<vmem>>, vector<4x256xf32>
    %c2_266 = arith.constant 2 : index
    %c0_267 = arith.constant 0 : index
    %316 = vector.load %arg15[%c2_266, %c0_267] : memref<9x256xf32, #tpu.memory_space<vmem>>, vector<1x256xf32>
    %cst_268 = arith.constant 0.000000e+00 : f32
    %317 = vector.broadcast %cst_268 : f32 to vector<1x256xf32>
    %318 = arith.cmpf one, %316, %317 : vector<1x256xf32>
    %cst_269 = arith.constant -1.000000e+30 : f32
    %319 = vector.shape_cast %318 : vector<1x256xi1> to vector<1x256xi1>
    %320 = vector.broadcast %319 : vector<1x256xi1> to vector<4x256xi1>
    %321 = vector.broadcast %cst_269 : f32 to vector<4x256xf32>
    %322 = arith.select %320, %315, %321 : vector<4x256xi1>, vector<4x256xf32>
    %323 = arith.maximumf %314, %322 : vector<4x256xf32>
    %c0_270 = arith.constant 0 : index
    %c127_271 = arith.constant 127 : index
    %324 = vector.load %arg23[%c0_270, %c127_271] : memref<16x512xf32, #tpu.memory_space<vmem>>, vector<4x256xf32>
    %c3_272 = arith.constant 3 : index
    %c0_273 = arith.constant 0 : index
    %325 = vector.load %arg15[%c3_272, %c0_273] : memref<9x256xf32, #tpu.memory_space<vmem>>, vector<1x256xf32>
    %cst_274 = arith.constant 0.000000e+00 : f32
    %326 = vector.broadcast %cst_274 : f32 to vector<1x256xf32>
    %327 = arith.cmpf one, %325, %326 : vector<1x256xf32>
    %cst_275 = arith.constant -1.000000e+30 : f32
    %328 = vector.shape_cast %327 : vector<1x256xi1> to vector<1x256xi1>
    %329 = vector.broadcast %328 : vector<1x256xi1> to vector<4x256xi1>
    %330 = vector.broadcast %cst_275 : f32 to vector<4x256xf32>
    %331 = arith.select %329, %324, %330 : vector<4x256xi1>, vector<4x256xf32>
    %332 = arith.maximumf %323, %331 : vector<4x256xf32>
    %c0_276 = arith.constant 0 : index
    %c129_277 = arith.constant 129 : index
    %333 = vector.load %arg23[%c0_276, %c129_277] : memref<16x512xf32, #tpu.memory_space<vmem>>, vector<4x256xf32>
    %c5_278 = arith.constant 5 : index
    %c0_279 = arith.constant 0 : index
    %334 = vector.load %arg15[%c5_278, %c0_279] : memref<9x256xf32, #tpu.memory_space<vmem>>, vector<1x256xf32>
    %cst_280 = arith.constant 0.000000e+00 : f32
    %335 = vector.broadcast %cst_280 : f32 to vector<1x256xf32>
    %336 = arith.cmpf one, %334, %335 : vector<1x256xf32>
    %cst_281 = arith.constant -1.000000e+30 : f32
    %337 = vector.shape_cast %336 : vector<1x256xi1> to vector<1x256xi1>
    %338 = vector.broadcast %337 : vector<1x256xi1> to vector<4x256xi1>
    %339 = vector.broadcast %cst_281 : f32 to vector<4x256xf32>
    %340 = arith.select %338, %333, %339 : vector<4x256xi1>, vector<4x256xf32>
    %341 = arith.maximumf %332, %340 : vector<4x256xf32>
    %c0_282 = arith.constant 0 : index
    %c143_283 = arith.constant 143 : index
    %342 = vector.load %arg23[%c0_282, %c143_283] : memref<16x512xf32, #tpu.memory_space<vmem>>, vector<4x256xf32>
    %c6_284 = arith.constant 6 : index
    %c0_285 = arith.constant 0 : index
    %343 = vector.load %arg15[%c6_284, %c0_285] : memref<9x256xf32, #tpu.memory_space<vmem>>, vector<1x256xf32>
    %cst_286 = arith.constant 0.000000e+00 : f32
    %344 = vector.broadcast %cst_286 : f32 to vector<1x256xf32>
    %345 = arith.cmpf one, %343, %344 : vector<1x256xf32>
    %cst_287 = arith.constant -1.000000e+30 : f32
    %346 = vector.shape_cast %345 : vector<1x256xi1> to vector<1x256xi1>
    %347 = vector.broadcast %346 : vector<1x256xi1> to vector<4x256xi1>
    %348 = vector.broadcast %cst_287 : f32 to vector<4x256xf32>
    %349 = arith.select %347, %342, %348 : vector<4x256xi1>, vector<4x256xf32>
    %350 = arith.maximumf %341, %349 : vector<4x256xf32>
    %c0_288 = arith.constant 0 : index
    %c144_289 = arith.constant 144 : index
    %351 = vector.load %arg23[%c0_288, %c144_289] : memref<16x512xf32, #tpu.memory_space<vmem>>, vector<4x256xf32>
    %c7_290 = arith.constant 7 : index
    %c0_291 = arith.constant 0 : index
    %352 = vector.load %arg15[%c7_290, %c0_291] : memref<9x256xf32, #tpu.memory_space<vmem>>, vector<1x256xf32>
    %cst_292 = arith.constant 0.000000e+00 : f32
    %353 = vector.broadcast %cst_292 : f32 to vector<1x256xf32>
    %354 = arith.cmpf one, %352, %353 : vector<1x256xf32>
    %cst_293 = arith.constant -1.000000e+30 : f32
    %355 = vector.shape_cast %354 : vector<1x256xi1> to vector<1x256xi1>
    %356 = vector.broadcast %355 : vector<1x256xi1> to vector<4x256xi1>
    %357 = vector.broadcast %cst_293 : f32 to vector<4x256xf32>
    %358 = arith.select %356, %351, %357 : vector<4x256xi1>, vector<4x256xf32>
    %359 = arith.maximumf %350, %358 : vector<4x256xf32>
    %c0_294 = arith.constant 0 : index
    %c145_295 = arith.constant 145 : index
    %360 = vector.load %arg23[%c0_294, %c145_295] : memref<16x512xf32, #tpu.memory_space<vmem>>, vector<4x256xf32>
    %c8_296 = arith.constant 8 : index
    %c0_297 = arith.constant 0 : index
    %361 = vector.load %arg15[%c8_296, %c0_297] : memref<9x256xf32, #tpu.memory_space<vmem>>, vector<1x256xf32>
    %cst_298 = arith.constant 0.000000e+00 : f32
    %362 = vector.broadcast %cst_298 : f32 to vector<1x256xf32>
    %363 = arith.cmpf one, %361, %362 : vector<1x256xf32>
    %cst_299 = arith.constant -1.000000e+30 : f32
    %364 = vector.shape_cast %363 : vector<1x256xi1> to vector<1x256xi1>
    %365 = vector.broadcast %364 : vector<1x256xi1> to vector<4x256xi1>
    %366 = vector.broadcast %cst_299 : f32 to vector<4x256xf32>
    %367 = arith.select %365, %360, %366 : vector<4x256xi1>, vector<4x256xf32>
    %368 = arith.maximumf %359, %367 : vector<4x256xf32>
    %c0_300 = arith.constant 0 : index
    %c0_301 = arith.constant 0 : index
    %369 = vector.load %arg18[%c0_300, %c0_301] : memref<256x49xf32, #tpu.memory_space<vmem>>, vector<256x49xf32>
    %cst_302 = arith.constant dense<0.000000e+00> : vector<4x49xf32>
    %370 = tpu.matmul %368, %369, %cst_302 {dimension_numbers = #tpu.dot_dimension_numbers<[1], [0], [0], [1], [0, 0, 1, 1], [], []>} : vector<4x256xf32>, vector<256x49xf32>, vector<4x49xf32> -> vector<4x49xf32>
    %c0_303 = arith.constant 0 : index
    %c0_304 = arith.constant 0 : index
    %371 = vector.load %arg6[%c0_303, %c0_304] : memref<4x2xf32, #tpu.memory_space<vmem>>, vector<4x1xf32>
    %372 = vector.broadcast %371 : vector<4x1xf32> to vector<4x49xf32>
    %373 = arith.mulf %370, %372 : vector<4x49xf32>
    %c0_305 = arith.constant 0 : index
    %c1_306 = arith.constant 1 : index
    %374 = vector.load %arg6[%c0_305, %c1_306] : memref<4x2xf32, #tpu.memory_space<vmem>>, vector<4x1xf32>
    %375 = vector.broadcast %374 : vector<4x1xf32> to vector<4x49xf32>
    %376 = arith.addf %373, %375 : vector<4x49xf32>
    %cst_307 = arith.constant 0.000000e+00 : f32
    %377 = vector.broadcast %cst_307 : f32 to vector<4x49xf32>
    %378 = arith.cmpf ogt, %376, %377 : vector<4x49xf32>
    %cst_308 = arith.constant 0.000000e+00 : f32
    %379 = vector.broadcast %cst_308 : f32 to vector<4x49xf32>
    %380 = arith.minimumf %376, %379 : vector<4x49xf32>
    %381 = math.exp %380 : vector<4x49xf32>
    %cst_309 = arith.constant 1.000000e+00 : f32
    %382 = vector.broadcast %cst_309 : f32 to vector<4x49xf32>
    %383 = arith.subf %381, %382 : vector<4x49xf32>
    %384 = arith.select %378, %376, %383 : vector<4x49xi1>, vector<4x49xf32>
    %c0_310 = arith.constant 0 : index
    %c128_311 = arith.constant 128 : index
    %385 = vector.load %arg23[%c0_310, %c128_311] : memref<16x512xf32, #tpu.memory_space<vmem>>, vector<4x49xf32>
    tpu.vector_store %arg23[%c0_310, %c128_311], %384 {strides = array<i32>} : memref<16x512xf32, #tpu.memory_space<vmem>>, vector<4x49xf32>,
    %c0_312 = arith.constant 0 : index
    %c120 = arith.constant 120 : index
    %386 = vector.load %arg23[%c0_312, %c120] : memref<16x512xf32, #tpu.memory_space<vmem>>, vector<4x49xf32>
    %c0_313 = arith.constant 0 : index
    %c0_314 = arith.constant 0 : index
    %387 = vector.load %arg16[%c0_313, %c0_314] : memref<9x49xf32, #tpu.memory_space<vmem>>, vector<1x49xf32>
    %cst_315 = arith.constant 0.000000e+00 : f32
    %388 = vector.broadcast %cst_315 : f32 to vector<1x49xf32>
    %389 = arith.cmpf one, %387, %388 : vector<1x49xf32>
    %cst_316 = arith.constant 0.000000e+00 : f32
    %390 = vector.shape_cast %389 : vector<1x49xi1> to vector<1x49xi1>
    %391 = vector.broadcast %390 : vector<1x49xi1> to vector<4x49xi1>
    %392 = vector.broadcast %cst_316 : f32 to vector<4x49xf32>
    %393 = arith.select %391, %386, %392 : vector<4x49xi1>, vector<4x49xf32>
    %c0_317 = arith.constant 0 : index
    %c0_318 = arith.constant 0 : index
    %394 = vector.load %arg24[%c0_317, %c0_318] : memref<144x256xf32, #tpu.memory_space<vmem>>, vector<4x49xf32>
    tpu.vector_store %arg24[%c0_317, %c0_318], %393 {strides = array<i32>} : memref<144x256xf32, #tpu.memory_space<vmem>>, vector<4x49xf32>,
    %c0_319 = arith.constant 0 : index
    %c121 = arith.constant 121 : index
    %395 = vector.load %arg23[%c0_319, %c121] : memref<16x512xf32, #tpu.memory_space<vmem>>, vector<4x49xf32>
    %c1_320 = arith.constant 1 : index
    %c0_321 = arith.constant 0 : index
    %396 = vector.load %arg16[%c1_320, %c0_321] : memref<9x49xf32, #tpu.memory_space<vmem>>, vector<1x49xf32>
    %cst_322 = arith.constant 0.000000e+00 : f32
    %397 = vector.broadcast %cst_322 : f32 to vector<1x49xf32>
    %398 = arith.cmpf one, %396, %397 : vector<1x49xf32>
    %cst_323 = arith.constant 0.000000e+00 : f32
    %399 = vector.shape_cast %398 : vector<1x49xi1> to vector<1x49xi1>
    %400 = vector.broadcast %399 : vector<1x49xi1> to vector<4x49xi1>
    %401 = vector.broadcast %cst_323 : f32 to vector<4x49xf32>
    %402 = arith.select %400, %395, %401 : vector<4x49xi1>, vector<4x49xf32>
    %c4_324 = arith.constant 4 : index
    %c0_325 = arith.constant 0 : index
    %403 = vector.load %arg24[%c4_324, %c0_325] : memref<144x256xf32, #tpu.memory_space<vmem>>, vector<4x49xf32>
    tpu.vector_store %arg24[%c4_324, %c0_325], %402 {strides = array<i32>} : memref<144x256xf32, #tpu.memory_space<vmem>>, vector<4x49xf32>,
    %c0_326 = arith.constant 0 : index
    %c122 = arith.constant 122 : index
    %404 = vector.load %arg23[%c0_326, %c122] : memref<16x512xf32, #tpu.memory_space<vmem>>, vector<4x49xf32>
    %c2_327 = arith.constant 2 : index
    %c0_328 = arith.constant 0 : index
    %405 = vector.load %arg16[%c2_327, %c0_328] : memref<9x49xf32, #tpu.memory_space<vmem>>, vector<1x49xf32>
    %cst_329 = arith.constant 0.000000e+00 : f32
    %406 = vector.broadcast %cst_329 : f32 to vector<1x49xf32>
    %407 = arith.cmpf one, %405, %406 : vector<1x49xf32>
    %cst_330 = arith.constant 0.000000e+00 : f32
    %408 = vector.shape_cast %407 : vector<1x49xi1> to vector<1x49xi1>
    %409 = vector.broadcast %408 : vector<1x49xi1> to vector<4x49xi1>
    %410 = vector.broadcast %cst_330 : f32 to vector<4x49xf32>
    %411 = arith.select %409, %404, %410 : vector<4x49xi1>, vector<4x49xf32>
    %c8_331 = arith.constant 8 : index
    %c0_332 = arith.constant 0 : index
    %412 = vector.load %arg24[%c8_331, %c0_332] : memref<144x256xf32, #tpu.memory_space<vmem>>, vector<4x49xf32>
    tpu.vector_store %arg24[%c8_331, %c0_332], %411 {strides = array<i32>} : memref<144x256xf32, #tpu.memory_space<vmem>>, vector<4x49xf32>,
    %c0_333 = arith.constant 0 : index
    %c127_334 = arith.constant 127 : index
    %413 = vector.load %arg23[%c0_333, %c127_334] : memref<16x512xf32, #tpu.memory_space<vmem>>, vector<4x49xf32>
    %c3_335 = arith.constant 3 : index
    %c0_336 = arith.constant 0 : index
    %414 = vector.load %arg16[%c3_335, %c0_336] : memref<9x49xf32, #tpu.memory_space<vmem>>, vector<1x49xf32>
    %cst_337 = arith.constant 0.000000e+00 : f32
    %415 = vector.broadcast %cst_337 : f32 to vector<1x49xf32>
    %416 = arith.cmpf one, %414, %415 : vector<1x49xf32>
    %cst_338 = arith.constant 0.000000e+00 : f32
    %417 = vector.shape_cast %416 : vector<1x49xi1> to vector<1x49xi1>
    %418 = vector.broadcast %417 : vector<1x49xi1> to vector<4x49xi1>
    %419 = vector.broadcast %cst_338 : f32 to vector<4x49xf32>
    %420 = arith.select %418, %413, %419 : vector<4x49xi1>, vector<4x49xf32>
    %c12_339 = arith.constant 12 : index
    %c0_340 = arith.constant 0 : index
    %421 = vector.load %arg24[%c12_339, %c0_340] : memref<144x256xf32, #tpu.memory_space<vmem>>, vector<4x49xf32>
    tpu.vector_store %arg24[%c12_339, %c0_340], %420 {strides = array<i32>} : memref<144x256xf32, #tpu.memory_space<vmem>>, vector<4x49xf32>,
    %c0_341 = arith.constant 0 : index
    %c128_342 = arith.constant 128 : index
    %422 = vector.load %arg23[%c0_341, %c128_342] : memref<16x512xf32, #tpu.memory_space<vmem>>, vector<4x49xf32>
    %c4_343 = arith.constant 4 : index
    %c0_344 = arith.constant 0 : index
    %423 = vector.load %arg16[%c4_343, %c0_344] : memref<9x49xf32, #tpu.memory_space<vmem>>, vector<1x49xf32>
    %cst_345 = arith.constant 0.000000e+00 : f32
    %424 = vector.broadcast %cst_345 : f32 to vector<1x49xf32>
    %425 = arith.cmpf one, %423, %424 : vector<1x49xf32>
    %cst_346 = arith.constant 0.000000e+00 : f32
    %426 = vector.shape_cast %425 : vector<1x49xi1> to vector<1x49xi1>
    %427 = vector.broadcast %426 : vector<1x49xi1> to vector<4x49xi1>
    %428 = vector.broadcast %cst_346 : f32 to vector<4x49xf32>
    %429 = arith.select %427, %422, %428 : vector<4x49xi1>, vector<4x49xf32>
    %c16_347 = arith.constant 16 : index
    %c0_348 = arith.constant 0 : index
    %430 = vector.load %arg24[%c16_347, %c0_348] : memref<144x256xf32, #tpu.memory_space<vmem>>, vector<4x49xf32>
    tpu.vector_store %arg24[%c16_347, %c0_348], %429 {strides = array<i32>} : memref<144x256xf32, #tpu.memory_space<vmem>>, vector<4x49xf32>,
    %c0_349 = arith.constant 0 : index
    %c129_350 = arith.constant 129 : index
    %431 = vector.load %arg23[%c0_349, %c129_350] : memref<16x512xf32, #tpu.memory_space<vmem>>, vector<4x49xf32>
    %c5_351 = arith.constant 5 : index
    %c0_352 = arith.constant 0 : index
    %432 = vector.load %arg16[%c5_351, %c0_352] : memref<9x49xf32, #tpu.memory_space<vmem>>, vector<1x49xf32>
    %cst_353 = arith.constant 0.000000e+00 : f32
    %433 = vector.broadcast %cst_353 : f32 to vector<1x49xf32>
    %434 = arith.cmpf one, %432, %433 : vector<1x49xf32>
    %cst_354 = arith.constant 0.000000e+00 : f32
    %435 = vector.shape_cast %434 : vector<1x49xi1> to vector<1x49xi1>
    %436 = vector.broadcast %435 : vector<1x49xi1> to vector<4x49xi1>
    %437 = vector.broadcast %cst_354 : f32 to vector<4x49xf32>
    %438 = arith.select %436, %431, %437 : vector<4x49xi1>, vector<4x49xf32>
    %c20_355 = arith.constant 20 : index
    %c0_356 = arith.constant 0 : index
    %439 = vector.load %arg24[%c20_355, %c0_356] : memref<144x256xf32, #tpu.memory_space<vmem>>, vector<4x49xf32>
    tpu.vector_store %arg24[%c20_355, %c0_356], %438 {strides = array<i32>} : memref<144x256xf32, #tpu.memory_space<vmem>>, vector<4x49xf32>,
    %c0_357 = arith.constant 0 : index
    %c134 = arith.constant 134 : index
    %440 = vector.load %arg23[%c0_357, %c134] : memref<16x512xf32, #tpu.memory_space<vmem>>, vector<4x49xf32>
    %c6_358 = arith.constant 6 : index
    %c0_359 = arith.constant 0 : index
    %441 = vector.load %arg16[%c6_358, %c0_359] : memref<9x49xf32, #tpu.memory_space<vmem>>, vector<1x49xf32>
    %cst_360 = arith.constant 0.000000e+00 : f32
    %442 = vector.broadcast %cst_360 : f32 to vector<1x49xf32>
    %443 = arith.cmpf one, %441, %442 : vector<1x49xf32>
    %cst_361 = arith.constant 0.000000e+00 : f32
    %444 = vector.shape_cast %443 : vector<1x49xi1> to vector<1x49xi1>
    %445 = vector.broadcast %444 : vector<1x49xi1> to vector<4x49xi1>
    %446 = vector.broadcast %cst_361 : f32 to vector<4x49xf32>
    %447 = arith.select %445, %440, %446 : vector<4x49xi1>, vector<4x49xf32>
    %c24_362 = arith.constant 24 : index
    %c0_363 = arith.constant 0 : index
    %448 = vector.load %arg24[%c24_362, %c0_363] : memref<144x256xf32, #tpu.memory_space<vmem>>, vector<4x49xf32>
    tpu.vector_store %arg24[%c24_362, %c0_363], %447 {strides = array<i32>} : memref<144x256xf32, #tpu.memory_space<vmem>>, vector<4x49xf32>,
    %c0_364 = arith.constant 0 : index
    %c135 = arith.constant 135 : index
    %449 = vector.load %arg23[%c0_364, %c135] : memref<16x512xf32, #tpu.memory_space<vmem>>, vector<4x49xf32>
    %c7_365 = arith.constant 7 : index
    %c0_366 = arith.constant 0 : index
    %450 = vector.load %arg16[%c7_365, %c0_366] : memref<9x49xf32, #tpu.memory_space<vmem>>, vector<1x49xf32>
    %cst_367 = arith.constant 0.000000e+00 : f32
    %451 = vector.broadcast %cst_367 : f32 to vector<1x49xf32>
    %452 = arith.cmpf one, %450, %451 : vector<1x49xf32>
    %cst_368 = arith.constant 0.000000e+00 : f32
    %453 = vector.shape_cast %452 : vector<1x49xi1> to vector<1x49xi1>
    %454 = vector.broadcast %453 : vector<1x49xi1> to vector<4x49xi1>
    %455 = vector.broadcast %cst_368 : f32 to vector<4x49xf32>
    %456 = arith.select %454, %449, %455 : vector<4x49xi1>, vector<4x49xf32>
    %c28_369 = arith.constant 28 : index
    %c0_370 = arith.constant 0 : index
    %457 = vector.load %arg24[%c28_369, %c0_370] : memref<144x256xf32, #tpu.memory_space<vmem>>, vector<4x49xf32>
    tpu.vector_store %arg24[%c28_369, %c0_370], %456 {strides = array<i32>} : memref<144x256xf32, #tpu.memory_space<vmem>>, vector<4x49xf32>,
    %c0_371 = arith.constant 0 : index
    %c136 = arith.constant 136 : index
    %458 = vector.load %arg23[%c0_371, %c136] : memref<16x512xf32, #tpu.memory_space<vmem>>, vector<4x49xf32>
    %c8_372 = arith.constant 8 : index
    %c0_373 = arith.constant 0 : index
    %459 = vector.load %arg16[%c8_372, %c0_373] : memref<9x49xf32, #tpu.memory_space<vmem>>, vector<1x49xf32>
    %cst_374 = arith.constant 0.000000e+00 : f32
    %460 = vector.broadcast %cst_374 : f32 to vector<1x49xf32>
    %461 = arith.cmpf one, %459, %460 : vector<1x49xf32>
    %cst_375 = arith.constant 0.000000e+00 : f32
    %462 = vector.shape_cast %461 : vector<1x49xi1> to vector<1x49xi1>
    %463 = vector.broadcast %462 : vector<1x49xi1> to vector<4x49xi1>
    %464 = vector.broadcast %cst_375 : f32 to vector<4x49xf32>
    %465 = arith.select %463, %458, %464 : vector<4x49xi1>, vector<4x49xf32>
    %c32_376 = arith.constant 32 : index
    %c0_377 = arith.constant 0 : index
    %466 = vector.load %arg24[%c32_376, %c0_377] : memref<144x256xf32, #tpu.memory_space<vmem>>, vector<4x49xf32>
    tpu.vector_store %arg24[%c32_376, %c0_377], %465 {strides = array<i32>} : memref<144x256xf32, #tpu.memory_space<vmem>>, vector<4x49xf32>,
    %c0_378 = arith.constant 0 : index
    %c0_379 = arith.constant 0 : index
    %467 = vector.load %arg24[%c0_378, %c0_379] : memref<144x256xf32, #tpu.memory_space<vmem>>, vector<36x49xf32>
    %468 = arith.truncf %467 : vector<36x49xf32> to vector<36x49xbf16>
    %c0_380 = arith.constant 0 : index
    %c0_381 = arith.constant 0 : index
    %469 = vector.load %arg7[%c0_380, %c0_381] : memref<8x36xbf16, #tpu.memory_space<vmem>>, vector<8x36xbf16>
    %cst_382 = arith.constant dense<0.000000e+00> : vector<8x49xf32>
    %470 = tpu.matmul %469, %468, %cst_382 {dimension_numbers = #tpu.dot_dimension_numbers<[1], [0], [0], [1], [0, 0, 1, 1], [], []>} : vector<8x36xbf16>, vector<36x49xbf16>, vector<8x49xf32> -> vector<8x49xf32>
    %c0_383 = arith.constant 0 : index
    %c0_384 = arith.constant 0 : index
    %471 = vector.load %arg8[%c0_383, %c0_384] : memref<8x2xf32, #tpu.memory_space<vmem>>, vector<8x1xf32>
    %472 = vector.broadcast %471 : vector<8x1xf32> to vector<8x49xf32>
    %473 = arith.mulf %470, %472 : vector<8x49xf32>
    %c0_385 = arith.constant 0 : index
    %c1_386 = arith.constant 1 : index
    %474 = vector.load %arg8[%c0_385, %c1_386] : memref<8x2xf32, #tpu.memory_space<vmem>>, vector<8x1xf32>
    %475 = vector.broadcast %474 : vector<8x1xf32> to vector<8x49xf32>
    %476 = arith.addf %473, %475 : vector<8x49xf32>
    %cst_387 = arith.constant 0.000000e+00 : f32
    %477 = vector.broadcast %cst_387 : f32 to vector<8x49xf32>
    %478 = arith.cmpf ogt, %476, %477 : vector<8x49xf32>
    %cst_388 = arith.constant 0.000000e+00 : f32
    %479 = vector.broadcast %cst_388 : f32 to vector<8x49xf32>
    %480 = arith.minimumf %476, %479 : vector<8x49xf32>
    %481 = math.exp %480 : vector<8x49xf32>
    %cst_389 = arith.constant 1.000000e+00 : f32
    %482 = vector.broadcast %cst_389 : f32 to vector<8x49xf32>
    %483 = arith.subf %481, %482 : vector<8x49xf32>
    %484 = arith.select %478, %476, %483 : vector<8x49xi1>, vector<8x49xf32>
    %c0_390 = arith.constant 0 : index
    %c128_391 = arith.constant 128 : index
    %485 = vector.load %arg23[%c0_390, %c128_391] : memref<16x512xf32, #tpu.memory_space<vmem>>, vector<8x49xf32>
    tpu.vector_store %arg23[%c0_390, %c128_391], %484 {strides = array<i32>} : memref<16x512xf32, #tpu.memory_space<vmem>>, vector<8x49xf32>,
    %c0_392 = arith.constant 0 : index
    %c120_393 = arith.constant 120 : index
    %486 = vector.load %arg23[%c0_392, %c120_393] : memref<16x512xf32, #tpu.memory_space<vmem>>, vector<8x49xf32>
    %c0_394 = arith.constant 0 : index
    %c0_395 = arith.constant 0 : index
    %487 = vector.load %arg16[%c0_394, %c0_395] : memref<9x49xf32, #tpu.memory_space<vmem>>, vector<1x49xf32>
    %cst_396 = arith.constant 0.000000e+00 : f32
    %488 = vector.broadcast %cst_396 : f32 to vector<1x49xf32>
    %489 = arith.cmpf one, %487, %488 : vector<1x49xf32>
    %cst_397 = arith.constant 0.000000e+00 : f32
    %490 = vector.shape_cast %489 : vector<1x49xi1> to vector<1x49xi1>
    %491 = vector.broadcast %490 : vector<1x49xi1> to vector<8x49xi1>
    %492 = vector.broadcast %cst_397 : f32 to vector<8x49xf32>
    %493 = arith.select %491, %486, %492 : vector<8x49xi1>, vector<8x49xf32>
    %c0_398 = arith.constant 0 : index
    %c0_399 = arith.constant 0 : index
    %494 = vector.load %arg24[%c0_398, %c0_399] : memref<144x256xf32, #tpu.memory_space<vmem>>, vector<8x49xf32>
    tpu.vector_store %arg24[%c0_398, %c0_399], %493 {strides = array<i32>} : memref<144x256xf32, #tpu.memory_space<vmem>>, vector<8x49xf32>,
    %c0_400 = arith.constant 0 : index
    %c121_401 = arith.constant 121 : index
    %495 = vector.load %arg23[%c0_400, %c121_401] : memref<16x512xf32, #tpu.memory_space<vmem>>, vector<8x49xf32>
    %c1_402 = arith.constant 1 : index
    %c0_403 = arith.constant 0 : index
    %496 = vector.load %arg16[%c1_402, %c0_403] : memref<9x49xf32, #tpu.memory_space<vmem>>, vector<1x49xf32>
    %cst_404 = arith.constant 0.000000e+00 : f32
    %497 = vector.broadcast %cst_404 : f32 to vector<1x49xf32>
    %498 = arith.cmpf one, %496, %497 : vector<1x49xf32>
    %cst_405 = arith.constant 0.000000e+00 : f32
    %499 = vector.shape_cast %498 : vector<1x49xi1> to vector<1x49xi1>
    %500 = vector.broadcast %499 : vector<1x49xi1> to vector<8x49xi1>
    %501 = vector.broadcast %cst_405 : f32 to vector<8x49xf32>
    %502 = arith.select %500, %495, %501 : vector<8x49xi1>, vector<8x49xf32>
    %c8_406 = arith.constant 8 : index
    %c0_407 = arith.constant 0 : index
    %503 = vector.load %arg24[%c8_406, %c0_407] : memref<144x256xf32, #tpu.memory_space<vmem>>, vector<8x49xf32>
    tpu.vector_store %arg24[%c8_406, %c0_407], %502 {strides = array<i32>} : memref<144x256xf32, #tpu.memory_space<vmem>>, vector<8x49xf32>,
    %c0_408 = arith.constant 0 : index
    %c122_409 = arith.constant 122 : index
    %504 = vector.load %arg23[%c0_408, %c122_409] : memref<16x512xf32, #tpu.memory_space<vmem>>, vector<8x49xf32>
    %c2_410 = arith.constant 2 : index
    %c0_411 = arith.constant 0 : index
    %505 = vector.load %arg16[%c2_410, %c0_411] : memref<9x49xf32, #tpu.memory_space<vmem>>, vector<1x49xf32>
    %cst_412 = arith.constant 0.000000e+00 : f32
    %506 = vector.broadcast %cst_412 : f32 to vector<1x49xf32>
    %507 = arith.cmpf one, %505, %506 : vector<1x49xf32>
    %cst_413 = arith.constant 0.000000e+00 : f32
    %508 = vector.shape_cast %507 : vector<1x49xi1> to vector<1x49xi1>
    %509 = vector.broadcast %508 : vector<1x49xi1> to vector<8x49xi1>
    %510 = vector.broadcast %cst_413 : f32 to vector<8x49xf32>
    %511 = arith.select %509, %504, %510 : vector<8x49xi1>, vector<8x49xf32>
    %c16_414 = arith.constant 16 : index
    %c0_415 = arith.constant 0 : index
    %512 = vector.load %arg24[%c16_414, %c0_415] : memref<144x256xf32, #tpu.memory_space<vmem>>, vector<8x49xf32>
    tpu.vector_store %arg24[%c16_414, %c0_415], %511 {strides = array<i32>} : memref<144x256xf32, #tpu.memory_space<vmem>>, vector<8x49xf32>,
    %c0_416 = arith.constant 0 : index
    %c127_417 = arith.constant 127 : index
    %513 = vector.load %arg23[%c0_416, %c127_417] : memref<16x512xf32, #tpu.memory_space<vmem>>, vector<8x49xf32>
    %c3_418 = arith.constant 3 : index
    %c0_419 = arith.constant 0 : index
    %514 = vector.load %arg16[%c3_418, %c0_419] : memref<9x49xf32, #tpu.memory_space<vmem>>, vector<1x49xf32>
    %cst_420 = arith.constant 0.000000e+00 : f32
    %515 = vector.broadcast %cst_420 : f32 to vector<1x49xf32>
    %516 = arith.cmpf one, %514, %515 : vector<1x49xf32>
    %cst_421 = arith.constant 0.000000e+00 : f32
    %517 = vector.shape_cast %516 : vector<1x49xi1> to vector<1x49xi1>
    %518 = vector.broadcast %517 : vector<1x49xi1> to vector<8x49xi1>
    %519 = vector.broadcast %cst_421 : f32 to vector<8x49xf32>
    %520 = arith.select %518, %513, %519 : vector<8x49xi1>, vector<8x49xf32>
    %c24_422 = arith.constant 24 : index
    %c0_423 = arith.constant 0 : index
    %521 = vector.load %arg24[%c24_422, %c0_423] : memref<144x256xf32, #tpu.memory_space<vmem>>, vector<8x49xf32>
    tpu.vector_store %arg24[%c24_422, %c0_423], %520 {strides = array<i32>} : memref<144x256xf32, #tpu.memory_space<vmem>>, vector<8x49xf32>,
    %c0_424 = arith.constant 0 : index
    %c128_425 = arith.constant 128 : index
    %522 = vector.load %arg23[%c0_424, %c128_425] : memref<16x512xf32, #tpu.memory_space<vmem>>, vector<8x49xf32>
    %c4_426 = arith.constant 4 : index
    %c0_427 = arith.constant 0 : index
    %523 = vector.load %arg16[%c4_426, %c0_427] : memref<9x49xf32, #tpu.memory_space<vmem>>, vector<1x49xf32>
    %cst_428 = arith.constant 0.000000e+00 : f32
    %524 = vector.broadcast %cst_428 : f32 to vector<1x49xf32>
    %525 = arith.cmpf one, %523, %524 : vector<1x49xf32>
    %cst_429 = arith.constant 0.000000e+00 : f32
    %526 = vector.shape_cast %525 : vector<1x49xi1> to vector<1x49xi1>
    %527 = vector.broadcast %526 : vector<1x49xi1> to vector<8x49xi1>
    %528 = vector.broadcast %cst_429 : f32 to vector<8x49xf32>
    %529 = arith.select %527, %522, %528 : vector<8x49xi1>, vector<8x49xf32>
    %c32_430 = arith.constant 32 : index
    %c0_431 = arith.constant 0 : index
    %530 = vector.load %arg24[%c32_430, %c0_431] : memref<144x256xf32, #tpu.memory_space<vmem>>, vector<8x49xf32>
    tpu.vector_store %arg24[%c32_430, %c0_431], %529 {strides = array<i32>} : memref<144x256xf32, #tpu.memory_space<vmem>>, vector<8x49xf32>,
    %c0_432 = arith.constant 0 : index
    %c129_433 = arith.constant 129 : index
    %531 = vector.load %arg23[%c0_432, %c129_433] : memref<16x512xf32, #tpu.memory_space<vmem>>, vector<8x49xf32>
    %c5_434 = arith.constant 5 : index
    %c0_435 = arith.constant 0 : index
    %532 = vector.load %arg16[%c5_434, %c0_435] : memref<9x49xf32, #tpu.memory_space<vmem>>, vector<1x49xf32>
    %cst_436 = arith.constant 0.000000e+00 : f32
    %533 = vector.broadcast %cst_436 : f32 to vector<1x49xf32>
    %534 = arith.cmpf one, %532, %533 : vector<1x49xf32>
    %cst_437 = arith.constant 0.000000e+00 : f32
    %535 = vector.shape_cast %534 : vector<1x49xi1> to vector<1x49xi1>
    %536 = vector.broadcast %535 : vector<1x49xi1> to vector<8x49xi1>
    %537 = vector.broadcast %cst_437 : f32 to vector<8x49xf32>
    %538 = arith.select %536, %531, %537 : vector<8x49xi1>, vector<8x49xf32>
    %c40 = arith.constant 40 : index
    %c0_438 = arith.constant 0 : index
    %539 = vector.load %arg24[%c40, %c0_438] : memref<144x256xf32, #tpu.memory_space<vmem>>, vector<8x49xf32>
    tpu.vector_store %arg24[%c40, %c0_438], %538 {strides = array<i32>} : memref<144x256xf32, #tpu.memory_space<vmem>>, vector<8x49xf32>,
    %c0_439 = arith.constant 0 : index
    %c134_440 = arith.constant 134 : index
    %540 = vector.load %arg23[%c0_439, %c134_440] : memref<16x512xf32, #tpu.memory_space<vmem>>, vector<8x49xf32>
    %c6_441 = arith.constant 6 : index
    %c0_442 = arith.constant 0 : index
    %541 = vector.load %arg16[%c6_441, %c0_442] : memref<9x49xf32, #tpu.memory_space<vmem>>, vector<1x49xf32>
    %cst_443 = arith.constant 0.000000e+00 : f32
    %542 = vector.broadcast %cst_443 : f32 to vector<1x49xf32>
    %543 = arith.cmpf one, %541, %542 : vector<1x49xf32>
    %cst_444 = arith.constant 0.000000e+00 : f32
    %544 = vector.shape_cast %543 : vector<1x49xi1> to vector<1x49xi1>
    %545 = vector.broadcast %544 : vector<1x49xi1> to vector<8x49xi1>
    %546 = vector.broadcast %cst_444 : f32 to vector<8x49xf32>
    %547 = arith.select %545, %540, %546 : vector<8x49xi1>, vector<8x49xf32>
    %c48 = arith.constant 48 : index
    %c0_445 = arith.constant 0 : index
    %548 = vector.load %arg24[%c48, %c0_445] : memref<144x256xf32, #tpu.memory_space<vmem>>, vector<8x49xf32>
    tpu.vector_store %arg24[%c48, %c0_445], %547 {strides = array<i32>} : memref<144x256xf32, #tpu.memory_space<vmem>>, vector<8x49xf32>,
    %c0_446 = arith.constant 0 : index
    %c135_447 = arith.constant 135 : index
    %549 = vector.load %arg23[%c0_446, %c135_447] : memref<16x512xf32, #tpu.memory_space<vmem>>, vector<8x49xf32>
    %c7_448 = arith.constant 7 : index
    %c0_449 = arith.constant 0 : index
    %550 = vector.load %arg16[%c7_448, %c0_449] : memref<9x49xf32, #tpu.memory_space<vmem>>, vector<1x49xf32>
    %cst_450 = arith.constant 0.000000e+00 : f32
    %551 = vector.broadcast %cst_450 : f32 to vector<1x49xf32>
    %552 = arith.cmpf one, %550, %551 : vector<1x49xf32>
    %cst_451 = arith.constant 0.000000e+00 : f32
    %553 = vector.shape_cast %552 : vector<1x49xi1> to vector<1x49xi1>
    %554 = vector.broadcast %553 : vector<1x49xi1> to vector<8x49xi1>
    %555 = vector.broadcast %cst_451 : f32 to vector<8x49xf32>
    %556 = arith.select %554, %549, %555 : vector<8x49xi1>, vector<8x49xf32>
    %c56 = arith.constant 56 : index
    %c0_452 = arith.constant 0 : index
    %557 = vector.load %arg24[%c56, %c0_452] : memref<144x256xf32, #tpu.memory_space<vmem>>, vector<8x49xf32>
    tpu.vector_store %arg24[%c56, %c0_452], %556 {strides = array<i32>} : memref<144x256xf32, #tpu.memory_space<vmem>>, vector<8x49xf32>,
    %c0_453 = arith.constant 0 : index
    %c136_454 = arith.constant 136 : index
    %558 = vector.load %arg23[%c0_453, %c136_454] : memref<16x512xf32, #tpu.memory_space<vmem>>, vector<8x49xf32>
    %c8_455 = arith.constant 8 : index
    %c0_456 = arith.constant 0 : index
    %559 = vector.load %arg16[%c8_455, %c0_456] : memref<9x49xf32, #tpu.memory_space<vmem>>, vector<1x49xf32>
    %cst_457 = arith.constant 0.000000e+00 : f32
    %560 = vector.broadcast %cst_457 : f32 to vector<1x49xf32>
    %561 = arith.cmpf one, %559, %560 : vector<1x49xf32>
    %cst_458 = arith.constant 0.000000e+00 : f32
    %562 = vector.shape_cast %561 : vector<1x49xi1> to vector<1x49xi1>
    %563 = vector.broadcast %562 : vector<1x49xi1> to vector<8x49xi1>
    %564 = vector.broadcast %cst_458 : f32 to vector<8x49xf32>
    %565 = arith.select %563, %558, %564 : vector<8x49xi1>, vector<8x49xf32>
    %c64 = arith.constant 64 : index
    %c0_459 = arith.constant 0 : index
    %566 = vector.load %arg24[%c64, %c0_459] : memref<144x256xf32, #tpu.memory_space<vmem>>, vector<8x49xf32>
    tpu.vector_store %arg24[%c64, %c0_459], %565 {strides = array<i32>} : memref<144x256xf32, #tpu.memory_space<vmem>>, vector<8x49xf32>,
    %c0_460 = arith.constant 0 : index
    %c0_461 = arith.constant 0 : index
    %567 = vector.load %arg24[%c0_460, %c0_461] : memref<144x256xf32, #tpu.memory_space<vmem>>, vector<72x49xf32>
    %568 = arith.truncf %567 : vector<72x49xf32> to vector<72x49xbf16>
    %c0_462 = arith.constant 0 : index
    %c0_463 = arith.constant 0 : index
    %569 = vector.load %arg9[%c0_462, %c0_463] : memref<8x72xbf16, #tpu.memory_space<vmem>>, vector<8x72xbf16>
    %cst_464 = arith.constant dense<0.000000e+00> : vector<8x49xf32>
    %570 = tpu.matmul %569, %568, %cst_464 {dimension_numbers = #tpu.dot_dimension_numbers<[1], [0], [0], [1], [0, 0, 1, 1], [], []>} : vector<8x72xbf16>, vector<72x49xbf16>, vector<8x49xf32> -> vector<8x49xf32>
    %c0_465 = arith.constant 0 : index
    %c128_466 = arith.constant 128 : index
    %571 = vector.load %arg23[%c0_465, %c128_466] : memref<16x512xf32, #tpu.memory_space<vmem>>, vector<8x49xf32>
    tpu.vector_store %arg23[%c0_465, %c128_466], %570 {strides = array<i32>} : memref<16x512xf32, #tpu.memory_space<vmem>>, vector<8x49xf32>,
    %c0_467 = arith.constant 0 : index
    %c120_468 = arith.constant 120 : index
    %572 = vector.load %arg23[%c0_467, %c120_468] : memref<16x512xf32, #tpu.memory_space<vmem>>, vector<8x49xf32>
    %c0_469 = arith.constant 0 : index
    %c0_470 = arith.constant 0 : index
    %573 = vector.load %arg16[%c0_469, %c0_470] : memref<9x49xf32, #tpu.memory_space<vmem>>, vector<1x49xf32>
    %cst_471 = arith.constant 0.000000e+00 : f32
    %574 = vector.broadcast %cst_471 : f32 to vector<1x49xf32>
    %575 = arith.cmpf one, %573, %574 : vector<1x49xf32>
    %cst_472 = arith.constant -1.000000e+30 : f32
    %576 = vector.shape_cast %575 : vector<1x49xi1> to vector<1x49xi1>
    %577 = vector.broadcast %576 : vector<1x49xi1> to vector<8x49xi1>
    %578 = vector.broadcast %cst_472 : f32 to vector<8x49xf32>
    %579 = arith.select %577, %572, %578 : vector<8x49xi1>, vector<8x49xf32>
    %580 = arith.maximumf %570, %579 : vector<8x49xf32>
    %c0_473 = arith.constant 0 : index
    %c121_474 = arith.constant 121 : index
    %581 = vector.load %arg23[%c0_473, %c121_474] : memref<16x512xf32, #tpu.memory_space<vmem>>, vector<8x49xf32>
    %c1_475 = arith.constant 1 : index
    %c0_476 = arith.constant 0 : index
    %582 = vector.load %arg16[%c1_475, %c0_476] : memref<9x49xf32, #tpu.memory_space<vmem>>, vector<1x49xf32>
    %cst_477 = arith.constant 0.000000e+00 : f32
    %583 = vector.broadcast %cst_477 : f32 to vector<1x49xf32>
    %584 = arith.cmpf one, %582, %583 : vector<1x49xf32>
    %cst_478 = arith.constant -1.000000e+30 : f32
    %585 = vector.shape_cast %584 : vector<1x49xi1> to vector<1x49xi1>
    %586 = vector.broadcast %585 : vector<1x49xi1> to vector<8x49xi1>
    %587 = vector.broadcast %cst_478 : f32 to vector<8x49xf32>
    %588 = arith.select %586, %581, %587 : vector<8x49xi1>, vector<8x49xf32>
    %589 = arith.maximumf %580, %588 : vector<8x49xf32>
    %c0_479 = arith.constant 0 : index
    %c122_480 = arith.constant 122 : index
    %590 = vector.load %arg23[%c0_479, %c122_480] : memref<16x512xf32, #tpu.memory_space<vmem>>, vector<8x49xf32>
    %c2_481 = arith.constant 2 : index
    %c0_482 = arith.constant 0 : index
    %591 = vector.load %arg16[%c2_481, %c0_482] : memref<9x49xf32, #tpu.memory_space<vmem>>, vector<1x49xf32>
    %cst_483 = arith.constant 0.000000e+00 : f32
    %592 = vector.broadcast %cst_483 : f32 to vector<1x49xf32>
    %593 = arith.cmpf one, %591, %592 : vector<1x49xf32>
    %cst_484 = arith.constant -1.000000e+30 : f32
    %594 = vector.shape_cast %593 : vector<1x49xi1> to vector<1x49xi1>
    %595 = vector.broadcast %594 : vector<1x49xi1> to vector<8x49xi1>
    %596 = vector.broadcast %cst_484 : f32 to vector<8x49xf32>
    %597 = arith.select %595, %590, %596 : vector<8x49xi1>, vector<8x49xf32>
    %598 = arith.maximumf %589, %597 : vector<8x49xf32>
    %c0_485 = arith.constant 0 : index
    %c127_486 = arith.constant 127 : index
    %599 = vector.load %arg23[%c0_485, %c127_486] : memref<16x512xf32, #tpu.memory_space<vmem>>, vector<8x49xf32>
    %c3_487 = arith.constant 3 : index
    %c0_488 = arith.constant 0 : index
    %600 = vector.load %arg16[%c3_487, %c0_488] : memref<9x49xf32, #tpu.memory_space<vmem>>, vector<1x49xf32>
    %cst_489 = arith.constant 0.000000e+00 : f32
    %601 = vector.broadcast %cst_489 : f32 to vector<1x49xf32>
    %602 = arith.cmpf one, %600, %601 : vector<1x49xf32>
    %cst_490 = arith.constant -1.000000e+30 : f32
    %603 = vector.shape_cast %602 : vector<1x49xi1> to vector<1x49xi1>
    %604 = vector.broadcast %603 : vector<1x49xi1> to vector<8x49xi1>
    %605 = vector.broadcast %cst_490 : f32 to vector<8x49xf32>
    %606 = arith.select %604, %599, %605 : vector<8x49xi1>, vector<8x49xf32>
    %607 = arith.maximumf %598, %606 : vector<8x49xf32>
    %c0_491 = arith.constant 0 : index
    %c129_492 = arith.constant 129 : index
    %608 = vector.load %arg23[%c0_491, %c129_492] : memref<16x512xf32, #tpu.memory_space<vmem>>, vector<8x49xf32>
    %c5_493 = arith.constant 5 : index
    %c0_494 = arith.constant 0 : index
    %609 = vector.load %arg16[%c5_493, %c0_494] : memref<9x49xf32, #tpu.memory_space<vmem>>, vector<1x49xf32>
    %cst_495 = arith.constant 0.000000e+00 : f32
    %610 = vector.broadcast %cst_495 : f32 to vector<1x49xf32>
    %611 = arith.cmpf one, %609, %610 : vector<1x49xf32>
    %cst_496 = arith.constant -1.000000e+30 : f32
    %612 = vector.shape_cast %611 : vector<1x49xi1> to vector<1x49xi1>
    %613 = vector.broadcast %612 : vector<1x49xi1> to vector<8x49xi1>
    %614 = vector.broadcast %cst_496 : f32 to vector<8x49xf32>
    %615 = arith.select %613, %608, %614 : vector<8x49xi1>, vector<8x49xf32>
    %616 = arith.maximumf %607, %615 : vector<8x49xf32>
    %c0_497 = arith.constant 0 : index
    %c134_498 = arith.constant 134 : index
    %617 = vector.load %arg23[%c0_497, %c134_498] : memref<16x512xf32, #tpu.memory_space<vmem>>, vector<8x49xf32>
    %c6_499 = arith.constant 6 : index
    %c0_500 = arith.constant 0 : index
    %618 = vector.load %arg16[%c6_499, %c0_500] : memref<9x49xf32, #tpu.memory_space<vmem>>, vector<1x49xf32>
    %cst_501 = arith.constant 0.000000e+00 : f32
    %619 = vector.broadcast %cst_501 : f32 to vector<1x49xf32>
    %620 = arith.cmpf one, %618, %619 : vector<1x49xf32>
    %cst_502 = arith.constant -1.000000e+30 : f32
    %621 = vector.shape_cast %620 : vector<1x49xi1> to vector<1x49xi1>
    %622 = vector.broadcast %621 : vector<1x49xi1> to vector<8x49xi1>
    %623 = vector.broadcast %cst_502 : f32 to vector<8x49xf32>
    %624 = arith.select %622, %617, %623 : vector<8x49xi1>, vector<8x49xf32>
    %625 = arith.maximumf %616, %624 : vector<8x49xf32>
    %c0_503 = arith.constant 0 : index
    %c135_504 = arith.constant 135 : index
    %626 = vector.load %arg23[%c0_503, %c135_504] : memref<16x512xf32, #tpu.memory_space<vmem>>, vector<8x49xf32>
    %c7_505 = arith.constant 7 : index
    %c0_506 = arith.constant 0 : index
    %627 = vector.load %arg16[%c7_505, %c0_506] : memref<9x49xf32, #tpu.memory_space<vmem>>, vector<1x49xf32>
    %cst_507 = arith.constant 0.000000e+00 : f32
    %628 = vector.broadcast %cst_507 : f32 to vector<1x49xf32>
    %629 = arith.cmpf one, %627, %628 : vector<1x49xf32>
    %cst_508 = arith.constant -1.000000e+30 : f32
    %630 = vector.shape_cast %629 : vector<1x49xi1> to vector<1x49xi1>
    %631 = vector.broadcast %630 : vector<1x49xi1> to vector<8x49xi1>
    %632 = vector.broadcast %cst_508 : f32 to vector<8x49xf32>
    %633 = arith.select %631, %626, %632 : vector<8x49xi1>, vector<8x49xf32>
    %634 = arith.maximumf %625, %633 : vector<8x49xf32>
    %c0_509 = arith.constant 0 : index
    %c136_510 = arith.constant 136 : index
    %635 = vector.load %arg23[%c0_509, %c136_510] : memref<16x512xf32, #tpu.memory_space<vmem>>, vector<8x49xf32>
    %c8_511 = arith.constant 8 : index
    %c0_512 = arith.constant 0 : index
    %636 = vector.load %arg16[%c8_511, %c0_512] : memref<9x49xf32, #tpu.memory_space<vmem>>, vector<1x49xf32>
    %cst_513 = arith.constant 0.000000e+00 : f32
    %637 = vector.broadcast %cst_513 : f32 to vector<1x49xf32>
    %638 = arith.cmpf one, %636, %637 : vector<1x49xf32>
    %cst_514 = arith.constant -1.000000e+30 : f32
    %639 = vector.shape_cast %638 : vector<1x49xi1> to vector<1x49xi1>
    %640 = vector.broadcast %639 : vector<1x49xi1> to vector<8x49xi1>
    %641 = vector.broadcast %cst_514 : f32 to vector<8x49xf32>
    %642 = arith.select %640, %635, %641 : vector<8x49xi1>, vector<8x49xf32>
    %643 = arith.maximumf %634, %642 : vector<8x49xf32>
    %c0_515 = arith.constant 0 : index
    %c0_516 = arith.constant 0 : index
    %644 = vector.load %arg19[%c0_515, %c0_516] : memref<49x16xf32, #tpu.memory_space<vmem>>, vector<49x16xf32>
    %cst_517 = arith.constant dense<0.000000e+00> : vector<8x16xf32>
    %645 = tpu.matmul %643, %644, %cst_517 {dimension_numbers = #tpu.dot_dimension_numbers<[1], [0], [0], [1], [0, 0, 1, 1], [], []>} : vector<8x49xf32>, vector<49x16xf32>, vector<8x16xf32> -> vector<8x16xf32>
    %c0_518 = arith.constant 0 : index
    %c0_519 = arith.constant 0 : index
    %646 = vector.load %arg10[%c0_518, %c0_519] : memref<8x2xf32, #tpu.memory_space<vmem>>, vector<8x1xf32>
    %647 = vector.broadcast %646 : vector<8x1xf32> to vector<8x16xf32>
    %648 = arith.mulf %645, %647 : vector<8x16xf32>
    %c0_520 = arith.constant 0 : index
    %c1_521 = arith.constant 1 : index
    %649 = vector.load %arg10[%c0_520, %c1_521] : memref<8x2xf32, #tpu.memory_space<vmem>>, vector<8x1xf32>
    %650 = vector.broadcast %649 : vector<8x1xf32> to vector<8x16xf32>
    %651 = arith.addf %648, %650 : vector<8x16xf32>
    %cst_522 = arith.constant 0.000000e+00 : f32
    %652 = vector.broadcast %cst_522 : f32 to vector<8x16xf32>
    %653 = arith.cmpf ogt, %651, %652 : vector<8x16xf32>
    %cst_523 = arith.constant 0.000000e+00 : f32
    %654 = vector.broadcast %cst_523 : f32 to vector<8x16xf32>
    %655 = arith.minimumf %651, %654 : vector<8x16xf32>
    %656 = math.exp %655 : vector<8x16xf32>
    %cst_524 = arith.constant 1.000000e+00 : f32
    %657 = vector.broadcast %cst_524 : f32 to vector<8x16xf32>
    %658 = arith.subf %656, %657 : vector<8x16xf32>
    %659 = arith.select %653, %651, %658 : vector<8x16xi1>, vector<8x16xf32>
    %c0_525 = arith.constant 0 : index
    %c128_526 = arith.constant 128 : index
    %660 = vector.load %arg23[%c0_525, %c128_526] : memref<16x512xf32, #tpu.memory_space<vmem>>, vector<8x16xf32>
    tpu.vector_store %arg23[%c0_525, %c128_526], %659 {strides = array<i32>} : memref<16x512xf32, #tpu.memory_space<vmem>>, vector<8x16xf32>,
    %c0_527 = arith.constant 0 : index
    %c123 = arith.constant 123 : index
    %661 = vector.load %arg23[%c0_527, %c123] : memref<16x512xf32, #tpu.memory_space<vmem>>, vector<8x16xf32>
    %c0_528 = arith.constant 0 : index
    %c0_529 = arith.constant 0 : index
    %662 = vector.load %arg17[%c0_528, %c0_529] : memref<9x16xf32, #tpu.memory_space<vmem>>, vector<1x16xf32>
    %cst_530 = arith.constant 0.000000e+00 : f32
    %663 = vector.broadcast %cst_530 : f32 to vector<1x16xf32>
    %664 = arith.cmpf one, %662, %663 : vector<1x16xf32>
    %cst_531 = arith.constant 0.000000e+00 : f32
    %665 = vector.shape_cast %664 : vector<1x16xi1> to vector<1x16xi1>
    %666 = vector.broadcast %665 : vector<1x16xi1> to vector<8x16xi1>
    %667 = vector.broadcast %cst_531 : f32 to vector<8x16xf32>
    %668 = arith.select %666, %661, %667 : vector<8x16xi1>, vector<8x16xf32>
    %c0_532 = arith.constant 0 : index
    %c0_533 = arith.constant 0 : index
    %669 = vector.load %arg24[%c0_532, %c0_533] : memref<144x256xf32, #tpu.memory_space<vmem>>, vector<8x16xf32>
    tpu.vector_store %arg24[%c0_532, %c0_533], %668 {strides = array<i32>} : memref<144x256xf32, #tpu.memory_space<vmem>>, vector<8x16xf32>,
    %c0_534 = arith.constant 0 : index
    %c124 = arith.constant 124 : index
    %670 = vector.load %arg23[%c0_534, %c124] : memref<16x512xf32, #tpu.memory_space<vmem>>, vector<8x16xf32>
    %c1_535 = arith.constant 1 : index
    %c0_536 = arith.constant 0 : index
    %671 = vector.load %arg17[%c1_535, %c0_536] : memref<9x16xf32, #tpu.memory_space<vmem>>, vector<1x16xf32>
    %cst_537 = arith.constant 0.000000e+00 : f32
    %672 = vector.broadcast %cst_537 : f32 to vector<1x16xf32>
    %673 = arith.cmpf one, %671, %672 : vector<1x16xf32>
    %cst_538 = arith.constant 0.000000e+00 : f32
    %674 = vector.shape_cast %673 : vector<1x16xi1> to vector<1x16xi1>
    %675 = vector.broadcast %674 : vector<1x16xi1> to vector<8x16xi1>
    %676 = vector.broadcast %cst_538 : f32 to vector<8x16xf32>
    %677 = arith.select %675, %670, %676 : vector<8x16xi1>, vector<8x16xf32>
    %c8_539 = arith.constant 8 : index
    %c0_540 = arith.constant 0 : index
    %678 = vector.load %arg24[%c8_539, %c0_540] : memref<144x256xf32, #tpu.memory_space<vmem>>, vector<8x16xf32>
    tpu.vector_store %arg24[%c8_539, %c0_540], %677 {strides = array<i32>} : memref<144x256xf32, #tpu.memory_space<vmem>>, vector<8x16xf32>,
    %c0_541 = arith.constant 0 : index
    %c125 = arith.constant 125 : index
    %679 = vector.load %arg23[%c0_541, %c125] : memref<16x512xf32, #tpu.memory_space<vmem>>, vector<8x16xf32>
    %c2_542 = arith.constant 2 : index
    %c0_543 = arith.constant 0 : index
    %680 = vector.load %arg17[%c2_542, %c0_543] : memref<9x16xf32, #tpu.memory_space<vmem>>, vector<1x16xf32>
    %cst_544 = arith.constant 0.000000e+00 : f32
    %681 = vector.broadcast %cst_544 : f32 to vector<1x16xf32>
    %682 = arith.cmpf one, %680, %681 : vector<1x16xf32>
    %cst_545 = arith.constant 0.000000e+00 : f32
    %683 = vector.shape_cast %682 : vector<1x16xi1> to vector<1x16xi1>
    %684 = vector.broadcast %683 : vector<1x16xi1> to vector<8x16xi1>
    %685 = vector.broadcast %cst_545 : f32 to vector<8x16xf32>
    %686 = arith.select %684, %679, %685 : vector<8x16xi1>, vector<8x16xf32>
    %c16_546 = arith.constant 16 : index
    %c0_547 = arith.constant 0 : index
    %687 = vector.load %arg24[%c16_546, %c0_547] : memref<144x256xf32, #tpu.memory_space<vmem>>, vector<8x16xf32>
    tpu.vector_store %arg24[%c16_546, %c0_547], %686 {strides = array<i32>} : memref<144x256xf32, #tpu.memory_space<vmem>>, vector<8x16xf32>,
    %c0_548 = arith.constant 0 : index
    %c127_549 = arith.constant 127 : index
    %688 = vector.load %arg23[%c0_548, %c127_549] : memref<16x512xf32, #tpu.memory_space<vmem>>, vector<8x16xf32>
    %c3_550 = arith.constant 3 : index
    %c0_551 = arith.constant 0 : index
    %689 = vector.load %arg17[%c3_550, %c0_551] : memref<9x16xf32, #tpu.memory_space<vmem>>, vector<1x16xf32>
    %cst_552 = arith.constant 0.000000e+00 : f32
    %690 = vector.broadcast %cst_552 : f32 to vector<1x16xf32>
    %691 = arith.cmpf one, %689, %690 : vector<1x16xf32>
    %cst_553 = arith.constant 0.000000e+00 : f32
    %692 = vector.shape_cast %691 : vector<1x16xi1> to vector<1x16xi1>
    %693 = vector.broadcast %692 : vector<1x16xi1> to vector<8x16xi1>
    %694 = vector.broadcast %cst_553 : f32 to vector<8x16xf32>
    %695 = arith.select %693, %688, %694 : vector<8x16xi1>, vector<8x16xf32>
    %c24_554 = arith.constant 24 : index
    %c0_555 = arith.constant 0 : index
    %696 = vector.load %arg24[%c24_554, %c0_555] : memref<144x256xf32, #tpu.memory_space<vmem>>, vector<8x16xf32>
    tpu.vector_store %arg24[%c24_554, %c0_555], %695 {strides = array<i32>} : memref<144x256xf32, #tpu.memory_space<vmem>>, vector<8x16xf32>,
    %c0_556 = arith.constant 0 : index
    %c128_557 = arith.constant 128 : index
    %697 = vector.load %arg23[%c0_556, %c128_557] : memref<16x512xf32, #tpu.memory_space<vmem>>, vector<8x16xf32>
    %c4_558 = arith.constant 4 : index
    %c0_559 = arith.constant 0 : index
    %698 = vector.load %arg17[%c4_558, %c0_559] : memref<9x16xf32, #tpu.memory_space<vmem>>, vector<1x16xf32>
    %cst_560 = arith.constant 0.000000e+00 : f32
    %699 = vector.broadcast %cst_560 : f32 to vector<1x16xf32>
    %700 = arith.cmpf one, %698, %699 : vector<1x16xf32>
    %cst_561 = arith.constant 0.000000e+00 : f32
    %701 = vector.shape_cast %700 : vector<1x16xi1> to vector<1x16xi1>
    %702 = vector.broadcast %701 : vector<1x16xi1> to vector<8x16xi1>
    %703 = vector.broadcast %cst_561 : f32 to vector<8x16xf32>
    %704 = arith.select %702, %697, %703 : vector<8x16xi1>, vector<8x16xf32>
    %c32_562 = arith.constant 32 : index
    %c0_563 = arith.constant 0 : index
    %705 = vector.load %arg24[%c32_562, %c0_563] : memref<144x256xf32, #tpu.memory_space<vmem>>, vector<8x16xf32>
    tpu.vector_store %arg24[%c32_562, %c0_563], %704 {strides = array<i32>} : memref<144x256xf32, #tpu.memory_space<vmem>>, vector<8x16xf32>,
    %c0_564 = arith.constant 0 : index
    %c129_565 = arith.constant 129 : index
    %706 = vector.load %arg23[%c0_564, %c129_565] : memref<16x512xf32, #tpu.memory_space<vmem>>, vector<8x16xf32>
    %c5_566 = arith.constant 5 : index
    %c0_567 = arith.constant 0 : index
    %707 = vector.load %arg17[%c5_566, %c0_567] : memref<9x16xf32, #tpu.memory_space<vmem>>, vector<1x16xf32>
    %cst_568 = arith.constant 0.000000e+00 : f32
    %708 = vector.broadcast %cst_568 : f32 to vector<1x16xf32>
    %709 = arith.cmpf one, %707, %708 : vector<1x16xf32>
    %cst_569 = arith.constant 0.000000e+00 : f32
    %710 = vector.shape_cast %709 : vector<1x16xi1> to vector<1x16xi1>
    %711 = vector.broadcast %710 : vector<1x16xi1> to vector<8x16xi1>
    %712 = vector.broadcast %cst_569 : f32 to vector<8x16xf32>
    %713 = arith.select %711, %706, %712 : vector<8x16xi1>, vector<8x16xf32>
    %c40_570 = arith.constant 40 : index
    %c0_571 = arith.constant 0 : index
    %714 = vector.load %arg24[%c40_570, %c0_571] : memref<144x256xf32, #tpu.memory_space<vmem>>, vector<8x16xf32>
    tpu.vector_store %arg24[%c40_570, %c0_571], %713 {strides = array<i32>} : memref<144x256xf32, #tpu.memory_space<vmem>>, vector<8x16xf32>,
    %c0_572 = arith.constant 0 : index
    %c131_573 = arith.constant 131 : index
    %715 = vector.load %arg23[%c0_572, %c131_573] : memref<16x512xf32, #tpu.memory_space<vmem>>, vector<8x16xf32>
    %c6_574 = arith.constant 6 : index
    %c0_575 = arith.constant 0 : index
    %716 = vector.load %arg17[%c6_574, %c0_575] : memref<9x16xf32, #tpu.memory_space<vmem>>, vector<1x16xf32>
    %cst_576 = arith.constant 0.000000e+00 : f32
    %717 = vector.broadcast %cst_576 : f32 to vector<1x16xf32>
    %718 = arith.cmpf one, %716, %717 : vector<1x16xf32>
    %cst_577 = arith.constant 0.000000e+00 : f32
    %719 = vector.shape_cast %718 : vector<1x16xi1> to vector<1x16xi1>
    %720 = vector.broadcast %719 : vector<1x16xi1> to vector<8x16xi1>
    %721 = vector.broadcast %cst_577 : f32 to vector<8x16xf32>
    %722 = arith.select %720, %715, %721 : vector<8x16xi1>, vector<8x16xf32>
    %c48_578 = arith.constant 48 : index
    %c0_579 = arith.constant 0 : index
    %723 = vector.load %arg24[%c48_578, %c0_579] : memref<144x256xf32, #tpu.memory_space<vmem>>, vector<8x16xf32>
    tpu.vector_store %arg24[%c48_578, %c0_579], %722 {strides = array<i32>} : memref<144x256xf32, #tpu.memory_space<vmem>>, vector<8x16xf32>,
    %c0_580 = arith.constant 0 : index
    %c132 = arith.constant 132 : index
    %724 = vector.load %arg23[%c0_580, %c132] : memref<16x512xf32, #tpu.memory_space<vmem>>, vector<8x16xf32>
    %c7_581 = arith.constant 7 : index
    %c0_582 = arith.constant 0 : index
    %725 = vector.load %arg17[%c7_581, %c0_582] : memref<9x16xf32, #tpu.memory_space<vmem>>, vector<1x16xf32>
    %cst_583 = arith.constant 0.000000e+00 : f32
    %726 = vector.broadcast %cst_583 : f32 to vector<1x16xf32>
    %727 = arith.cmpf one, %725, %726 : vector<1x16xf32>
    %cst_584 = arith.constant 0.000000e+00 : f32
    %728 = vector.shape_cast %727 : vector<1x16xi1> to vector<1x16xi1>
    %729 = vector.broadcast %728 : vector<1x16xi1> to vector<8x16xi1>
    %730 = vector.broadcast %cst_584 : f32 to vector<8x16xf32>
    %731 = arith.select %729, %724, %730 : vector<8x16xi1>, vector<8x16xf32>
    %c56_585 = arith.constant 56 : index
    %c0_586 = arith.constant 0 : index
    %732 = vector.load %arg24[%c56_585, %c0_586] : memref<144x256xf32, #tpu.memory_space<vmem>>, vector<8x16xf32>
    tpu.vector_store %arg24[%c56_585, %c0_586], %731 {strides = array<i32>} : memref<144x256xf32, #tpu.memory_space<vmem>>, vector<8x16xf32>,
    %c0_587 = arith.constant 0 : index
    %c133 = arith.constant 133 : index
    %733 = vector.load %arg23[%c0_587, %c133] : memref<16x512xf32, #tpu.memory_space<vmem>>, vector<8x16xf32>
    %c8_588 = arith.constant 8 : index
    %c0_589 = arith.constant 0 : index
    %734 = vector.load %arg17[%c8_588, %c0_589] : memref<9x16xf32, #tpu.memory_space<vmem>>, vector<1x16xf32>
    %cst_590 = arith.constant 0.000000e+00 : f32
    %735 = vector.broadcast %cst_590 : f32 to vector<1x16xf32>
    %736 = arith.cmpf one, %734, %735 : vector<1x16xf32>
    %cst_591 = arith.constant 0.000000e+00 : f32
    %737 = vector.shape_cast %736 : vector<1x16xi1> to vector<1x16xi1>
    %738 = vector.broadcast %737 : vector<1x16xi1> to vector<8x16xi1>
    %739 = vector.broadcast %cst_591 : f32 to vector<8x16xf32>
    %740 = arith.select %738, %733, %739 : vector<8x16xi1>, vector<8x16xf32>
    %c64_592 = arith.constant 64 : index
    %c0_593 = arith.constant 0 : index
    %741 = vector.load %arg24[%c64_592, %c0_593] : memref<144x256xf32, #tpu.memory_space<vmem>>, vector<8x16xf32>
    tpu.vector_store %arg24[%c64_592, %c0_593], %740 {strides = array<i32>} : memref<144x256xf32, #tpu.memory_space<vmem>>, vector<8x16xf32>,
    %c0_594 = arith.constant 0 : index
    %c0_595 = arith.constant 0 : index
    %742 = vector.load %arg24[%c0_594, %c0_595] : memref<144x256xf32, #tpu.memory_space<vmem>>, vector<72x16xf32>
    %743 = arith.truncf %742 : vector<72x16xf32> to vector<72x16xbf16>
    %c0_596 = arith.constant 0 : index
    %c0_597 = arith.constant 0 : index
    %744 = vector.load %arg11[%c0_596, %c0_597] : memref<16x72xbf16, #tpu.memory_space<vmem>>, vector<16x72xbf16>
    %cst_598 = arith.constant dense<0.000000e+00> : vector<16x16xf32>
    %745 = tpu.matmul %744, %743, %cst_598 {dimension_numbers = #tpu.dot_dimension_numbers<[1], [0], [0], [1], [0, 0, 1, 1], [], []>} : vector<16x72xbf16>, vector<72x16xbf16>, vector<16x16xf32> -> vector<16x16xf32>
    %c0_599 = arith.constant 0 : index
    %c0_600 = arith.constant 0 : index
    %746 = vector.load %arg12[%c0_599, %c0_600] : memref<16x2xf32, #tpu.memory_space<vmem>>, vector<16x1xf32>
    %747 = vector.broadcast %746 : vector<16x1xf32> to vector<16x16xf32>
    %748 = arith.mulf %745, %747 : vector<16x16xf32>
    %c0_601 = arith.constant 0 : index
    %c1_602 = arith.constant 1 : index
    %749 = vector.load %arg12[%c0_601, %c1_602] : memref<16x2xf32, #tpu.memory_space<vmem>>, vector<16x1xf32>
    %750 = vector.broadcast %749 : vector<16x1xf32> to vector<16x16xf32>
    %751 = arith.addf %748, %750 : vector<16x16xf32>
    %cst_603 = arith.constant 0.000000e+00 : f32
    %752 = vector.broadcast %cst_603 : f32 to vector<16x16xf32>
    %753 = arith.cmpf ogt, %751, %752 : vector<16x16xf32>
    %cst_604 = arith.constant 0.000000e+00 : f32
    %754 = vector.broadcast %cst_604 : f32 to vector<16x16xf32>
    %755 = arith.minimumf %751, %754 : vector<16x16xf32>
    %756 = math.exp %755 : vector<16x16xf32>
    %cst_605 = arith.constant 1.000000e+00 : f32
    %757 = vector.broadcast %cst_605 : f32 to vector<16x16xf32>
    %758 = arith.subf %756, %757 : vector<16x16xf32>
    %759 = arith.select %753, %751, %758 : vector<16x16xi1>, vector<16x16xf32>
    %c0_606 = arith.constant 0 : index
    %c128_607 = arith.constant 128 : index
    %760 = vector.load %arg23[%c0_606, %c128_607] : memref<16x512xf32, #tpu.memory_space<vmem>>, vector<16x16xf32>
    tpu.vector_store %arg23[%c0_606, %c128_607], %759 {strides = array<i32>} : memref<16x512xf32, #tpu.memory_space<vmem>>, vector<16x16xf32>,
    %c0_608 = arith.constant 0 : index
    %c123_609 = arith.constant 123 : index
    %761 = vector.load %arg23[%c0_608, %c123_609] : memref<16x512xf32, #tpu.memory_space<vmem>>, vector<16x16xf32>
    %c0_610 = arith.constant 0 : index
    %c0_611 = arith.constant 0 : index
    %762 = vector.load %arg17[%c0_610, %c0_611] : memref<9x16xf32, #tpu.memory_space<vmem>>, vector<1x16xf32>
    %cst_612 = arith.constant 0.000000e+00 : f32
    %763 = vector.broadcast %cst_612 : f32 to vector<1x16xf32>
    %764 = arith.cmpf one, %762, %763 : vector<1x16xf32>
    %cst_613 = arith.constant 0.000000e+00 : f32
    %765 = vector.shape_cast %764 : vector<1x16xi1> to vector<1x16xi1>
    %766 = vector.broadcast %765 : vector<1x16xi1> to vector<16x16xi1>
    %767 = vector.broadcast %cst_613 : f32 to vector<16x16xf32>
    %768 = arith.select %766, %761, %767 : vector<16x16xi1>, vector<16x16xf32>
    %c0_614 = arith.constant 0 : index
    %c0_615 = arith.constant 0 : index
    %769 = vector.load %arg24[%c0_614, %c0_615] : memref<144x256xf32, #tpu.memory_space<vmem>>, vector<16x16xf32>
    tpu.vector_store %arg24[%c0_614, %c0_615], %768 {strides = array<i32>} : memref<144x256xf32, #tpu.memory_space<vmem>>, vector<16x16xf32>,
    %c0_616 = arith.constant 0 : index
    %c124_617 = arith.constant 124 : index
    %770 = vector.load %arg23[%c0_616, %c124_617] : memref<16x512xf32, #tpu.memory_space<vmem>>, vector<16x16xf32>
    %c1_618 = arith.constant 1 : index
    %c0_619 = arith.constant 0 : index
    %771 = vector.load %arg17[%c1_618, %c0_619] : memref<9x16xf32, #tpu.memory_space<vmem>>, vector<1x16xf32>
    %cst_620 = arith.constant 0.000000e+00 : f32
    %772 = vector.broadcast %cst_620 : f32 to vector<1x16xf32>
    %773 = arith.cmpf one, %771, %772 : vector<1x16xf32>
    %cst_621 = arith.constant 0.000000e+00 : f32
    %774 = vector.shape_cast %773 : vector<1x16xi1> to vector<1x16xi1>
    %775 = vector.broadcast %774 : vector<1x16xi1> to vector<16x16xi1>
    %776 = vector.broadcast %cst_621 : f32 to vector<16x16xf32>
    %777 = arith.select %775, %770, %776 : vector<16x16xi1>, vector<16x16xf32>
    %c16_622 = arith.constant 16 : index
    %c0_623 = arith.constant 0 : index
    %778 = vector.load %arg24[%c16_622, %c0_623] : memref<144x256xf32, #tpu.memory_space<vmem>>, vector<16x16xf32>
    tpu.vector_store %arg24[%c16_622, %c0_623], %777 {strides = array<i32>} : memref<144x256xf32, #tpu.memory_space<vmem>>, vector<16x16xf32>,
    %c0_624 = arith.constant 0 : index
    %c125_625 = arith.constant 125 : index
    %779 = vector.load %arg23[%c0_624, %c125_625] : memref<16x512xf32, #tpu.memory_space<vmem>>, vector<16x16xf32>
    %c2_626 = arith.constant 2 : index
    %c0_627 = arith.constant 0 : index
    %780 = vector.load %arg17[%c2_626, %c0_627] : memref<9x16xf32, #tpu.memory_space<vmem>>, vector<1x16xf32>
    %cst_628 = arith.constant 0.000000e+00 : f32
    %781 = vector.broadcast %cst_628 : f32 to vector<1x16xf32>
    %782 = arith.cmpf one, %780, %781 : vector<1x16xf32>
    %cst_629 = arith.constant 0.000000e+00 : f32
    %783 = vector.shape_cast %782 : vector<1x16xi1> to vector<1x16xi1>
    %784 = vector.broadcast %783 : vector<1x16xi1> to vector<16x16xi1>
    %785 = vector.broadcast %cst_629 : f32 to vector<16x16xf32>
    %786 = arith.select %784, %779, %785 : vector<16x16xi1>, vector<16x16xf32>
    %c32_630 = arith.constant 32 : index
    %c0_631 = arith.constant 0 : index
    %787 = vector.load %arg24[%c32_630, %c0_631] : memref<144x256xf32, #tpu.memory_space<vmem>>, vector<16x16xf32>
    tpu.vector_store %arg24[%c32_630, %c0_631], %786 {strides = array<i32>} : memref<144x256xf32, #tpu.memory_space<vmem>>, vector<16x16xf32>,
    %c0_632 = arith.constant 0 : index
    %c127_633 = arith.constant 127 : index
    %788 = vector.load %arg23[%c0_632, %c127_633] : memref<16x512xf32, #tpu.memory_space<vmem>>, vector<16x16xf32>
    %c3_634 = arith.constant 3 : index
    %c0_635 = arith.constant 0 : index
    %789 = vector.load %arg17[%c3_634, %c0_635] : memref<9x16xf32, #tpu.memory_space<vmem>>, vector<1x16xf32>
    %cst_636 = arith.constant 0.000000e+00 : f32
    %790 = vector.broadcast %cst_636 : f32 to vector<1x16xf32>
    %791 = arith.cmpf one, %789, %790 : vector<1x16xf32>
    %cst_637 = arith.constant 0.000000e+00 : f32
    %792 = vector.shape_cast %791 : vector<1x16xi1> to vector<1x16xi1>
    %793 = vector.broadcast %792 : vector<1x16xi1> to vector<16x16xi1>
    %794 = vector.broadcast %cst_637 : f32 to vector<16x16xf32>
    %795 = arith.select %793, %788, %794 : vector<16x16xi1>, vector<16x16xf32>
    %c48_638 = arith.constant 48 : index
    %c0_639 = arith.constant 0 : index
    %796 = vector.load %arg24[%c48_638, %c0_639] : memref<144x256xf32, #tpu.memory_space<vmem>>, vector<16x16xf32>
    tpu.vector_store %arg24[%c48_638, %c0_639], %795 {strides = array<i32>} : memref<144x256xf32, #tpu.memory_space<vmem>>, vector<16x16xf32>,
    %c0_640 = arith.constant 0 : index
    %c128_641 = arith.constant 128 : index
    %797 = vector.load %arg23[%c0_640, %c128_641] : memref<16x512xf32, #tpu.memory_space<vmem>>, vector<16x16xf32>
    %c4_642 = arith.constant 4 : index
    %c0_643 = arith.constant 0 : index
    %798 = vector.load %arg17[%c4_642, %c0_643] : memref<9x16xf32, #tpu.memory_space<vmem>>, vector<1x16xf32>
    %cst_644 = arith.constant 0.000000e+00 : f32
    %799 = vector.broadcast %cst_644 : f32 to vector<1x16xf32>
    %800 = arith.cmpf one, %798, %799 : vector<1x16xf32>
    %cst_645 = arith.constant 0.000000e+00 : f32
    %801 = vector.shape_cast %800 : vector<1x16xi1> to vector<1x16xi1>
    %802 = vector.broadcast %801 : vector<1x16xi1> to vector<16x16xi1>
    %803 = vector.broadcast %cst_645 : f32 to vector<16x16xf32>
    %804 = arith.select %802, %797, %803 : vector<16x16xi1>, vector<16x16xf32>
    %c64_646 = arith.constant 64 : index
    %c0_647 = arith.constant 0 : index
    %805 = vector.load %arg24[%c64_646, %c0_647] : memref<144x256xf32, #tpu.memory_space<vmem>>, vector<16x16xf32>
    tpu.vector_store %arg24[%c64_646, %c0_647], %804 {strides = array<i32>} : memref<144x256xf32, #tpu.memory_space<vmem>>, vector<16x16xf32>,
    %c0_648 = arith.constant 0 : index
    %c129_649 = arith.constant 129 : index
    %806 = vector.load %arg23[%c0_648, %c129_649] : memref<16x512xf32, #tpu.memory_space<vmem>>, vector<16x16xf32>
    %c5_650 = arith.constant 5 : index
    %c0_651 = arith.constant 0 : index
    %807 = vector.load %arg17[%c5_650, %c0_651] : memref<9x16xf32, #tpu.memory_space<vmem>>, vector<1x16xf32>
    %cst_652 = arith.constant 0.000000e+00 : f32
    %808 = vector.broadcast %cst_652 : f32 to vector<1x16xf32>
    %809 = arith.cmpf one, %807, %808 : vector<1x16xf32>
    %cst_653 = arith.constant 0.000000e+00 : f32
    %810 = vector.shape_cast %809 : vector<1x16xi1> to vector<1x16xi1>
    %811 = vector.broadcast %810 : vector<1x16xi1> to vector<16x16xi1>
    %812 = vector.broadcast %cst_653 : f32 to vector<16x16xf32>
    %813 = arith.select %811, %806, %812 : vector<16x16xi1>, vector<16x16xf32>
    %c80 = arith.constant 80 : index
    %c0_654 = arith.constant 0 : index
    %814 = vector.load %arg24[%c80, %c0_654] : memref<144x256xf32, #tpu.memory_space<vmem>>, vector<16x16xf32>
    tpu.vector_store %arg24[%c80, %c0_654], %813 {strides = array<i32>} : memref<144x256xf32, #tpu.memory_space<vmem>>, vector<16x16xf32>,
    %c0_655 = arith.constant 0 : index
    %c131_656 = arith.constant 131 : index
    %815 = vector.load %arg23[%c0_655, %c131_656] : memref<16x512xf32, #tpu.memory_space<vmem>>, vector<16x16xf32>
    %c6_657 = arith.constant 6 : index
    %c0_658 = arith.constant 0 : index
    %816 = vector.load %arg17[%c6_657, %c0_658] : memref<9x16xf32, #tpu.memory_space<vmem>>, vector<1x16xf32>
    %cst_659 = arith.constant 0.000000e+00 : f32
    %817 = vector.broadcast %cst_659 : f32 to vector<1x16xf32>
    %818 = arith.cmpf one, %816, %817 : vector<1x16xf32>
    %cst_660 = arith.constant 0.000000e+00 : f32
    %819 = vector.shape_cast %818 : vector<1x16xi1> to vector<1x16xi1>
    %820 = vector.broadcast %819 : vector<1x16xi1> to vector<16x16xi1>
    %821 = vector.broadcast %cst_660 : f32 to vector<16x16xf32>
    %822 = arith.select %820, %815, %821 : vector<16x16xi1>, vector<16x16xf32>
    %c96 = arith.constant 96 : index
    %c0_661 = arith.constant 0 : index
    %823 = vector.load %arg24[%c96, %c0_661] : memref<144x256xf32, #tpu.memory_space<vmem>>, vector<16x16xf32>
    tpu.vector_store %arg24[%c96, %c0_661], %822 {strides = array<i32>} : memref<144x256xf32, #tpu.memory_space<vmem>>, vector<16x16xf32>,
    %c0_662 = arith.constant 0 : index
    %c132_663 = arith.constant 132 : index
    %824 = vector.load %arg23[%c0_662, %c132_663] : memref<16x512xf32, #tpu.memory_space<vmem>>, vector<16x16xf32>
    %c7_664 = arith.constant 7 : index
    %c0_665 = arith.constant 0 : index
    %825 = vector.load %arg17[%c7_664, %c0_665] : memref<9x16xf32, #tpu.memory_space<vmem>>, vector<1x16xf32>
    %cst_666 = arith.constant 0.000000e+00 : f32
    %826 = vector.broadcast %cst_666 : f32 to vector<1x16xf32>
    %827 = arith.cmpf one, %825, %826 : vector<1x16xf32>
    %cst_667 = arith.constant 0.000000e+00 : f32
    %828 = vector.shape_cast %827 : vector<1x16xi1> to vector<1x16xi1>
    %829 = vector.broadcast %828 : vector<1x16xi1> to vector<16x16xi1>
    %830 = vector.broadcast %cst_667 : f32 to vector<16x16xf32>
    %831 = arith.select %829, %824, %830 : vector<16x16xi1>, vector<16x16xf32>
    %c112_668 = arith.constant 112 : index
    %c0_669 = arith.constant 0 : index
    %832 = vector.load %arg24[%c112_668, %c0_669] : memref<144x256xf32, #tpu.memory_space<vmem>>, vector<16x16xf32>
    tpu.vector_store %arg24[%c112_668, %c0_669], %831 {strides = array<i32>} : memref<144x256xf32, #tpu.memory_space<vmem>>, vector<16x16xf32>,
    %c0_670 = arith.constant 0 : index
    %c133_671 = arith.constant 133 : index
    %833 = vector.load %arg23[%c0_670, %c133_671] : memref<16x512xf32, #tpu.memory_space<vmem>>, vector<16x16xf32>
    %c8_672 = arith.constant 8 : index
    %c0_673 = arith.constant 0 : index
    %834 = vector.load %arg17[%c8_672, %c0_673] : memref<9x16xf32, #tpu.memory_space<vmem>>, vector<1x16xf32>
    %cst_674 = arith.constant 0.000000e+00 : f32
    %835 = vector.broadcast %cst_674 : f32 to vector<1x16xf32>
    %836 = arith.cmpf one, %834, %835 : vector<1x16xf32>
    %cst_675 = arith.constant 0.000000e+00 : f32
    %837 = vector.shape_cast %836 : vector<1x16xi1> to vector<1x16xi1>
    %838 = vector.broadcast %837 : vector<1x16xi1> to vector<16x16xi1>
    %839 = vector.broadcast %cst_675 : f32 to vector<16x16xf32>
    %840 = arith.select %838, %833, %839 : vector<16x16xi1>, vector<16x16xf32>
    %c128_676 = arith.constant 128 : index
    %c0_677 = arith.constant 0 : index
    %841 = vector.load %arg24[%c128_676, %c0_677] : memref<144x256xf32, #tpu.memory_space<vmem>>, vector<16x16xf32>
    tpu.vector_store %arg24[%c128_676, %c0_677], %840 {strides = array<i32>} : memref<144x256xf32, #tpu.memory_space<vmem>>, vector<16x16xf32>,
    %c0_678 = arith.constant 0 : index
    %c0_679 = arith.constant 0 : index
    %842 = vector.load %arg24[%c0_678, %c0_679] : memref<144x256xf32, #tpu.memory_space<vmem>>, vector<144x16xf32>
    %843 = arith.truncf %842 : vector<144x16xf32> to vector<144x16xbf16>
    %c0_680 = arith.constant 0 : index
    %c0_681 = arith.constant 0 : index
    %844 = vector.load %arg13[%c0_680, %c0_681] : memref<16x144xbf16, #tpu.memory_space<vmem>>, vector<16x144xbf16>
    %cst_682 = arith.constant dense<0.000000e+00> : vector<16x16xf32>
    %845 = tpu.matmul %844, %843, %cst_682 {dimension_numbers = #tpu.dot_dimension_numbers<[1], [0], [0], [1], [0, 0, 1, 1], [], []>} : vector<16x144xbf16>, vector<144x16xbf16>, vector<16x16xf32> -> vector<16x16xf32>
    %c0_683 = arith.constant 0 : index
    %c128_684 = arith.constant 128 : index
    %846 = vector.load %arg23[%c0_683, %c128_684] : memref<16x512xf32, #tpu.memory_space<vmem>>, vector<16x16xf32>
    tpu.vector_store %arg23[%c0_683, %c128_684], %845 {strides = array<i32>} : memref<16x512xf32, #tpu.memory_space<vmem>>, vector<16x16xf32>,
    %c0_685 = arith.constant 0 : index
    %c123_686 = arith.constant 123 : index
    %847 = vector.load %arg23[%c0_685, %c123_686] : memref<16x512xf32, #tpu.memory_space<vmem>>, vector<16x16xf32>
    %c0_687 = arith.constant 0 : index
    %c0_688 = arith.constant 0 : index
    %848 = vector.load %arg17[%c0_687, %c0_688] : memref<9x16xf32, #tpu.memory_space<vmem>>, vector<1x16xf32>
    %cst_689 = arith.constant 0.000000e+00 : f32
    %849 = vector.broadcast %cst_689 : f32 to vector<1x16xf32>
    %850 = arith.cmpf one, %848, %849 : vector<1x16xf32>
    %cst_690 = arith.constant -1.000000e+30 : f32
    %851 = vector.shape_cast %850 : vector<1x16xi1> to vector<1x16xi1>
    %852 = vector.broadcast %851 : vector<1x16xi1> to vector<16x16xi1>
    %853 = vector.broadcast %cst_690 : f32 to vector<16x16xf32>
    %854 = arith.select %852, %847, %853 : vector<16x16xi1>, vector<16x16xf32>
    %855 = arith.maximumf %845, %854 : vector<16x16xf32>
    %c0_691 = arith.constant 0 : index
    %c124_692 = arith.constant 124 : index
    %856 = vector.load %arg23[%c0_691, %c124_692] : memref<16x512xf32, #tpu.memory_space<vmem>>, vector<16x16xf32>
    %c1_693 = arith.constant 1 : index
    %c0_694 = arith.constant 0 : index
    %857 = vector.load %arg17[%c1_693, %c0_694] : memref<9x16xf32, #tpu.memory_space<vmem>>, vector<1x16xf32>
    %cst_695 = arith.constant 0.000000e+00 : f32
    %858 = vector.broadcast %cst_695 : f32 to vector<1x16xf32>
    %859 = arith.cmpf one, %857, %858 : vector<1x16xf32>
    %cst_696 = arith.constant -1.000000e+30 : f32
    %860 = vector.shape_cast %859 : vector<1x16xi1> to vector<1x16xi1>
    %861 = vector.broadcast %860 : vector<1x16xi1> to vector<16x16xi1>
    %862 = vector.broadcast %cst_696 : f32 to vector<16x16xf32>
    %863 = arith.select %861, %856, %862 : vector<16x16xi1>, vector<16x16xf32>
    %864 = arith.maximumf %855, %863 : vector<16x16xf32>
    %c0_697 = arith.constant 0 : index
    %c125_698 = arith.constant 125 : index
    %865 = vector.load %arg23[%c0_697, %c125_698] : memref<16x512xf32, #tpu.memory_space<vmem>>, vector<16x16xf32>
    %c2_699 = arith.constant 2 : index
    %c0_700 = arith.constant 0 : index
    %866 = vector.load %arg17[%c2_699, %c0_700] : memref<9x16xf32, #tpu.memory_space<vmem>>, vector<1x16xf32>
    %cst_701 = arith.constant 0.000000e+00 : f32
    %867 = vector.broadcast %cst_701 : f32 to vector<1x16xf32>
    %868 = arith.cmpf one, %866, %867 : vector<1x16xf32>
    %cst_702 = arith.constant -1.000000e+30 : f32
    %869 = vector.shape_cast %868 : vector<1x16xi1> to vector<1x16xi1>
    %870 = vector.broadcast %869 : vector<1x16xi1> to vector<16x16xi1>
    %871 = vector.broadcast %cst_702 : f32 to vector<16x16xf32>
    %872 = arith.select %870, %865, %871 : vector<16x16xi1>, vector<16x16xf32>
    %873 = arith.maximumf %864, %872 : vector<16x16xf32>
    %c0_703 = arith.constant 0 : index
    %c127_704 = arith.constant 127 : index
    %874 = vector.load %arg23[%c0_703, %c127_704] : memref<16x512xf32, #tpu.memory_space<vmem>>, vector<16x16xf32>
    %c3_705 = arith.constant 3 : index
    %c0_706 = arith.constant 0 : index
    %875 = vector.load %arg17[%c3_705, %c0_706] : memref<9x16xf32, #tpu.memory_space<vmem>>, vector<1x16xf32>
    %cst_707 = arith.constant 0.000000e+00 : f32
    %876 = vector.broadcast %cst_707 : f32 to vector<1x16xf32>
    %877 = arith.cmpf one, %875, %876 : vector<1x16xf32>
    %cst_708 = arith.constant -1.000000e+30 : f32
    %878 = vector.shape_cast %877 : vector<1x16xi1> to vector<1x16xi1>
    %879 = vector.broadcast %878 : vector<1x16xi1> to vector<16x16xi1>
    %880 = vector.broadcast %cst_708 : f32 to vector<16x16xf32>
    %881 = arith.select %879, %874, %880 : vector<16x16xi1>, vector<16x16xf32>
    %882 = arith.maximumf %873, %881 : vector<16x16xf32>
    %c0_709 = arith.constant 0 : index
    %c129_710 = arith.constant 129 : index
    %883 = vector.load %arg23[%c0_709, %c129_710] : memref<16x512xf32, #tpu.memory_space<vmem>>, vector<16x16xf32>
    %c5_711 = arith.constant 5 : index
    %c0_712 = arith.constant 0 : index
    %884 = vector.load %arg17[%c5_711, %c0_712] : memref<9x16xf32, #tpu.memory_space<vmem>>, vector<1x16xf32>
    %cst_713 = arith.constant 0.000000e+00 : f32
    %885 = vector.broadcast %cst_713 : f32 to vector<1x16xf32>
    %886 = arith.cmpf one, %884, %885 : vector<1x16xf32>
    %cst_714 = arith.constant -1.000000e+30 : f32
    %887 = vector.shape_cast %886 : vector<1x16xi1> to vector<1x16xi1>
    %888 = vector.broadcast %887 : vector<1x16xi1> to vector<16x16xi1>
    %889 = vector.broadcast %cst_714 : f32 to vector<16x16xf32>
    %890 = arith.select %888, %883, %889 : vector<16x16xi1>, vector<16x16xf32>
    %891 = arith.maximumf %882, %890 : vector<16x16xf32>
    %c0_715 = arith.constant 0 : index
    %c131_716 = arith.constant 131 : index
    %892 = vector.load %arg23[%c0_715, %c131_716] : memref<16x512xf32, #tpu.memory_space<vmem>>, vector<16x16xf32>
    %c6_717 = arith.constant 6 : index
    %c0_718 = arith.constant 0 : index
    %893 = vector.load %arg17[%c6_717, %c0_718] : memref<9x16xf32, #tpu.memory_space<vmem>>, vector<1x16xf32>
    %cst_719 = arith.constant 0.000000e+00 : f32
    %894 = vector.broadcast %cst_719 : f32 to vector<1x16xf32>
    %895 = arith.cmpf one, %893, %894 : vector<1x16xf32>
    %cst_720 = arith.constant -1.000000e+30 : f32
    %896 = vector.shape_cast %895 : vector<1x16xi1> to vector<1x16xi1>
    %897 = vector.broadcast %896 : vector<1x16xi1> to vector<16x16xi1>
    %898 = vector.broadcast %cst_720 : f32 to vector<16x16xf32>
    %899 = arith.select %897, %892, %898 : vector<16x16xi1>, vector<16x16xf32>
    %900 = arith.maximumf %891, %899 : vector<16x16xf32>
    %c0_721 = arith.constant 0 : index
    %c132_722 = arith.constant 132 : index
    %901 = vector.load %arg23[%c0_721, %c132_722] : memref<16x512xf32, #tpu.memory_space<vmem>>, vector<16x16xf32>
    %c7_723 = arith.constant 7 : index
    %c0_724 = arith.constant 0 : index
    %902 = vector.load %arg17[%c7_723, %c0_724] : memref<9x16xf32, #tpu.memory_space<vmem>>, vector<1x16xf32>
    %cst_725 = arith.constant 0.000000e+00 : f32
    %903 = vector.broadcast %cst_725 : f32 to vector<1x16xf32>
    %904 = arith.cmpf one, %902, %903 : vector<1x16xf32>
    %cst_726 = arith.constant -1.000000e+30 : f32
    %905 = vector.shape_cast %904 : vector<1x16xi1> to vector<1x16xi1>
    %906 = vector.broadcast %905 : vector<1x16xi1> to vector<16x16xi1>
    %907 = vector.broadcast %cst_726 : f32 to vector<16x16xf32>
    %908 = arith.select %906, %901, %907 : vector<16x16xi1>, vector<16x16xf32>
    %909 = arith.maximumf %900, %908 : vector<16x16xf32>
    %c0_727 = arith.constant 0 : index
    %c133_728 = arith.constant 133 : index
    %910 = vector.load %arg23[%c0_727, %c133_728] : memref<16x512xf32, #tpu.memory_space<vmem>>, vector<16x16xf32>
    %c8_729 = arith.constant 8 : index
    %c0_730 = arith.constant 0 : index
    %911 = vector.load %arg17[%c8_729, %c0_730] : memref<9x16xf32, #tpu.memory_space<vmem>>, vector<1x16xf32>
    %cst_731 = arith.constant 0.000000e+00 : f32
    %912 = vector.broadcast %cst_731 : f32 to vector<1x16xf32>
    %913 = arith.cmpf one, %911, %912 : vector<1x16xf32>
    %cst_732 = arith.constant -1.000000e+30 : f32
    %914 = vector.shape_cast %913 : vector<1x16xi1> to vector<1x16xi1>
    %915 = vector.broadcast %914 : vector<1x16xi1> to vector<16x16xi1>
    %916 = vector.broadcast %cst_732 : f32 to vector<16x16xf32>
    %917 = arith.select %915, %910, %916 : vector<16x16xi1>, vector<16x16xf32>
    %918 = arith.maximumf %909, %917 : vector<16x16xf32>
    %cst_733 = arith.constant 0.000000e+00 : f32
    %919 = vector.broadcast %cst_733 : f32 to vector<16x256xf32>
    %920 = vector.extract_strided_slice %918 {offsets = [0, 0], sizes = [16, 1], strides = [1, 1]} : vector<16x16xf32> to vector<16x1xf32>
    %c0_734 = arith.constant 0 : index
    %c0_735 = arith.constant 0 : index
    %c0_736 = arith.constant 0 : index
    %921 = vector.load %arg20[%c0_734, %c0_735, %c0_736] : memref<4x16x256xf32, #tpu.memory_space<vmem>>, vector<1x16x256xf32>
    %922 = vector.shape_cast %921 : vector<1x16x256xf32> to vector<16x256xf32>
    %923 = vector.broadcast %920 : vector<16x1xf32> to vector<16x256xf32>
    %924 = arith.mulf %923, %922 : vector<16x256xf32>
    %925 = arith.addf %919, %924 : vector<16x256xf32>
    %926 = vector.extract_strided_slice %918 {offsets = [0, 2], sizes = [16, 1], strides = [1, 1]} : vector<16x16xf32> to vector<16x1xf32>
    %c1_737 = arith.constant 1 : index
    %c0_738 = arith.constant 0 : index
    %c0_739 = arith.constant 0 : index
    %927 = vector.load %arg20[%c1_737, %c0_738, %c0_739] : memref<4x16x256xf32, #tpu.memory_space<vmem>>, vector<1x16x256xf32>
    %928 = vector.shape_cast %927 : vector<1x16x256xf32> to vector<16x256xf32>
    %929 = vector.broadcast %926 : vector<16x1xf32> to vector<16x256xf32>
    %930 = arith.mulf %929, %928 : vector<16x256xf32>
    %931 = arith.addf %925, %930 : vector<16x256xf32>
    %932 = vector.extract_strided_slice %918 {offsets = [0, 8], sizes = [16, 1], strides = [1, 1]} : vector<16x16xf32> to vector<16x1xf32>
    %c2_740 = arith.constant 2 : index
    %c0_741 = arith.constant 0 : index
    %c0_742 = arith.constant 0 : index
    %933 = vector.load %arg20[%c2_740, %c0_741, %c0_742] : memref<4x16x256xf32, #tpu.memory_space<vmem>>, vector<1x16x256xf32>
    %934 = vector.shape_cast %933 : vector<1x16x256xf32> to vector<16x256xf32>
    %935 = vector.broadcast %932 : vector<16x1xf32> to vector<16x256xf32>
    %936 = arith.mulf %935, %934 : vector<16x256xf32>
    %937 = arith.addf %931, %936 : vector<16x256xf32>
    %938 = vector.extract_strided_slice %918 {offsets = [0, 10], sizes = [16, 1], strides = [1, 1]} : vector<16x16xf32> to vector<16x1xf32>
    %c3_743 = arith.constant 3 : index
    %c0_744 = arith.constant 0 : index
    %c0_745 = arith.constant 0 : index
    %939 = vector.load %arg20[%c3_743, %c0_744, %c0_745] : memref<4x16x256xf32, #tpu.memory_space<vmem>>, vector<1x16x256xf32>
    %940 = vector.shape_cast %939 : vector<1x16x256xf32> to vector<16x256xf32>
    %941 = vector.broadcast %938 : vector<16x1xf32> to vector<16x256xf32>
    %942 = arith.mulf %941, %940 : vector<16x256xf32>
    %943 = arith.addf %937, %942 : vector<16x256xf32>
    %cst_746 = arith.constant dense<0.000000e+00> : vector<256xf32>
    %944 = vector.multi_reduction <add>, %943, %cst_746 [0] : vector<16x256xf32> to vector<256xf32>
    %945 = vector.shape_cast %944 : vector<256xf32> to vector<1x256xf32>
    %cst_747 = arith.constant 0.000000e+00 : f32
    %946 = vector.broadcast %cst_747 : f32 to vector<1x256xf32>
    %947 = arith.cmpf ogt, %945, %946 : vector<1x256xf32>
    %cst_748 = arith.constant 0.000000e+00 : f32
    %948 = vector.broadcast %cst_748 : f32 to vector<1x256xf32>
    %949 = arith.minimumf %945, %948 : vector<1x256xf32>
    %950 = math.exp %949 : vector<1x256xf32>
    %cst_749 = arith.constant 1.000000e+00 : f32
    %951 = vector.broadcast %cst_749 : f32 to vector<1x256xf32>
    %952 = arith.subf %950, %951 : vector<1x256xf32>
    %953 = arith.select %947, %945, %952 : vector<1x256xi1>, vector<1x256xf32>
    %c0_750 = arith.constant 0 : index
    %c0_751 = arith.constant 0 : index
    %954 = vector.load %arg21[%c0_750, %c0_751] : memref<1x256xf32, #tpu.memory_space<vmem>>, vector<1x256xf32>
    %955 = arith.mulf %953, %954 : vector<1x256xf32>
    %cst_752 = arith.constant dense<0.000000e+00> : vector<1xf32>
    %956 = vector.multi_reduction <add>, %955, %cst_752 [1] : vector<1x256xf32> to vector<1xf32>
    %957 = vector.shape_cast %956 : vector<1xf32> to vector<1x1xf32>
    %cst_753 = arith.constant 0.000000e+00 : f32
    %958 = vector.broadcast %cst_753 : f32 to vector<1x1xf32>
    %959 = arith.subf %958, %957 : vector<1x1xf32>
    %960 = math.exp %959 : vector<1x1xf32>
    %cst_754 = arith.constant 1.000000e+00 : f32
    %961 = vector.broadcast %cst_754 : f32 to vector<1x1xf32>
    %962 = arith.addf %961, %960 : vector<1x1xf32>
    %963 = tpu.reciprocal %962 {approx = true} : vector<1x1xf32> -> vector<1x1xf32>
    %c0_755 = arith.constant 0 : index
    %c0_756 = arith.constant 0 : index
    %c0_757 = arith.constant 0 : index
    %964 = vector.load %arg22[%c0_755, %c0_756, %c0_757] : memref<1x1x1xf32, #tpu.memory_space<vmem>>, vector<1x1x1xf32>
    %965 = vector.shape_cast %964 : vector<1x1x1xf32> to vector<1x1xf32>
    %966 = vector.shape_cast %963 : vector<1x1xf32> to vector<1x1x1xf32>
    tpu.vector_store %arg22[%c0_755, %c0_756, %c0_757], %966 {strides = array<i32>} : memref<1x1x1xf32, #tpu.memory_space<vmem>>, vector<1x1x1xf32>,
    return
  }
  func.func @transform_0(%arg0: i32) -> (i32, i32, i32) {
    %c0_i32 = arith.constant 0 : i32
    %c0_i32_0 = arith.constant 0 : i32
    %c0_i32_1 = arith.constant 0 : i32
    return %arg0, %c0_i32, %c0_i32_0 : i32, i32, i32
  }
  func.func @transform_1(%arg0: i32) -> (i32, i32) {
    %c0_i32 = arith.constant 0 : i32
    %c0_i32_0 = arith.constant 0 : i32
    %c0_i32_1 = arith.constant 0 : i32
    return %c0_i32, %c0_i32_0 : i32, i32
  }
  func.func @transform_2(%arg0: i32) -> (i32, i32) {
    %c0_i32 = arith.constant 0 : i32
    %c0_i32_0 = arith.constant 0 : i32
    %c0_i32_1 = arith.constant 0 : i32
    return %c0_i32, %c0_i32_0 : i32, i32
  }
  func.func @transform_3(%arg0: i32) -> (i32, i32) {
    %c0_i32 = arith.constant 0 : i32
    %c0_i32_0 = arith.constant 0 : i32
    %c0_i32_1 = arith.constant 0 : i32
    return %c0_i32, %c0_i32_0 : i32, i32
  }
  func.func @transform_4(%arg0: i32) -> (i32, i32) {
    %c0_i32 = arith.constant 0 : i32
    %c0_i32_0 = arith.constant 0 : i32
    %c0_i32_1 = arith.constant 0 : i32
    return %c0_i32, %c0_i32_0 : i32, i32
  }
  func.func @transform_5(%arg0: i32) -> (i32, i32) {
    %c0_i32 = arith.constant 0 : i32
    %c0_i32_0 = arith.constant 0 : i32
    %c0_i32_1 = arith.constant 0 : i32
    return %c0_i32, %c0_i32_0 : i32, i32
  }
  func.func @transform_6(%arg0: i32) -> (i32, i32) {
    %c0_i32 = arith.constant 0 : i32
    %c0_i32_0 = arith.constant 0 : i32
    %c0_i32_1 = arith.constant 0 : i32
    return %c0_i32, %c0_i32_0 : i32, i32
  }
  func.func @transform_7(%arg0: i32) -> (i32, i32) {
    %c0_i32 = arith.constant 0 : i32
    %c0_i32_0 = arith.constant 0 : i32
    %c0_i32_1 = arith.constant 0 : i32
    return %c0_i32, %c0_i32_0 : i32, i32
  }
  func.func @transform_8(%arg0: i32) -> (i32, i32) {
    %c0_i32 = arith.constant 0 : i32
    %c0_i32_0 = arith.constant 0 : i32
    %c0_i32_1 = arith.constant 0 : i32
    return %c0_i32, %c0_i32_0 : i32, i32
  }
  func.func @transform_9(%arg0: i32) -> (i32, i32) {
    %c0_i32 = arith.constant 0 : i32
    %c0_i32_0 = arith.constant 0 : i32
    %c0_i32_1 = arith.constant 0 : i32
    return %c0_i32, %c0_i32_0 : i32, i32
  }
  func.func @transform_10(%arg0: i32) -> (i32, i32) {
    %c0_i32 = arith.constant 0 : i32
    %c0_i32_0 = arith.constant 0 : i32
    %c0_i32_1 = arith.constant 0 : i32
    return %c0_i32, %c0_i32_0 : i32, i32
  }
  func.func @transform_11(%arg0: i32) -> (i32, i32) {
    %c0_i32 = arith.constant 0 : i32
    %c0_i32_0 = arith.constant 0 : i32
    %c0_i32_1 = arith.constant 0 : i32
    return %c0_i32, %c0_i32_0 : i32, i32
  }
  func.func @transform_12(%arg0: i32) -> (i32, i32) {
    %c0_i32 = arith.constant 0 : i32
    %c0_i32_0 = arith.constant 0 : i32
    %c0_i32_1 = arith.constant 0 : i32
    return %c0_i32, %c0_i32_0 : i32, i32
  }
  func.func @transform_13(%arg0: i32) -> (i32, i32) {
    %c0_i32 = arith.constant 0 : i32
    %c0_i32_0 = arith.constant 0 : i32
    %c0_i32_1 = arith.constant 0 : i32
    return %c0_i32, %c0_i32_0 : i32, i32
  }
  func.func @transform_14(%arg0: i32) -> (i32, i32) {
    %c0_i32 = arith.constant 0 : i32
    %c0_i32_0 = arith.constant 0 : i32
    %c0_i32_1 = arith.constant 0 : i32
    return %c0_i32, %c0_i32_0 : i32, i32
  }
  func.func @transform_15(%arg0: i32) -> (i32, i32) {
    %c0_i32 = arith.constant 0 : i32
    %c0_i32_0 = arith.constant 0 : i32
    %c0_i32_1 = arith.constant 0 : i32
    return %c0_i32, %c0_i32_0 : i32, i32
  }
  func.func @transform_16(%arg0: i32) -> (i32, i32) {
    %c0_i32 = arith.constant 0 : i32
    %c0_i32_0 = arith.constant 0 : i32
    %c0_i32_1 = arith.constant 0 : i32
    return %c0_i32, %c0_i32_0 : i32, i32
  }
  func.func @transform_17(%arg0: i32) -> (i32, i32) {
    %c0_i32 = arith.constant 0 : i32
    %c0_i32_0 = arith.constant 0 : i32
    %c0_i32_1 = arith.constant 0 : i32
    return %c0_i32, %c0_i32_0 : i32, i32
  }
  func.func @transform_18(%arg0: i32) -> (i32, i32) {
    %c0_i32 = arith.constant 0 : i32
    %c0_i32_0 = arith.constant 0 : i32
    %c0_i32_1 = arith.constant 0 : i32
    return %c0_i32, %c0_i32_0 : i32, i32
  }
  func.func @transform_19(%arg0: i32) -> (i32, i32, i32) {
    %c0_i32 = arith.constant 0 : i32
    %c0_i32_0 = arith.constant 0 : i32
    %c0_i32_1 = arith.constant 0 : i32
    %c0_i32_2 = arith.constant 0 : i32
    return %c0_i32, %c0_i32_0, %c0_i32_1 : i32, i32, i32
  }
  func.func @transform_20(%arg0: i32) -> (i32, i32) {
    %c0_i32 = arith.constant 0 : i32
    %c0_i32_0 = arith.constant 0 : i32
    %c0_i32_1 = arith.constant 0 : i32
    return %c0_i32, %c0_i32_0 : i32, i32
  }
  func.func @transform_21(%arg0: i32) -> (i32, i32, i32) {
    %c0_i32 = arith.constant 0 : i32
    %c0_i32_0 = arith.constant 0 : i32
    %c0_i32_1 = arith.constant 0 : i32
    return %arg0, %c0_i32, %c0_i32_0 : i32, i32, i32
  }
}

</mosaic_0001>

<bundles_post_ra>
// kernel: sconv_forward.1
= control target key start
LH: loop header
LB: loop body
LE: loop exit
PB: predicated region body
PF: predicated region fallthrough
CT: control target
= control target key end

     0   :  { %s4684_s0 = inlined_call_operand.vmem [shape: f32[2,1,256], index: 0, kind: input, shape index: {}]   ;;  %s4685_s1 = inlined_call_operand.vmem [shape: f32[1,2], index: 1, kind: input, shape index: {}]   ;;  %s4686_s2 = inlined_call_operand.vmem [shape: bf16[4,25], index: 2, kind: input, shape index: {}]   ;;  %s4687_s3 = inlined_call_operand.vmem [shape: f32[4,2], index: 3, kind: input, shape index: {}]   ;;  %s4688_s4 = inlined_call_operand.vmem [shape: bf16[4,36], index: 4, kind: input, shape index: {}]   ;;  %s4689_s5 = inlined_call_operand.vmem [shape: f32[4,2], index: 5, kind: input, shape index: {}]   ;;  %s4690_s6 = inlined_call_operand.vmem [shape: bf16[8,36], index: 6, kind: input, shape index: {}]   ;;  %s4691_s7 = inlined_call_operand.vmem [shape: f32[8,2], index: 7, kind: input, shape index: {}]   ;;  %s4692_s8 = inlined_call_operand.vmem [shape: bf16[8,72], index: 8, kind: input, shape index: {}]   ;;  %s4693_s9 = inlined_call_operand.vmem [shape: f32[8,2], index: 9, kind: input, shape index: {}]   ;;  %s4694_s10 = inlined_call_operand.vmem [shape: bf16[16,72], index: 10, kind: input, shape index: {}]   ;;  %s4695_s11 = inlined_call_operand.vmem [shape: f32[16,2], index: 11, kind: input, shape index: {}]   ;;  %s4696_s12 = inlined_call_operand.vmem [shape: bf16[16,144], index: 12, kind: input, shape index: {}]   ;;  %s4697_s13 = inlined_call_operand.vmem [shape: f32[25,256], index: 13, kind: input, shape index: {}]   ;;  %s4698_s14 = inlined_call_operand.vmem [shape: f32[9,256], index: 14, kind: input, shape index: {}]   ;;  %s4699_s15 = inlined_call_operand.vmem [shape: f32[9,49], index: 15, kind: input, shape index: {}]   ;;  %s4700_s16 = inlined_call_operand.vmem [shape: f32[9,16], index: 16, kind: input, shape index: {}]   ;;  %s4701_s17 = inlined_call_operand.vmem [shape: f32[256,49], index: 17, kind: input, shape index: {}]   ;;  %s4702_s18 = inlined_call_operand.vmem [shape: f32[49,16], index: 18, kind: input, shape index: {}]   ;;  %s4703_s19 = inlined_call_operand.vmem [shape: f32[4,16,256], index: 19, kind: input, shape index: {}]   ;;  %s4704_s20 = inlined_call_operand.vmem [shape: f32[1,256], index: 20, kind: input, shape index: {}]   ;;  %s4705_s21 = inlined_call_operand.vmem [shape: f32[2,1,1], index: 21, kind: output, shape index: {}]  }
   0x1   :  { %4725 = sst [smem:[#allocation4_spill]] %s4684_s0 }
   0x2   :  { %4726 = sst [smem:[#allocation5_spill]] %s4685_s1 }
   0x3   :  { %4727 = sst [smem:[#allocation6_spill]] %s4686_s2  ;;  %s3403_s2 = smov 0  }
   0x4   :  { %4728 = sst [smem:[#allocation7_spill]] %s4687_s3 }
   0x5   :  { %4729 = sst [smem:[#allocation8_spill]] %s4688_s4 }
   0x6   :  { %4730 = sst [smem:[#allocation9_spill]] %s4689_s5 }
   0x7 LB: > { %s3018_s25 = sadd.s32 4294967295, %s3250_s2   ;;  %p3022_p0 = scmp.ge.s32.totalorder %s3250_s2, 1  ;;  %s3250_s2 = sphi %s3403_s2, %s31_s2  }
   0x8   : > { %p586_p1 = scmp.lt.s32.totalorder %s3250_s2, 3 }
   0xa   : > { %p587_p2 = pnand %p3022_p0, %p586_p1 }
   0xb   : > { %s4731_s3 = sld [smem:[#allocation5_spill]] (!%p587_p2)  ;;  %p643_p3 = scmp.lt.s32.totalorder (!%p587_p2), %s3018_s25, 1 }
   0xc   : > { %590 = sbr.rel (%p587_p2) target bundleno = 3112 (0xc28), region = 104  ;;  %s4732_s4 = sld [smem:[#allocation4_spill]] (!%p587_p2) }
   0xd   : > { %s3254_s5 = smov (!%p587_p2), 79   ;;  %s3255_s22 = smov (!%p587_p2), 94  }
   0xe   : > { %s3256_s23 = smov (!%p587_p2), 96   ;;  %s4710_s26 = smov (!%p587_p2), 17  }
   0xf   : > { %s3258_s27 = smov (!%p587_p2), 93   ;;  %s3261_s29 = smov (!%p587_p2), 80  }
  0x10   : > { %s3262_s0 = smov (!%p587_p2), 81   ;;  %s3268_s1 = smov (!%p587_p2), 16  }
  0x11   : > { %v652_v0 = vld [vmem:[%s4731_s3] sm:$0x1]  ;;  %v3252_v1 = vmov 0   ;;  %v3253_v2 = vmov 1   ;;  %s4843_s25 = smov (!%p643_p3, %s3018_s25), 1  ;;  %v672_v12 = vlaneseq  ;;  %s3259_s3 = smov 95  }
  0x12   : > { %3161 = vset.pattern.permute.xlu0 %v3252_v1  ;;  %3164 = vset.pattern.permute.xlu1 %v3253_v2  ;;  %s3023_s28 = sshll.u32 %s4843_s25, 1  ;;  %v3030_v20 = vld [vmem:[%s4697_s13 + $0x6] ss:$8 sm:$0x3]  ;;  %s3269_s24 = smov 110   ;;  %vm948_vm3 = vcmask 769024  }
  0x13   : > { %655 = vperm.xlu0 %3161, %v652_v0   ;;  %3206 = vset.pattern.permute.xlu2 %v3253_v2  ;;  %s646_s30 = scalar_lea.vmem %s4732_s4, %s3023_s28  ;;  %vm3425_vm0 = vcmp.lt.s32.totalorder %v672_v12, 256  ;;  %vm770_vm2 = vcmp.ne.f32.partialorder %v3030_v20, 0.0  ;;  %s3260_s28 = smov 14   ;;  %v3042_v44 = vld [vmem:[%s4697_s13 + $0x22] ss:$8 sm:$0x3] }
  0x14   : > { %v651_v5 = vld [vmem:[%s646_s30] sm:$0x3]  ;;  %s4719_s4 = smov 127   ;;  %s3264_s30 = smov 77   ;;  %vm943_vm4 = vcmp.ne.f32.partialorder %v3042_v44, 0.0  ;;  %vm963_vm5 = vcmask 760832  }
  0x15   : > { %v3043_v49 = vld [vmem:[%s4697_s13 + $0x23] ss:$8 sm:$0x3]  ;;  %v3045_v54 = vld [vmem:[%s4697_s13 + $0x25] ss:$8 sm:$0x3] }
  0x16   : > { %vm958_vm6 = vcmp.ne.f32.partialorder %v3043_v49, 0.0  ;;  %vm993_vm7 = vcmask 654336   ;;  %vm988_vm8 = vcmp.ne.f32.partialorder %v3045_v54, 0.0  ;;  %v3046_v59 = vld [vmem:[%s4697_s13 + $0x26] ss:$8 sm:$0x3] }
  0x17   : > { %v3048_v60 = vld [vmem:[%s4697_s13 + $0x30] ss:$8 sm:$0x3]  ;;  %v3040_v61 = vld [vmem:[%s4697_s13 + $0x20] ss:$8 sm:$0x3] }
  0x18   : > { %vm1008_vm9 = vcmask 646144   ;;  %vm1003_vm10 = vcmp.ne.f32.partialorder %v3046_v59, 0.0  ;;  %vm1038_vm11 = vcmask 629760   ;;  %vm918_vm12 = vcmask 785408   ;;  %v1153_v14 = vld [vmem:[#allocation2] sm:$0xf] }
  0x19   : > { %vm1033_vm13 = vcmp.ne.f32.partialorder %v3048_v60, 0.0  ;;  %vm913_vm14 = vcmp.ne.f32.partialorder %v3040_v61, 0.0  ;;  %v3041_v12 = vld [vmem:[%s4697_s13 + $0x21] ss:$8 sm:$0x3]  ;;  %vm686_vm15 = vcmask 138240  }
  0x1a   : > { %v3031_v44 = vld [vmem:[%s4697_s13 + $0x7] ss:$8 sm:$0x3]  ;;  %v3036_v59 = vld [vmem:[%s4697_s13 + $0x14] ss:$8 sm:$0x3] }
  0x1b   : > { %3162 = vset.pattern.permute.xlu0 %v3253_v2  ;;  %v3025_v60 = vld [vmem:[%s4697_s13 + $0x1] ss:$8 sm:$0x3] }
  0x1c   : > { %661 = vperm.xlu0 %3162, %v652_v0  }
  0x24   : > { %3163 = vset.pattern.permute.xlu0 %v3252_v1 }
  0x85   : > { %v656_v3 = vpop.permute.xlu0 %655 }
  0x86   : > { %v658_v4 = vperm.slane %v656_v3, 0 }
  0x88   : > { %v659_v7 = vmul.f32 %v658_v4, %v651_v5 }
  0x8e   : > { %v662_v6 = vpop.permute.xlu0 %661 }
  0x8f   : > { %v664_v8 = vperm.slane %v662_v6, 0 }
  0x91   : > { %v665_v9 = vadd.f32 %v664_v8, %v659_v7 }
  0x93   : > { %v667_v10 = vmin.f32 %v665_v9, 0.0  ;;  %vm666_vm1 = vcmp.gt.f32.partialorder %v665_v9, 0.0 }
  0x95   : > { %v668_v11 = vmul.f32 1.442695, %v667_v10 }
  0x97   : > { %3220 = vpow2.f32 %v668_v11 }
  0x9d   : > { %v3221_v13 = vpop.eup %3220 }
  0x9e   : > { %v3024_v15 = vadd.f32 -1.0, %v3221_v13  ;;  %v680_v13 = vld [vmem:[%s4697_s13] ss:$8 sm:$0x3] }
  0xa0   : > { %v671_v16 = vsel %vm666_vm1, %v665_v9, %v3024_v15  ;;  %v3026_v15 = vld [vmem:[%s4697_s13 + $0x2] ss:$8 sm:$0x3]  ;;  %vm933_vm1 = vcmask 777216  }
  0xa1   : > { %677 = vst.msk [vmem:[#allocation2 + $0x8] ss:$8 sm:$0x3] %vm3425_vm0, %v671_v16 }
  0xa8   : > { %v1000_v17 = vld [vmem:[#allocation2 + $0x8] ss:$8 sm:$0x7] }
  0xa9   : > { %1005 = vrot.lane.b32.xlu0 %v1000_v17, %s3254_s5  ;;  %v940_v18 = vld [vmem:[#allocation2 + $0x8] ss:$8 sm:$0x7]  ;;  %s3265_s5 = smov 78  }
  0xaa   : > { %v910_v19 = vld [vmem:[#allocation2 + $0x8] ss:$8 sm:$0x7]  ;;  %945 = vrot.lane.b32.xlu2 %v940_v18, %s3255_s22  ;;  %s3266_s22 = smov 113  }
  0xab   : > { %915 = vrot.lane.b32.xlu1 %v910_v19, %s3256_s23  ;;  %v767_v21 = vld [vmem:[#allocation2 + $0x8] ss:$8 sm:$0x3]  ;;  %s4706_s23 = smov 15  }
  0xac   : > { %v679_v22 = vld [vmem:[#allocation2] ss:$8 sm:$0x7]  ;;  %v771_v25 = vsel %vm770_vm2, %v767_v21, 0.0  ;;  %vm715_vm2 = vcmask 121856  }
  0xad   : > { %v955_v23 = vld [vmem:[#allocation2 + $0x8] ss:$8 sm:$0x7]  ;;  %773 = vst.msk [vmem:[#allocation3 + $0x6] ss:$8 sm:$0x3] %vm3425_vm0, %v771_v25 }
  0xae   : > { %v925_v24 = vld [vmem:[#allocation2 + $0x8] ss:$8 sm:$0x7] }
  0xaf   : > { %v722_v26 = vld [vmem:[#allocation2] ss:$8 sm:$0x7] }
  0xb0   : > { %v985_v27 = vld [vmem:[#allocation2 + $0x8] ss:$8 sm:$0x7] }
  0xb1   : > { %683 = vrot.lane.b32.xlu0 %v679_v22, %s4710_s26  ;;  %v970_v28 = vld [vmem:[#allocation2 + $0x8] ss:$8 sm:$0x7]  ;;  %s4737_s26 = smov 17  }
  0xb2   : > { %960 = vrot.lane.b32.xlu2 %v955_v23, %s3258_s27  ;;  %v775_v29 = vld [vmem:[#allocation2 + $0x8] ss:$8 sm:$0x7]  ;;  %s4721_s27 = smov 1  }
  0xb3   : > { %930 = vrot.lane.b32.xlu1 %v925_v24, %s3259_s3  ;;  %v1030_v30 = vld [vmem:[#allocation2 + $0x8] ss:$8 sm:$0x7]  ;;  %s3271_s3 = smov 13  }
  0xb4   : > { %v1015_v31 = vld [vmem:[#allocation2 + $0x8] ss:$8 sm:$0x7] }
  0xb5   : > { %v820_v32 = vld [vmem:[#allocation2 + $0x8] ss:$8 sm:$0x7] }
  0xb6   : > { %v707_v33 = vld [vmem:[#allocation2] ss:$8 sm:$0x7] }
  0xb7   : > { %v692_v34 = vld [vmem:[#allocation2] ss:$8 sm:$0x7] }
  0xb8   : > { %v865_v35 = vld [vmem:[#allocation2 + $0x8] ss:$8 sm:$0x7] }
  0xb9   : > { %727 = vrot.lane.b32.xlu0 %v722_v26, %s3260_s28  ;;  %v752_v36 = vld [vmem:[#allocation2] ss:$8 sm:$0x7]  ;;  %s4708_s28 = smov 125  }
  0xba   : > { %990 = vrot.lane.b32.xlu2 %v985_v27, %s3261_s29  ;;  %v737_v37 = vld [vmem:[#allocation2] ss:$8 sm:$0x7]  ;;  %s3273_s29 = smov 126  }
  0xbb   : > { %975 = vrot.lane.b32.xlu1 %v970_v28, %s3262_s0  ;;  %v805_v38 = vld [vmem:[#allocation2 + $0x8] ss:$8 sm:$0x7]  ;;  %s3274_s0 = smov 111  }
  0xbc   : > { %v790_v39 = vld [vmem:[#allocation2 + $0x8] ss:$8 sm:$0x7]  ;;  %v3044_v28 = vld [vmem:[%s4697_s13 + $0x24] ss:$8 sm:$0x3] }
  0xbd   : > { %v850_v40 = vld [vmem:[#allocation2 + $0x8] ss:$8 sm:$0x7] }
  0xbe   : > { %v835_v41 = vld [vmem:[#allocation2 + $0x8] ss:$8 sm:$0x7] }
  0xbf   : > { %v895_v42 = vld [vmem:[#allocation2 + $0x8] ss:$8 sm:$0x7] }
  0xc0   : > { %v880_v43 = vld [vmem:[#allocation2 + $0x8] ss:$8 sm:$0x7] }
  0xc1   : > { %780 = vrot.lane.b32.xlu0 %v775_v29, %s4719_s4  ;;  %v3027_v29 = vld [vmem:[%s4697_s13 + $0x3] ss:$8 sm:$0x3] }
  0xc2   : > { %1035 = vrot.lane.b32.xlu2 %v1030_v30, %s3264_s30  ;;  %s3275_s30 = smov 112   ;;  %v3029_v30 = vld [vmem:[%s4697_s13 + $0x5] ss:$8 sm:$0x3] }
  0xc3   : > { %1020 = vrot.lane.b32.xlu1 %v1015_v31, %s3265_s5  ;;  %s3276_s5 = smov 97  }
  0xc9   : > { %825 = vrot.lane.b32.xlu0 %v820_v32, %s3266_s22 }
  0xca   : > { %712 = vrot.lane.b32.xlu2 %v707_v33, %s4706_s23  ;;  %s4735_s23 = sld [smem:[#allocation7_spill]] }
  0xcb   : > { %697 = vrot.lane.b32.xlu1 %v692_v34, %s3268_s1 }
  0xd1   : > { %870 = vrot.lane.b32.xlu0 %v865_v35, %s3269_s24  ;;  %s3277_s24 = smov 109  }
  0xd2   : > { %757 = vrot.lane.b32.xlu2 %v752_v36, %s4721_s27 }
  0xd3   : > { %742 = vrot.lane.b32.xlu1 %v737_v37, %s3271_s3  ;;  %s3286_s3 = smov 3  }
  0xda   : > { %810 = vrot.lane.b32.xlu2 %v805_v38, %s4708_s28  ;;  %s3284_s28 = smov 6  }
  0xdb   : > { %795 = vrot.lane.b32.xlu1 %v790_v39, %s3273_s29 }
  0xe2   : > { %855 = vrot.lane.b32.xlu2 %v850_v40, %s3274_s0 }
  0xe3   : > { %840 = vrot.lane.b32.xlu1 %v835_v41, %s3275_s30 }
  0xea   : > { %900 = vrot.lane.b32.xlu2 %v895_v42, %s3276_s5  ;;  %s4739_s5 = sld [smem:[#allocation8_spill]] }
  0xeb   : > { %885 = vrot.lane.b32.xlu1 %v880_v43, %s3277_s24  ;;  %v3047_v43 = vld [vmem:[%s4697_s13 + $0x27] ss:$8 sm:$0x3]  ;;  %s4738_s24 = smov 15  }
 0x104   : > { %v946_v45 = vpop.permute.xlu2 %945 }
 0x105   : > { %v947_v46 = vrot.slane %v946_v45, 1 }
 0x107   : > { %v949_v47 = vsel %vm948_vm3, %v946_v45, %v947_v46  ;;  %vm681_vm3 = vcmp.ne.f32.partialorder %v680_v13, 0.0  ;;  %v3033_v45 = vld [vmem:[%s4697_s13 + $0x11] ss:$8 sm:$0x3] }
 0x108   : > { %v951_v48 = vsel %vm943_vm4, %v949_v47, 0.0  ;;  %vm928_vm4 = vcmp.ne.f32.partialorder %v3041_v12, 0.0 }
 0x109   : > { %953 = vst.msk [vmem:[#allocation3 + $0x22] ss:$8 sm:$0x3] %vm3425_vm0, %v951_v48 }
 0x10c   : > { %v961_v50 = vpop.permute.xlu2 %960 }
 0x10d   : > { %v962_v51 = vrot.slane %v961_v50, 1 }
 0x10f   : > { %v964_v52 = vsel %vm963_vm5, %v961_v50, %v962_v51  ;;  %vm710_vm5 = vcmp.ne.f32.partialorder %v3026_v15, 0.0 }
 0x110   : > { %v966_v53 = vsel %vm958_vm6, %v964_v52, 0.0  ;;  %vm730_vm6 = vcmask 113664  }
 0x111   : > { %968 = vst.msk [vmem:[#allocation3 + $0x23] ss:$8 sm:$0x3] %vm3425_vm0, %v966_v53 }
 0x114   : > { %v991_v55 = vpop.permute.xlu2 %990 }
 0x115   : > { %v992_v56 = vrot.slane %v991_v55, 1 }
 0x117   : > { %v994_v57 = vsel %vm993_vm7, %v991_v55, %v992_v56  ;;  %vm978_vm7 = vcmask 662528   ;;  %v3034_v56 = vld [vmem:[%s4697_s13 + $0x12] ss:$8 sm:$0x3] }
 0x118   : > { %v996_v58 = vsel %vm988_vm8, %v994_v57, 0.0  ;;  %vm760_vm8 = vcmask 7168  }
 0x119   : > { %998 = vst.msk [vmem:[#allocation3 + $0x25] ss:$8 sm:$0x3] %vm3425_vm0, %v996_v58 }
 0x11b   : > { %v1006_v62 = vpop.permute.xlu0 %1005 }
 0x11c   : > { %v1007_v63 = vrot.slane %v1006_v62, 1  ;;  %v1036_v0 = vpop.permute.xlu2 %1035 }
 0x11d   : > { %v916_v3 = vpop.permute.xlu1 %915  ;;  %v1037_v4 = vrot.slane %v1036_v0, 1 }
 0x11e   : > { %v917_v5 = vrot.slane %v916_v3, 1  ;;  %v1009_v6 = vsel %vm1008_vm9, %v1006_v62, %v1007_v63  ;;  %vm725_vm9 = vcmp.ne.f32.partialorder %v3027_v29, 0.0 }
 0x11f   : > { %v1011_v7 = vsel %vm1003_vm10, %v1009_v6, 0.0  ;;  %v1039_v8 = vsel %vm1038_vm11, %v1036_v0, %v1037_v4  ;;  %vm973_vm10 = vcmp.ne.f32.partialorder %v3044_v28, 0.0  ;;  %vm755_vm11 = vcmp.ne.f32.partialorder %v3029_v30, 0.0 }
 0x120   : > { %v919_v9 = vsel %vm918_vm12, %v916_v3, %v917_v5  ;;  %1013 = vst.msk [vmem:[#allocation3 + $0x26] ss:$8 sm:$0x3] %vm3425_vm0, %v1011_v7  ;;  %v1041_v10 = vsel %vm1033_vm13, %v1039_v8, 0.0  ;;  %vm783_vm12 = vcmask 1039360   ;;  %vm1023_vm13 = vcmask 637952  }
 0x121   : > { %v921_v11 = vsel %vm913_vm14, %v919_v9, 0.0  ;;  %1043 = vst.msk [vmem:[#allocation3 + $0x30] ss:$8 sm:$0x3] %vm3425_vm0, %v1041_v10  ;;  %vm813_vm14 = vcmask 1022976   ;;  %v3278_v3 = vmov 65535  }
 0x122   : > { %923 = vst.msk [vmem:[#allocation3 + $0x20] ss:$8 sm:$0x3] %vm3425_vm0, %v921_v11  ;;  %v3037_v11 = vld [vmem:[%s4697_s13 + $0x15] ss:$8 sm:$0x3] }
 0x123   : > { %v684_v16 = vpop.permute.xlu0 %683 }
 0x124   : > { %v713_v18 = vpop.permute.xlu2 %712  ;;  %v685_v19 = vrot.slane %v684_v16, 1 }
 0x125   : > { %v931_v17 = vpop.permute.xlu1 %930  ;;  %v714_v21 = vrot.slane %v713_v18, 1 }
 0x126   : > { %v932_v20 = vrot.slane %v931_v17, 1  ;;  %v687_v22 = vsel %vm686_vm15, %v684_v16, %v685_v19 }
 0x127   : > { %v716_v24 = vsel %vm715_vm2, %v713_v18, %v714_v21  ;;  %v689_v25 = vsel %vm681_vm3, %v687_v22, 0.0  ;;  %vm1018_vm3 = vcmp.ne.f32.partialorder %v3047_v43, 0.0  ;;  %v3028_v22 = vld [vmem:[%s4697_s13 + $0x4] ss:$8 sm:$0x3] }
 0x128   : > { %v934_v23 = vsel %vm933_vm1, %v931_v17, %v932_v20  ;;  %v718_v27 = vsel %vm710_vm5, %v716_v24, 0.0  ;;  %690 = vst.msk [vmem:[#allocation3] ss:$8 sm:$0x3] %vm3425_vm0, %v689_v25  ;;  %vm778_vm1 = vcmp.ne.f32.partialorder %v3031_v44, 0.0  ;;  %vm4712_vm5 = vcmask 1043456  }
 0x129   : > { %v936_v26 = vsel %vm928_vm4, %v934_v23, 0.0  ;;  %720 = vst.msk [vmem:[#allocation3 + $0x2] ss:$8 sm:$0x3] %vm3425_vm0, %v718_v27  ;;  %vm808_vm4 = vcmp.ne.f32.partialorder %v3033_v45, 0.0  ;;  %v1064_v4 = vsel %vm4712_vm5, 4294967295, %v3278_v3 }
 0x12a   : > { %938 = vst.msk [vmem:[#allocation3 + $0x21] ss:$8 sm:$0x3] %vm3425_vm0, %v936_v26  ;;  %v1051_v12 = vld [vmem:[#allocation3 + $0x30] sm:$0x1] }
 0x12b   : > { %v728_v31 = vpop.permute.xlu0 %727  ;;  %v3039_v17 = vld [vmem:[%s4697_s13 + $0x17] ss:$8 sm:$0x3]  ;;  %v1052_v21 = vld [vmem:[#allocation3 + $0x38] sm:$0x1] }
 0x12c   : > { %v758_v33 = vpop.permute.xlu2 %757  ;;  %v729_v34 = vrot.slane %v728_v31, 1  ;;  %v3035_v45 = vld [vmem:[%s4697_s13 + $0x13] ss:$8 sm:$0x3]  ;;  %v1299_v3 = vld [vmem:[#allocation2 + $0x18] sm:$0xf] }
 0x12d   : > { %v976_v32 = vpop.permute.xlu1 %975  ;;  %v759_v36 = vrot.slane %v758_v33, 1 }
 0x12e   : > { %v977_v35 = vrot.slane %v976_v32, 1  ;;  %v731_v37 = vsel %vm730_vm6, %v728_v31, %v729_v34  ;;  %vm858_vm6 = vcmask 908288  }
 0x12f   : > { %v761_v39 = vsel %vm760_vm8, %v758_v33, %v759_v36  ;;  %v733_v40 = vsel %vm725_vm9, %v731_v37, 0.0  ;;  %vm828_vm9 = vcmask 924672  }
 0x130   : > { %v979_v38 = vsel %vm978_vm7, %v976_v32, %v977_v35  ;;  %v763_v42 = vsel %vm755_vm11, %v761_v39, 0.0  ;;  %735 = vst.msk [vmem:[#allocation3 + $0x3] ss:$8 sm:$0x3] %vm3425_vm0, %v733_v40  ;;  %vm4713_vm7 = vcmask 130048   ;;  %vm1063_vm11 = vcmask 1044480  }
 0x131   : > { %v981_v41 = vsel %vm973_vm10, %v979_v38, 0.0  ;;  %765 = vst.msk [vmem:[#allocation3 + $0x5] ss:$8 sm:$0x3] %vm3425_vm0, %v763_v42  ;;  %vm823_vm10 = vcmp.ne.f32.partialorder %v3034_v56, 0.0  ;;  %v1065_v13 = vsel %vm1063_vm11, %v1064_v4, 0 }
 0x132   : > { %983 = vst.msk [vmem:[#allocation3 + $0x24] ss:$8 sm:$0x3] %vm3425_vm0, %v981_v41  ;;  %vm898_vm11 = vcmp.ne.f32.partialorder %v3039_v17, 0.0  ;;  %v1098_v41 = vld [vmem:[%s4735_s23] sm:$0xf] }
 0x133   : > { %v781_v46 = vpop.permute.xlu0 %780  ;;  %v3032_v38 = vld [vmem:[%s4697_s13 + $0x10] ss:$8 sm:$0x3]  ;;  %v1361_v42 = vld [vmem:[#allocation2 + $0x18] sm:$0xf]  ;;  %1101 = vperm.xlu0 %3163, %v1098_v41   ;;  %1107 = vperm.xlu1 %3164, %v1098_v41   ;;  %s4736_s23 = sld [smem:[#allocation6_spill]] }
 0x134   : > { %v811_v48 = vpop.permute.xlu2 %810  ;;  %v782_v49 = vrot.slane %v781_v46, 1  ;;  %1377 = vrot.lane.b32.xlu2 %v1361_v42, %s3274_s0 }
 0x135   : > { %v1021_v47 = vpop.permute.xlu1 %1020  ;;  %v812_v51 = vrot.slane %v811_v48, 1 }
 0x136   : > { %v1022_v50 = vrot.slane %v1021_v47, 1  ;;  %v784_v52 = vsel %vm783_vm12, %v781_v46, %v782_v49 }
 0x137   : > { %v814_v54 = vsel %vm813_vm14, %v811_v48, %v812_v51  ;;  %v786_v55 = vsel %vm778_vm1, %v784_v52, 0.0  ;;  %vm695_vm14 = vcmp.ne.f32.partialorder %v3025_v60, 0.0  ;;  %vm903_vm1 = vcmask 793600  }
 0x138   : > { %v1024_v53 = vsel %vm1023_vm13, %v1021_v47, %v1022_v50  ;;  %v816_v58 = vsel %vm808_vm4, %v814_v54, 0.0  ;;  %788 = vst.msk [vmem:[#allocation3 + $0x7] ss:$8 sm:$0x3] %vm3425_vm0, %v786_v55  ;;  %vm853_vm13 = vcmp.ne.f32.partialorder %v3036_v59, 0.0  ;;  %vm745_vm4 = vcmask 105472  }
 0x139   : > { %v1026_v57 = vsel %vm1018_vm3, %v1024_v53, 0.0  ;;  %818 = vst.msk [vmem:[#allocation3 + $0x11] ss:$8 sm:$0x3] %vm3425_vm0, %v816_v58  ;;  %vm873_vm3 = vcmask 900096  }
 0x13a   : > { %1028 = vst.msk [vmem:[#allocation3 + $0x27] ss:$8 sm:$0x3] %vm3425_vm0, %v1026_v57  ;;  %v3038_v50 = vld [vmem:[%s4697_s13 + $0x16] ss:$8 sm:$0x3] }
 0x13b   : > { %v826_v61 = vpop.permute.xlu0 %825  ;;  %3205 = vset.pattern.permute.xlu1 %v3252_v1  ;;  %1167 = vrot.lane.b32.xlu0 %v1153_v14, %s3268_s1 }
 0x13c   : > { %v856_v62 = vpop.permute.xlu2 %855  ;;  %v827_v0 = vrot.slane %v826_v61, 1 }
 0x13d   : > { %v698_v63 = vpop.permute.xlu1 %697  ;;  %v857_v5 = vrot.slane %v856_v62, 1 }
 0x13e   : > { %v699_v6 = vrot.slane %v698_v63, 1  ;;  %v829_v7 = vsel %vm828_vm9, %v826_v61, %v827_v0  ;;  %v1057_v61 = vld [vmem:[%s4736_s23] sm:$0x3]  ;;  %v1215_v0 = vld [vmem:[#allocation2] sm:$0xf]  ;;  %s4714_s23 = smov 7  }
 0x13f   : > { %v859_v8 = vsel %vm858_vm6, %v856_v62, %v857_v5  ;;  %v831_v10 = vsel %vm823_vm10, %v829_v7, 0.0  ;;  %vm868_vm10 = vcmp.ne.f32.partialorder %v3037_v11, 0.0  ;;  %v1265_v62 = vld [vmem:[#allocation2 + $0x18] sm:$0xf] }
 0x140   : > { %v701_v9 = vsel %vm4713_vm7, %v698_v63, %v699_v6  ;;  %v861_v15 = vsel %vm853_vm13, %v859_v8, 0.0  ;;  %833 = vst.msk [vmem:[#allocation3 + $0x12] ss:$8 sm:$0x3] %vm3425_vm0, %v831_v10  ;;  %vm740_vm13 = vcmp.ne.f32.partialorder %v3028_v22, 0.0  ;;  %1281 = vrot.lane.b32.xlu2 %v1265_v62, %s4719_s4 }
 0x141   : > { %v703_v16 = vsel %vm695_vm14, %v701_v9, 0.0  ;;  %v1049_v18 = vld [vmem:[#allocation3 + $0x20] sm:$0xff]  ;;  %863 = vst.msk [vmem:[#allocation3 + $0x14] ss:$8 sm:$0x3] %vm3425_vm0, %v861_v15  ;;  %v1050_v20 = vld [vmem:[#allocation3 + $0x28] sm:$0xff] }
 0x142   : > { %v1055_v19 = vpack.c.bf16 %v1051_v12, %v1049_v18  ;;  %705 = vst.msk [vmem:[#allocation3 + $0x1] ss:$8 sm:$0x3] %vm3425_vm0, %v703_v16  ;;  %v1056_v23 = vpack.c.bf16 %v1052_v21, %v1050_v20  ;;  %vm798_vm14 = vcmask 1031168   ;;  %v1327_v63 = vld [vmem:[#allocation2 + $0x18] sm:$0xf] }
 0x143   : > { %v871_v24 = vpop.permute.xlu0 %870  ;;  %1229 = vrot.lane.b32.xlu0 %v1215_v0, %s4721_s27  ;;  %v1126_v8 = vld [vmem:[#allocation2] sm:$0xf] }
 0x144   : > { %v1067_v25 = vand.u32 %v1065_v13, %v1055_v19  ;;  %v901_v26 = vpop.permute.xlu2 %900  ;;  %v872_v28 = vrot.slane %v871_v24, 1  ;;  %v1070_v29 = vand.u32 %v1065_v13, %v1056_v23  ;;  %v3056_v19 = vld [vmem:[%s4698_s14 + $0x4] ss:$8 sm:$0x3] }
 0x145   : > { %v743_v27 = vpop.permute.xlu1 %742  ;;  %v902_v30 = vrot.slane %v901_v26, 1 }
 0x146   : > { %v744_v31 = vrot.slane %v743_v27, 1  ;;  %1078 = vmatpush.bf16.msra.mxu2 %v1067_v25  ;;  %v874_v32 = vsel %vm873_vm3, %v871_v24, %v872_v28  ;;  %1091 = vmatpush.bf16.msra.mxu1 %v1070_v29  ;;  %vm843_vm3 = vcmask 916480  }
 0x147   : > { %v904_v33 = vsel %vm903_vm1, %v901_v26, %v902_v30  ;;  %v876_v35 = vsel %vm868_vm10, %v874_v32, 0.0  ;;  %vm793_vm1 = vcmp.ne.f32.partialorder %v3032_v38, 0.0  ;;  %vm888_vm10 = vcmask 891904  }
 0x148   : > { %v746_v34 = vsel %vm745_vm4, %v743_v27, %v744_v31  ;;  %v906_v36 = vsel %vm898_vm11, %v904_v33, 0.0  ;;  %878 = vst.msk [vmem:[#allocation3 + $0x15] ss:$8 sm:$0x3] %vm3425_vm0, %v876_v35  ;;  %vm838_vm4 = vcmp.ne.f32.partialorder %v3035_v45, 0.0  ;;  %vm883_vm11 = vcmp.ne.f32.partialorder %v3038_v50, 0.0  ;;  %1343 = vrot.lane.b32.xlu2 %v1327_v63, %s3275_s30 }
 0x149   : > { %v748_v37 = vsel %vm740_vm13, %v746_v34, 0.0  ;;  %908 = vst.msk [vmem:[#allocation3 + $0x17] ss:$8 sm:$0x3] %vm3425_vm0, %v906_v36  ;;  %vm1058_vm13 = vcmask 203776  }
 0x14a   : > { %750 = vst.msk [vmem:[#allocation3 + $0x4] ss:$8 sm:$0x3] %vm3425_vm0, %v748_v37  ;;  %v1187_v45 = vld [vmem:[#allocation2] sm:$0xf] }
 0x14b   : > { %1139 = vrot.lane.b32.xlu0 %v1126_v8, %s4737_s26 }
 0x14d   : > { %v796_v39 = vpop.permute.xlu1 %795 }
 0x14e   : > { %v797_v40 = vrot.slane %v796_v39, 1 }
 0x150   : > { %v799_v43 = vsel %vm798_vm14, %v796_v39, %v797_v40  ;;  %1315 = vrot.lane.b32.xlu2 %v1299_v3, %s3266_s22 }
 0x151   : > { %v801_v44 = vsel %vm793_vm1, %v799_v43, 0.0  ;;  %v1045_v55 = vld [vmem:[#allocation3] sm:$0xff]  ;;  %v1046_v57 = vld [vmem:[#allocation3 + $0x8] sm:$0xff] }
 0x152   : > { %803 = vst.msk [vmem:[#allocation3 + $0x10] ss:$8 sm:$0x3] %vm3425_vm0, %v801_v44 }
 0x155   : > { %v841_v46 = vpop.permute.xlu1 %840 }
 0x156   : > { %v842_v47 = vrot.slane %v841_v46, 1 }
 0x158   : > { %v844_v48 = vsel %vm843_vm3, %v841_v46, %v842_v47 }
 0x159   : > { %v846_v49 = vsel %vm838_vm4, %v844_v48, 0.0 }
 0x15a   : > { %848 = vst.msk [vmem:[#allocation3 + $0x13] ss:$8 sm:$0x3] %vm3425_vm0, %v846_v49 }
 0x15d   : > { %v886_v51 = vpop.permute.xlu1 %885 }
 0x15e   : > { %v887_v52 = vrot.slane %v886_v51, 1 }
 0x160   : > { %v889_v53 = vsel %vm888_vm10, %v886_v51, %v887_v52 }
 0x161   : > { %v891_v54 = vsel %vm883_vm11, %v889_v53, 0.0 }
 0x162   : > { %893 = vst.msk [vmem:[#allocation3 + $0x16] ss:$8 sm:$0x3] %vm3425_vm0, %v891_v54  ;;  %vm1253_vm0 = vcmp.ne.f32.partialorder %v3056_v19, 0.0 }
 0x163   : > { %v1254_v24 = vsel %vm1253_vm0, 1, %v3252_v1 }
 0x164   : > { %v1256_v27 = vperm.slane %v1254_v24, 1  ;;  %v1255_v31 = vperm.slane %v1254_v24, 0 }
 0x166   : > { %vm1258_vm4 = vcmp.eq.s32.totalorder %v1256_v27, 1  ;;  %vm1257_vm10 = vcmp.eq.s32.totalorder %v1255_v31, 1 }
 0x169   : > { %v1047_v56 = vld [vmem:[#allocation3 + $0x10] sm:$0xff]  ;;  %v1048_v58 = vld [vmem:[#allocation3 + $0x18] sm:$0xff] }
 0x16a   : > { %v1053_v59 = vpack.c.bf16 %v1047_v56, %v1045_v55  ;;  %v1054_v60 = vpack.c.bf16 %v1048_v58, %v1046_v57  ;;  %v3060_v58 = vld [vmem:[%s4698_s14 + $0x10] ss:$8 sm:$0x3] }
 0x16b   : > { %vm1364_vm11 = vcmp.ne.f32.partialorder %v3060_v58, 0.0 }
 0x16c   : > { %1079 = vmatpush.bf16.msra.mxu2 %v1053_v59  ;;  %1092 = vmatpush.bf16.msra.mxu1 %v1054_v60  ;;  %v1365_v60 = vsel %vm1364_vm11, 1, %v3252_v1  ;;  %vm1408_vm11 = vcmask 1041408  }
 0x16d   : > { %v1366_v62 = vperm.slane %v1365_v60, 0  ;;  %v1367_v14 = vperm.slane %v1365_v60, 1 }
 0x16f   : > { %3049 = vmatmul.msk.bf16.vlgmr.msra.gmra.mxu2 %vm1058_vm13, %v1057_v61  ;;  %3050 = vmatmul.msk.bf16.vlgmr.msra.gmra.mxu1 %vm1058_vm13, %v1057_v61  ;;  %v3057_v61 = vld [vmem:[%s4698_s14 + $0x5] ss:$8 sm:$0x3]  ;;  %vm1368_vm0 = vcmp.eq.s32.totalorder %v1366_v62, 1 }
 0x170   : > { %vm1268_vm13 = vcmp.ne.f32.partialorder %v3057_v61, 0.0  ;;  %v1129_v61 = vld [vmem:[%s4698_s14] ss:$8 sm:$0x3] }
 0x18e   : > { %v1378_v50 = vpop.permute.xlu2 %1377 }
 0x19a   : > { %v1282_v52 = vpop.permute.xlu2 %1281 }
 0x1a2   : > { %v1344_v53 = vpop.permute.xlu2 %1343 }
 0x1a5   : > { %v1102_v4 = vpop.permute.xlu0 %1101  ;;  %v1108_v6 = vpop.permute.xlu1 %1107 }
 0x1aa   : > { %v3610_v54 = vpop.permute.xlu2 %1315 }
 0x1ad   : > { %v3612_v55 = vpop.permute.xlu0 %1167 }
 0x1b5   : > { %v3616_v57 = vpop.permute.xlu0 %1229 }
 0x1bd   : > { %v3627_v63 = vpop.permute.xlu0 %1139 }
 0x1ec   : > { %v1094_v5 = vpop.f32.mrf.mxu1 }
 0x1ed   : > { %v1105_v7 = vmul.f32 %v1102_v4, %v1094_v5 }
 0x1ef   : > { %v1111_v9 = vadd.f32 %v1108_v6, %v1105_v7  ;;  %v3059_v7 = vld [vmem:[%s4698_s14 + $0x7] ss:$8 sm:$0x3] }
 0x1f1   : > { %v1115_v10 = vmin.f32 %v1111_v9, 0.0  ;;  %vm1113_vm14 = vcmp.gt.f32.partialorder %v1111_v9, 0.0 }
 0x1f2   : > { %v1081_v11 = vpop.f32.mrf.mxu2 }
 0x1f3   : > { %v1118_v12 = vmul.f32 1.442695, %v1115_v10  ;;  %v1104_v13 = vmul.f32 %v1102_v4, %v1081_v11  ;;  %v1269_v4 = vsel %vm1268_vm13, 1, %v3252_v1 }
 0x1f4   : > { %v1096_v15 = vpop.f32.mrf.mxu1  ;;  %v1270_v10 = vperm.slane %v1269_v4, 0  ;;  %v1271_v11 = vperm.slane %v1269_v4, 1 }
 0x1f5   : > { %3222 = vpow2.f32 %v1118_v12  ;;  %v1110_v16 = vadd.f32 %v1108_v6, %v1104_v13 }
 0x1f7   : > { %v1114_v17 = vmin.f32 %v1110_v16, 0.0  ;;  %vm1112_vm1 = vcmp.gt.f32.partialorder %v1110_v16, 0.0 }
 0x1f9   : > { %v1116_v18 = vmul.f32 1.442695, %v1114_v17 }
 0x1fa   : > { %v1083_v20 = vpop.f32.mrf.mxu2 }
 0x1fb   : > { %v3223_v21 = vpop.eup %3222  ;;  %3224 = vpow2.f32 %v1116_v18  ;;  %v3058_v18 = vld [vmem:[%s4698_s14 + $0x6] ss:$8 sm:$0x3] }
 0x1fc   : > { %v3052_v22 = vadd.f32 -1.0, %v3223_v21  ;;  %vm1302_vm13 = vcmp.ne.f32.partialorder %v3058_v18, 0.0 }
 0x1fe   : > { %v1123_v23 = vsel %vm1113_vm14, %v1111_v9, %v3052_v22  ;;  %vm1369_vm14 = vcmp.eq.s32.totalorder %v1367_v14, 1 }
 0x1ff   : > { %1125 = vst [vmem:[#allocation2 + $0x10] sm:$0xf] %v1123_v23 }
 0x201   : > { %v3225_v25 = vpop.eup %3224 }
 0x202   : > { %v3051_v26 = vadd.f32 -1.0, %v3225_v25 }
 0x204   : > { %v1122_v28 = vsel %vm1112_vm1, %v1110_v16, %v3051_v26  ;;  %vm1330_vm1 = vcmp.ne.f32.partialorder %v3059_v7, 0.0 }
 0x205   : > { %1124 = vst [vmem:[#allocation2 + $0x8] sm:$0xf] %v1122_v28  ;;  %v1331_v13 = vsel %vm1330_vm1, 1, %v3252_v1 }
 0x206   : > { %v1360_v29 = vld [vmem:[#allocation2 + $0x10] sm:$0xf]  ;;  %v1332_v22 = vperm.slane %v1331_v13, 0  ;;  %v1333_v27 = vperm.slane %v1331_v13, 1 }
 0x207   : > { %v1155_v30 = vld [vmem:[#allocation2 + $0x10] sm:$0xf]  ;;  %1375 = vrot.lane.b32.xlu1 %v1360_v29, %s3274_s0 }
 0x208   : > { %1171 = vrot.lane.b32.xlu2 %v1155_v30, %s3268_s1  ;;  %v1250_v32 = vld [vmem:[#allocation2 + $0x10] sm:$0xf] }
 0x209   : > { %v1260_v33 = vsel %vm1258_vm4, %v1250_v32, 0.0  ;;  %v1264_v35 = vld [vmem:[#allocation2 + $0x10] sm:$0xf]  ;;  %vm1272_vm4 = vcmp.eq.s32.totalorder %v1270_v10, 1 }
 0x20a   : > { %1262 = vst [vmem:[#allocation3 + $0x28] sm:$0xf] %v1260_v33  ;;  %v1217_v36 = vld [vmem:[#allocation2 + $0x10] sm:$0xf]  ;;  %v1303_v33 = vsel %vm1302_vm13, 1, %v3252_v1 }
 0x20b   : > { %v1326_v40 = vld [vmem:[#allocation2 + $0x10] sm:$0xf] }
 0x20c   : > { %v1263_v34 = vld [vmem:[#allocation2 + $0x8] sm:$0xf]  ;;  %v1298_v43 = vld [vmem:[#allocation2 + $0x10] sm:$0xf] }
 0x20d   : > { %1277 = vrot.lane.b32.xlu0 %v1263_v34, %s4719_s4  ;;  %v1249_v37 = vld [vmem:[#allocation2 + $0x8] sm:$0xf]  ;;  %v1128_v44 = vld [vmem:[#allocation2 + $0x10] sm:$0xf] }
 0x20e   : > { %v1259_v38 = vsel %vm1257_vm10, %v1249_v37, 0.0  ;;  %v1325_v39 = vld [vmem:[#allocation2 + $0x8] sm:$0xf]  ;;  %v1189_v46 = vld [vmem:[#allocation2 + $0x10] sm:$0xf]  ;;  %vm1273_vm10 = vcmp.eq.s32.totalorder %v1271_v11, 1 }
 0x20f   : > { %1279 = vrot.lane.b32.xlu1 %v1264_v35, %s4719_s4  ;;  %1261 = vst [vmem:[#allocation3 + $0x20] sm:$0xf] %v1259_v38  ;;  %v1359_v41 = vld [vmem:[#allocation2 + $0x8] sm:$0xf] }
 0x210   : > { %1233 = vrot.lane.b32.xlu2 %v1217_v36, %s4721_s27  ;;  %v1297_v42 = vld [vmem:[#allocation2 + $0x8] sm:$0xf]  ;;  %v3053_v38 = vld [vmem:[%s4698_s14 + $0x1] ss:$8 sm:$0x3] }
 0x211   : > { %v1154_v47 = vld [vmem:[#allocation2 + $0x8] sm:$0xf]  ;;  %vm1158_vm1 = vcmp.ne.f32.partialorder %v3053_v38, 0.0 }
 0x212   : > { %v1216_v48 = vld [vmem:[#allocation2 + $0x8] sm:$0xf] }
 0x213   : > { %v1127_v49 = vld [vmem:[#allocation2 + $0x8] sm:$0xf] }
 0x214   : > { %v1188_v51 = vld [vmem:[#allocation2 + $0x8] sm:$0xf] }
 0x215   : > { %1339 = vrot.lane.b32.xlu0 %v1325_v39, %s3275_s30 }
 0x217   : > { %1341 = vrot.lane.b32.xlu1 %v1326_v40, %s3275_s30 }
 0x218   : > { %1373 = vrot.lane.b32.xlu2 %v1359_v41, %s3274_s0  ;;  %v1304_v41 = vperm.slane %v1303_v33, 0 }
 0x21d   : > { %1311 = vrot.lane.b32.xlu0 %v1297_v42, %s3266_s22  ;;  %v1305_v42 = vperm.slane %v1303_v33, 1 }
 0x21f   : > { %1313 = vrot.lane.b32.xlu1 %v1298_v43, %s3266_s22 }
 0x220   : > { %1143 = vrot.lane.b32.xlu2 %v1128_v44, %s4737_s26 }
 0x225   : > { %1201 = vrot.lane.b32.xlu0 %v1187_v45, %s4738_s24  ;;  %v1159_v45 = vsel %vm1158_vm1, 1, %v3252_v1  ;;  %vm1130_vm1 = vcmp.ne.f32.partialorder %v1129_v61, 0.0  ;;  %v1649_v61 = vld [vmem:[%s4701_s17 + $0xf0] sm:$0xff] }
 0x227   : > { %1169 = vrot.lane.b32.xlu1 %v1154_v47, %s3268_s1 }
 0x228   : > { %1205 = vrot.lane.b32.xlu2 %v1189_v46, %s4738_s24 }
 0x22f   : > { %1231 = vrot.lane.b32.xlu1 %v1216_v48, %s4721_s27  ;;  %v3055_v48 = vld [vmem:[%s4698_s14 + $0x3] ss:$8 sm:$0x3] }
 0x230   : > { %vm1220_vm13 = vcmp.ne.f32.partialorder %v3055_v48, 0.0  ;;  %v1443_v48 = vld [vmem:[#allocation2] sm:$0xf] }
 0x237   : > { %1141 = vrot.lane.b32.xlu1 %v1127_v49, %s4737_s26 }
 0x23f   : > { %1203 = vrot.lane.b32.xlu1 %v1188_v51, %s4738_s24  ;;  %v1160_v51 = vperm.slane %v1159_v45, 0 }
 0x262   : > { %v3614_v56 = vpop.permute.xlu2 %1171 }
 0x26a   : > { %v3621_v59 = vpop.permute.xlu2 %1233 }
 0x272   : > { %v1374_v0 = vpop.permute.xlu2 %1373 }
 0x279   : > { %v1376_v3 = vpop.permute.xlu1 %1375 }
 0x27a   : > { %v1379_v5 = vsel %vm858_vm6, %v1374_v0, %v1376_v3  ;;  %v1380_v6 = vsel %vm858_vm6, %v1376_v3, %v1378_v50 }
 0x27b   : > { %v1383_v8 = vsel %vm1368_vm0, %v1379_v5, 0.0  ;;  %v1384_v9 = vsel %vm1369_vm14, %v1380_v6, 0.0  ;;  %vm1334_vm0 = vcmp.eq.s32.totalorder %v1332_v22, 1  ;;  %vm1335_vm14 = vcmp.eq.s32.totalorder %v1333_v27, 1  ;;  %v1144_v22 = vpop.permute.xlu2 %1143 }
 0x27c   : > { %1385 = vst [vmem:[#allocation3 + $0x40] sm:$0xf] %v1383_v8 }
 0x27d   : > { %1386 = vst [vmem:[#allocation3 + $0x48] sm:$0xf] %v1384_v9 }
 0x27f   : > { %v1278_v12 = vpop.permute.xlu0 %1277 }
 0x281   : > { %v1280_v15 = vpop.permute.xlu1 %1279 }
 0x282   : > { %v1283_v16 = vsel %vm783_vm12, %v1278_v12, %v1280_v15  ;;  %v1284_v17 = vsel %vm783_vm12, %v1280_v15, %v1282_v52  ;;  %v1161_v52 = vperm.slane %v1159_v45, 1 }
 0x283   : > { %v1287_v19 = vsel %vm1272_vm4, %v1283_v16, 0.0  ;;  %v1288_v20 = vsel %vm1273_vm10, %v1284_v17, 0.0  ;;  %v1395_v21 = vld [vmem:[#allocation3 + $0x40] sm:$0xf]  ;;  %vm1306_vm4 = vcmp.eq.s32.totalorder %v1304_v41, 1  ;;  %vm1307_vm10 = vcmp.eq.s32.totalorder %v1305_v42, 1 }
 0x284   : > { %v1291_v23 = vrot.slane %v1287_v19, 4  ;;  %v1292_v24 = vrot.slane %v1288_v20, 4  ;;  %v1401_v25 = vpack.c.bf16 %v1395_v21, %v1395_v21  ;;  %v1396_v26 = vld [vmem:[#allocation3 + $0x48] sm:$0xf]  ;;  %v1403_v41 = vld [vmem:[%s4739_s5] sm:$0x3] }
 0x285   : > { %v1402_v28 = vpack.c.bf16 %v1396_v26, %v1396_v26  ;;  %v3054_v17 = vld [vmem:[%s4698_s14 + $0x2] ss:$8 sm:$0x3]  ;;  %s3280_s5 = smov 8  }
 0x286   : > { %1295 = vst [vmem:[#allocation3 + $0x20] sm:$0xf0] %v1291_v23  ;;  %v1410_v29 = vsel %vm1408_vm11, %v1401_v25, 0  ;;  %v1533_v42 = vld [vmem:[#allocation2 + $0x18] sm:$0xf] }
 0x287   : > { %1296 = vst [vmem:[#allocation3 + $0x28] sm:$0xf0] %v1292_v24  ;;  %1420 = vmatpush.bf16.msrb.mxu2 %v1410_v29  ;;  %v1413_v30 = vsel %vm1408_vm11, %v1402_v28, 0  ;;  %v1340_v31 = vpop.permute.xlu0 %1339  ;;  %1567 = vrot.lane.b32.xlu2 %v1533_v42, %s3266_s22 }
 0x288   : > { %1433 = vmatpush.bf16.msra.mxu3 %v1413_v30  ;;  %v1206_v30 = vpop.permute.xlu2 %1205  ;;  %1546 = vrot.lane.b32.xlu0 %v1533_v42, %s4719_s4 }
 0x289   : > { %v1342_v32 = vpop.permute.xlu1 %1341 }
 0x28a   : > { %v1345_v34 = vsel %vm843_vm3, %v1340_v31, %v1342_v32  ;;  %v1346_v35 = vsel %vm843_vm3, %v1342_v32, %v1344_v53  ;;  %v1221_v53 = vsel %vm1220_vm13, 1, %v3252_v1  ;;  %vm1192_vm13 = vcmp.ne.f32.partialorder %v3054_v17, 0.0  ;;  %v3066_v17 = vld [vmem:[%s4698_s14 + $0x5] ss:$8 sm:$0x3] }
 0x28b   : > { %v1349_v36 = vsel %vm1334_vm0, %v1345_v34, 0.0  ;;  %v1350_v37 = vsel %vm1335_vm14, %v1346_v35, 0.0  ;;  %vm1162_vm0 = vcmp.eq.s32.totalorder %v1160_v51, 1  ;;  %vm1163_vm14 = vcmp.eq.s32.totalorder %v1161_v52, 1  ;;  %v1634_v52 = vld [vmem:[%s4701_s17 + $0x78] sm:$0xff] }
 0x28c   : > { %v1353_v39 = vrot.slane %v1349_v36, 4  ;;  %v1354_v40 = vrot.slane %v1350_v37, 4  ;;  %v1222_v4 = vperm.slane %v1221_v53, 0  ;;  %v1223_v10 = vperm.slane %v1221_v53, 1  ;;  %v1633_v53 = vld [vmem:[%s4701_s17 + $0x70] sm:$0xff]  ;;  %1651 = vmatpush.msra.mxu0 %v1634_v52  ;;  %v1635_v52 = vld [vmem:[%s4701_s17 + $0x80] sm:$0xff] }
 0x28d   : > { %v1391_v0 = vld [vmem:[#allocation3 + $0x20] sm:$0xff]  ;;  %v1193_v23 = vsel %vm1192_vm13, 1, %v3252_v1 }
 0x28e   : > { %1357 = vst [vmem:[#allocation3 + $0x30] sm:$0xf0] %v1353_v39  ;;  %v1392_v8 = vld [vmem:[#allocation3 + $0x28] sm:$0xff]  ;;  %v1195_v27 = vperm.slane %v1193_v23, 1  ;;  %v1194_v28 = vperm.slane %v1193_v23, 0  ;;  %1652 = vmatpush.msra.mxu0 %v1633_v53 }
 0x28f   : > { %1358 = vst [vmem:[#allocation3 + $0x38] sm:$0xf0] %v1354_v40  ;;  %v1312_v43 = vpop.permute.xlu0 %1311 }
 0x291   : > { %v1314_v44 = vpop.permute.xlu1 %1313 }
 0x292   : > { %v1317_v46 = vsel %vm828_vm9, %v1312_v43, %v1314_v44  ;;  %v1318_v47 = vsel %vm828_vm9, %v1314_v44, %v3610_v54 }
 0x293   : > { %v1321_v49 = vsel %vm1306_vm4, %v1317_v46, 0.0  ;;  %v1322_v50 = vsel %vm1307_vm10, %v1318_v47, 0.0  ;;  %vm1224_vm4 = vcmp.eq.s32.totalorder %v1222_v4, 1  ;;  %vm1225_vm10 = vcmp.eq.s32.totalorder %v1223_v10, 1  ;;  %v1647_v4 = vld [vmem:[%s4701_s17 + $0xe0] sm:$0xff]  ;;  %v1645_v10 = vld [vmem:[%s4701_s17 + $0xd0] sm:$0xff] }
 0x294   : > { %1323 = vst [vmem:[#allocation3 + $0x30] sm:$0xf] %v1321_v49 }
 0x295   : > { %1324 = vst [vmem:[#allocation3 + $0x38] sm:$0xf] %v1322_v50 }
 0x297   : > { %v1202_v29 = vpop.permute.xlu0 %1201 }
 0x299   : > { %v1170_v58 = vpop.permute.xlu1 %1169 }
 0x29a   : > { %v1173_v60 = vsel %vm4713_vm7, %v3612_v55, %v1170_v58  ;;  %v1174_v54 = vsel %vm4713_vm7, %v1170_v58, %v3614_v56  ;;  %v1131_v56 = vsel %vm1130_vm1, 1, %v3252_v1  ;;  %vm1197_vm1 = vcmp.eq.s32.totalorder %v1195_v27, 1  ;;  %v1650_v58 = vld [vmem:[%s4701_s17 + $0xf8] sm:$0xff] }
 0x29b   : > { %v1177_v62 = vsel %vm1162_vm0, %v1173_v60, 0.0  ;;  %v1178_v14 = vsel %vm1163_vm14, %v1174_v54, 0.0  ;;  %v1393_v3 = vld [vmem:[#allocation3 + $0x30] sm:$0xff]  ;;  %v1132_v20 = vperm.slane %v1131_v56, 0  ;;  %v1133_v21 = vperm.slane %v1131_v56, 1  ;;  %v1632_v60 = vld [vmem:[%s4701_s17 + $0x68] sm:$0xff]  ;;  %1671 = vmatpush.msrb.mxu1 %v1650_v58 }
 0x29c   : > { %v1181_v5 = vrot.slane %v1177_v62, 4  ;;  %v1182_v6 = vrot.slane %v1178_v14, 4  ;;  %v1399_v7 = vpack.c.bf16 %v1393_v3, %v1391_v0  ;;  %v1394_v9 = vld [vmem:[#allocation3 + $0x38] sm:$0xff]  ;;  %1653 = vmatpush.msra.mxu0 %v1632_v60  ;;  %v1631_v54 = vld [vmem:[%s4701_s17 + $0x60] sm:$0xff]  ;;  %v1630_v62 = vld [vmem:[%s4701_s17 + $0x58] sm:$0xff] }
 0x29d   : > { %v1400_v11 = vpack.c.bf16 %v1394_v9, %v1392_v8  ;;  %vm1134_vm0 = vcmp.eq.s32.totalorder %v1132_v20, 1  ;;  %vm1135_vm14 = vcmp.eq.s32.totalorder %v1133_v21, 1  ;;  %1672 = vmatpush.msrb.mxu1 %v1649_v61  ;;  %v1648_v0 = vld [vmem:[%s4701_s17 + $0xe8] sm:$0xff]  ;;  %v1629_v3 = vld [vmem:[%s4701_s17 + $0x50] sm:$0xff]  ;;  %v1627_v9 = vld [vmem:[%s4701_s17 + $0x40] sm:$0xff] }
 0x29e   : > { %1185 = vst [vmem:[#allocation3] sm:$0xf0] %v1181_v5  ;;  %1421 = vmatpush.bf16.msrb.mxu2 %v1399_v7  ;;  %1654 = vmatpush.msra.mxu0 %v1631_v54  ;;  %v1628_v5 = vld [vmem:[%s4701_s17 + $0x48] sm:$0xff]  ;;  %v1625_v56 = vld [vmem:[%s4701_s17 + $0x30] sm:$0xff] }
 0x29f   : > { %1186 = vst [vmem:[#allocation3 + $0x8] sm:$0xf0] %v1182_v6  ;;  %1434 = vmatpush.bf16.msra.mxu3 %v1400_v11  ;;  %1673 = vmatpush.msrb.mxu1 %v1648_v0  ;;  %v1646_v6 = vld [vmem:[%s4701_s17 + $0xd8] sm:$0xff]  ;;  %v3063_v20 = vld [vmem:[%s4698_s14 + $0x1] ss:$8 sm:$0x3] }
 0x2a0   : > { %1655 = vmatpush.msra.mxu0 %v1630_v62  ;;  %v1626_v11 = vld [vmem:[%s4701_s17 + $0x38] sm:$0xff] }
 0x2a1   : > { %v1232_v55 = vpop.permute.xlu1 %1231  ;;  %1674 = vmatpush.msrb.mxu1 %v1647_v4 }
 0x2a2   : > { %v1235_v12 = vsel %vm760_vm8, %v3616_v57, %v1232_v55  ;;  %v1236_v13 = vsel %vm760_vm8, %v1232_v55, %v3621_v59  ;;  %1656 = vmatpush.msra.mxu0 %v1629_v3  ;;  %v1644_v55 = vld [vmem:[%s4701_s17 + $0xc8] sm:$0xff] }
 0x2a3   : > { %v1239_v15 = vsel %vm1224_vm4, %v1235_v12, 0.0  ;;  %v1240_v16 = vsel %vm1225_vm10, %v1236_v13, 0.0  ;;  %vm1196_vm4 = vcmp.eq.s32.totalorder %v1194_v28, 1  ;;  %vm1404_vm10 = vcmask 293888   ;;  %1675 = vmatpush.msrb.mxu1 %v1646_v6  ;;  %v1643_v12 = vld [vmem:[%s4701_s17 + $0xc0] sm:$0xff]  ;;  %v1624_v13 = vld [vmem:[%s4701_s17 + $0x28] sm:$0xff] }
 0x2a4   : > { %v1243_v18 = vrot.slane %v1239_v15, 4  ;;  %v1244_v19 = vrot.slane %v1240_v16, 4  ;;  %1657 = vmatpush.msra.mxu0 %v1628_v5  ;;  %v1642_v15 = vld [vmem:[%s4701_s17 + $0xb8] sm:$0xff]  ;;  %v1446_v16 = vld [vmem:[%s4698_s14] ss:$8 sm:$0x3] }
 0x2a5   : > { %1676 = vmatpush.msrb.mxu1 %v1645_v10  ;;  %vm1447_vm13 = vcmp.ne.f32.partialorder %v1446_v16, 0.0  ;;  %v1620_v28 = vld [vmem:[%s4701_s17 + $0x8] sm:$0xff] }
 0x2a6   : > { %1247 = vst [vmem:[#allocation3 + $0x10] sm:$0xf0] %v1243_v18  ;;  %1658 = vmatpush.msra.mxu0 %v1627_v9  ;;  %v1623_v18 = vld [vmem:[%s4701_s17 + $0x20] sm:$0xff]  ;;  %v1448_v27 = vsel %vm1447_vm13, 1, %v3252_v1 }
 0x2a7   : > { %1248 = vst [vmem:[#allocation3 + $0x18] sm:$0xf0] %v1244_v19  ;;  %1677 = vmatpush.msrb.mxu1 %v1644_v55  ;;  %v1641_v19 = vld [vmem:[%s4701_s17 + $0xb0] sm:$0xff]  ;;  %v3067_v5 = vld [vmem:[%s4698_s14 + $0x6] ss:$8 sm:$0x3] }
 0x2a8   : > { %1659 = vmatpush.msra.mxu0 %v1626_v11  ;;  %v3068_v10 = vld [vmem:[%s4698_s14 + $0x7] ss:$8 sm:$0x3] }
 0x2a9   : > { %v1142_v57 = vpop.permute.xlu1 %1141  ;;  %1678 = vmatpush.msrb.mxu1 %v1643_v12 }
 0x2aa   : > { %v1145_v59 = vsel %vm686_vm15, %v3627_v63, %v1142_v57  ;;  %v1146_v24 = vsel %vm686_vm15, %v1142_v57, %v1144_v22  ;;  %1660 = vmatpush.msra.mxu0 %v1625_v56  ;;  %v1622_v22 = vld [vmem:[%s4701_s17 + $0x18] sm:$0xff]  ;;  %v1640_v57 = vld [vmem:[%s4701_s17 + $0xa8] sm:$0xff] }
 0x2ab   : > { %v1149_v25 = vsel %vm1134_vm0, %v1145_v59, 0.0  ;;  %v1150_v26 = vsel %vm1135_vm14, %v1146_v24, 0.0  ;;  %1679 = vmatpush.msrb.mxu1 %v1642_v15  ;;  %vm1535_vm0 = vcmp.ne.f32.partialorder %v3066_v17, 0.0  ;;  %vm1471_vm14 = vcmp.ne.f32.partialorder %v3063_v20, 0.0 }
 0x2ac   : > { %1151 = vst [vmem:[#allocation3] sm:$0xf] %v1149_v25  ;;  %1661 = vmatpush.msra.mxu0 %v1624_v13  ;;  %v3064_v24 = vld [vmem:[%s4698_s14 + $0x2] ss:$8 sm:$0x3]  ;;  %v1621_v25 = vld [vmem:[%s4701_s17 + $0x10] sm:$0xff] }
 0x2ad   : > { %1152 = vst [vmem:[#allocation3 + $0x8] sm:$0xf] %v1150_v26  ;;  %1680 = vmatpush.msrb.mxu1 %v1641_v19  ;;  %v1639_v26 = vld [vmem:[%s4701_s17 + $0xa0] sm:$0xff] }
 0x2ae   : > { %1662 = vmatpush.msra.mxu0 %v1623_v18 }
 0x2af   : > { %1681 = vmatpush.msrb.mxu1 %v1640_v57 }
 0x2b0   : > { %1663 = vmatpush.msra.mxu0 %v1622_v22 }
 0x2b1   : > { %v1204_v31 = vpop.permute.xlu1 %1203  ;;  %1682 = vmatpush.msrb.mxu1 %v1639_v26 }
 0x2b2   : > { %v1208_v32 = vsel %vm715_vm2, %v1204_v31, %v1206_v30  ;;  %v1207_v33 = vsel %vm715_vm2, %v1202_v29, %v1204_v31  ;;  %v1638_v29 = vld [vmem:[%s4701_s17 + $0x98] sm:$0xff]  ;;  %v3813_v30 = vsel %vm1535_vm0, 1, %v3252_v1  ;;  %v1472_v31 = vsel %vm1471_vm14, 1, %v3252_v1  ;;  %1664 = vmatpush.msra.mxu0 %v1621_v25 }
 0x2b3   : > { %v1212_v34 = vsel %vm1197_vm1, %v1208_v32, 0.0  ;;  %v1211_v35 = vsel %vm1196_vm4, %v1207_v33, 0.0  ;;  %v1387_v37 = vld [vmem:[#allocation3] sm:$0xff]  ;;  %vm1492_vm1 = vcmp.ne.f32.partialorder %v3064_v24, 0.0  ;;  %v1449_v32 = vperm.slane %v1448_v27, 0  ;;  %1683 = vmatpush.msrb.mxu1 %v1638_v29 }
 0x2b4   : > { %1214 = vst [vmem:[#allocation3 + $0x18] sm:$0xf] %v1212_v34  ;;  %v1388_v63 = vld [vmem:[#allocation3 + $0x8] sm:$0xff]  ;;  %v3065_v33 = vld [vmem:[%s4698_s14 + $0x3] ss:$8 sm:$0x3]  ;;  %1665 = vmatpush.msra.mxu0 %v1620_v28 }
 0x2b5   : > { %1213 = vst [vmem:[#allocation3 + $0x10] sm:$0xf] %v1211_v35  ;;  %v1619_v34 = vld [vmem:[%s4701_s17] sm:$0xff]  ;;  %v1637_v35 = vld [vmem:[%s4701_s17 + $0x90] sm:$0xff]  ;;  %vm1513_vm4 = vcmp.ne.f32.partialorder %v3065_v33, 0.0  ;;  %vm3840_vm13 = vcmp.eq.s32.totalorder %v1449_v32, 1 }
 0x2b6   : > { %1666 = vmatpush.msra.mxu0 %v1619_v34  ;;  %1684 = vmatpush.msrb.mxu1 %v1637_v35  ;;  %v1538_v0 = vperm.slane %v3813_v30, 1  ;;  %v1514_v4 = vsel %vm1513_vm4, 1, %v3252_v1 }
 0x2b7   : > { %v1515_v17 = vperm.slane %v1514_v4, 0  ;;  %v1516_v28 = vperm.slane %v1514_v4, 1 }
 0x2bb   : > { %v1390_v36 = vld [vmem:[#allocation3 + $0x18] sm:$0xff] }
 0x2bc   : > { %v1389_v38 = vld [vmem:[#allocation3 + $0x10] sm:$0xff]  ;;  %v1398_v39 = vpack.c.bf16 %v1390_v36, %v1388_v63  ;;  %v1450_v63 = vperm.slane %v1448_v27, 1  ;;  %v3069_v36 = vld [vmem:[%s4698_s14 + $0x10] ss:$8 sm:$0x3] }
 0x2bd   : > { %v1397_v40 = vpack.c.bf16 %v1389_v38, %v1387_v37  ;;  %vm1599_vm0 = vcmp.ne.f32.partialorder %v3069_v36, 0.0 }
 0x2be   : > { %1435 = vmatpush.bf16.msra.mxu3 %v1398_v39  ;;  %v1473_v39 = vperm.slane %v1472_v31, 0  ;;  %vm3847_vm14 = vcmp.eq.s32.totalorder %v1450_v63, 1  ;;  %v3881_v12 = vsel %vm1599_vm0, 1, %v3252_v1 }
 0x2bf   : > { %1422 = vmatpush.bf16.msrb.mxu2 %v1397_v40  ;;  %v1601_v53 = vperm.slane %v3881_v12, 0 }
 0x2c1   : > { %3062 = vmatmul.msk.bf16.vlgmr.msra.gmra.mxu3 %vm1404_vm10, %v1403_v41 }
 0x2c2   : > { %3061 = vmatmul.msk.bf16.vlgmr.msrb.gmra.mxu2 %vm1404_vm10, %v1403_v41  ;;  %v1493_v41 = vsel %vm1492_vm1, 1, %v3252_v1  ;;  %vm3855_vm1 = vcmp.eq.s32.totalorder %v1473_v39, 1 }
 0x2c3   : > { %v1494_v54 = vperm.slane %v1493_v41, 0  ;;  %v1495_v56 = vperm.slane %v1493_v41, 1 }
 0x2c5   : > { %vm3885_vm4 = vcmp.eq.s32.totalorder %v1494_v54, 1  ;;  %vm3893_vm0 = vcmp.eq.s32.totalorder %v1495_v56, 1  ;;  %v1602_v56 = vperm.slane %v3881_v12, 1 }
 0x2e1   : > { %v3726_v14 = vpop.permute.xlu2 %1567 }
 0x2fa   : > { %v3743_v7 = vpop.permute.xlu0 %1546 }
 0x344   : > { %v3685_v43 = vpop.f32.mrf.mxu3 }
 0x345   : > { %v3687_v44 = vpop.f32.mrf.mxu2  ;;  %1442 = vst [vmem:[#allocation2 + $0x10] sm:$0xf] %v3685_v43 }
 0x346   : > { %1441 = vst [vmem:[#allocation2 + $0x8] sm:$0xf] %v3687_v44 }
 0x34c   : > { %v1439_v45 = vpop.f32.mrf.mxu3  ;;  %v1445_v46 = vld [vmem:[#allocation2 + $0x10] sm:$0xf] }
 0x34d   : > { %v1426_v47 = vpop.f32.mrf.mxu2  ;;  %1502 = vrot.lane.b32.xlu2 %v1445_v46, %s4738_s24  ;;  %1481 = vrot.lane.b32.xlu0 %v1445_v46, %s3268_s1  ;;  %v1444_v49 = vld [vmem:[#allocation2 + $0x8] sm:$0xf] }
 0x34e   : > { %1460 = vrot.lane.b32.xlu1 %v1445_v46, %s4737_s26  ;;  %v3170_v50 = vpack.i.bf16 %v1444_v49, %v1443_v48  ;;  %v3185_v51 = vpack.i.bf16 %v1445_v46, %v1444_v49 }
 0x355   : > { %3171 = vrot.lane.b32.xlu2 %v3170_v50, %s3268_s1  ;;  %3166 = vrot.lane.b32.xlu0 %v3170_v50, %s4737_s26  ;;  %s4716_s1 = smov 121   ;;  %s3283_s26 = smov 122  }
 0x356   : > { %1523 = vrot.lane.b32.xlu1 %v1445_v46, %s4721_s27  ;;  %v1537_v46 = vperm.slane %v3813_v30, 0 }
 0x358   : > { %vm3864_vm5 = vcmp.eq.s32.totalorder %v1537_v46, 1 }
 0x35d   : > { %3186 = vrot.lane.b32.xlu2 %v3185_v51, %s4719_s4  ;;  %3181 = vrot.lane.b32.xlu0 %v3170_v50, %s4721_s27 }
 0x35e   : > { %3176 = vrot.lane.b32.xlu1 %v3170_v50, %s4738_s24  ;;  %v1474_v50 = vperm.slane %v1472_v31, 1  ;;  %s4723_s24 = smov 124  }
 0x365   : > { %3201 = vrot.lane.b32.xlu2 %v3185_v51, %s3274_s0  ;;  %3196 = vrot.lane.b32.xlu0 %v3185_v51, %s3275_s30 }
 0x366   : > { %3191 = vrot.lane.b32.xlu1 %v3185_v51, %s3266_s22  ;;  %s4765_s22 = smov 7  }
 0x36d   : > { %1609 = vrot.lane.b32.xlu0 %v1533_v42, %s3274_s0  ;;  %s4767_s0 = smov 121  }
 0x36e   : > { %1588 = vrot.lane.b32.xlu1 %v1533_v42, %s3275_s30  ;;  %v1636_v42 = vld [vmem:[%s4701_s17 + $0x88] sm:$0xff]  ;;  %s4740_s30 = sld [smem:[#allocation9_spill]] }
 0x36f   : > { %1685 = vmatpush.msrb.mxu1 %v1636_v42 }
 0x371   : > { %1686 = vmatpush.msrb.mxu1 %v1635_v52 }
 0x374   : > { %v1691_v45 = vld [vmem:[%s4740_s30] sm:$0xf]  ;;  %s3281_s30 = smov 120  }
 0x375   : > { %1699 = vperm.xlu2 %3206, %v1691_v45  }
 0x376   : > { %1694 = vperm.xlu1 %3205, %v1691_v45  }
 0x37d   : > { %3208 = vset.pattern.permute.xlu2 %v3252_v1 }
 0x37e   : > { %3207 = vset.pattern.permute.xlu1 %v3253_v2 }
 0x3a7   : > { %v3745_v8 = vpop.permute.xlu2 %1502 }
 0x3af   : > { %v3794_v59 = vpop.permute.xlu2 %3171 }
 0x3b0   : > { %v3174_v37 = vunpack.i.h.bf16 %v3794_v59  ;;  %v3173_v38 = vunpack.i.l.bf16 %v3794_v59 }
 0x3b2   : > { %v1483_v61 = vsel %vm4713_vm7, %v3173_v38, %v3174_v37 }
 0x3b3   : > { %v1487_v15 = vsel %vm3855_vm1, %v1483_v61, -1e+30  ;;  %vm3901_vm1 = vcmp.eq.s32.totalorder %v1515_v17, 1 }
 0x3b7   : > { %v3187_v62 = vpop.permute.xlu2 %3186 }
 0x3b8   : > { %v3189_v13 = vunpack.i.h.bf16 %v3187_v62  ;;  %v3188_v22 = vunpack.i.l.bf16 %v3187_v62 }
 0x3ba   : > { %v1548_v35 = vsel %vm783_vm12, %v3188_v22, %v3189_v13 }
 0x3bf   : > { %v3786_v21 = vpop.permute.xlu0 %1481  ;;  %v3202_v38 = vpop.permute.xlu2 %3201 }
 0x3c0   : > { %v1461_v23 = vpop.permute.xlu1 %1460  ;;  %v1484_v18 = vsel %vm4713_vm7, %v3174_v37, %v3786_v21  ;;  %vm3907_vm7 = vcmp.eq.s32.totalorder %v1538_v0, 1  ;;  %v1729_v21 = vld [vmem:[#allocation2] sm:$0xf] }
 0x3c1   : > { %1738 = vrot.lane.b32.xlu1 %v1729_v21, %s4714_s23 }
 0x3c7   : > { %v3167_v40 = vpop.permute.xlu0 %3166 }
 0x3c8   : > { %v3838_v47 = vpop.permute.xlu1 %1523  ;;  %v3169_v48 = vunpack.i.h.bf16 %v3167_v40  ;;  %v3168_v49 = vunpack.i.l.bf16 %v3167_v40 }
 0x3ca   : > { %v1463_v58 = vsel %vm686_vm15, %v3169_v48, %v1461_v23  ;;  %v1462_v60 = vsel %vm686_vm15, %v3168_v49, %v3169_v48  ;;  %vm3873_vm15 = vcmp.eq.s32.totalorder %v1474_v50, 1  ;;  %v1552_v49 = vsel %vm3864_vm5, %v1548_v35, -1e+30 }
 0x3cb   : > { %v1466_v9 = vsel %vm3840_vm13, %v1462_v60, -1e+30  ;;  %v1467_v55 = vsel %vm3847_vm14, %v1463_v58, -1e+30  ;;  %vm1557_vm13 = vcmp.ne.f32.partialorder %v3067_v5, 0.0  ;;  %vm1578_vm14 = vcmp.ne.f32.partialorder %v3068_v10, 0.0 }
 0x3cc   : > { %v1468_v19 = vmax.f32 %v3687_v44, %v1466_v9  ;;  %v1469_v57 = vmax.f32 %v3685_v43, %v1467_v55  ;;  %v1488_v44 = vsel %vm3873_vm15, %v1484_v18, -1e+30  ;;  %v1558_v43 = vsel %vm1557_vm13, 1, %v3252_v1 }
 0x3cd   : > { %v1579_v29 = vsel %vm1578_vm14, 1, %v3252_v1  ;;  %vm3920_vm15 = vcmp.eq.s32.totalorder %v1516_v28, 1  ;;  %v1559_v41 = vperm.slane %v1558_v43, 0  ;;  %v1549_v50 = vsel %vm783_vm12, %v3189_v13, %v3743_v7 }
 0x3ce   : > { %v1489_v32 = vmax.f32 %v1468_v19, %v1487_v15  ;;  %v1490_v36 = vmax.f32 %v1469_v57, %v1488_v44  ;;  %v1580_v48 = vperm.slane %v1579_v29, 0  ;;  %v3204_v58 = vunpack.i.h.bf16 %v3202_v38 }
 0x3cf   : > { %v3182_v20 = vpop.permute.xlu0 %3181  ;;  %v3203_v60 = vunpack.i.l.bf16 %v3202_v38  ;;  %v1581_v7 = vperm.slane %v1579_v29, 1  ;;  %v1553_v17 = vsel %vm3907_vm7, %v1549_v50, -1e+30  ;;  %vm1604_vm13 = vcmp.eq.s32.totalorder %v1602_v56, 1  ;;  %v1769_v29 = vld [vmem:[#allocation2] sm:$0xf] }
 0x3d0   : > { %v3177_v23 = vpop.permute.xlu1 %3176  ;;  %v3184_v59 = vunpack.i.h.bf16 %v3182_v20  ;;  %v3183_v24 = vunpack.i.l.bf16 %v3182_v20  ;;  %vm3939_vm12 = vcmp.eq.s32.totalorder %v1580_v48, 1  ;;  %1778 = vrot.lane.b32.xlu0 %v1769_v29, %s4721_s27  ;;  %v1790_v38 = vld [vmem:[%s4699_s15 + $0x4] sm:$0x1]  ;;  %vm1709_vm7 = vcmask 396288  }
 0x3d1   : > { %v3179_v26 = vunpack.i.h.bf16 %v3177_v23  ;;  %v3178_v27 = vunpack.i.l.bf16 %v3177_v23  ;;  %v1611_v16 = vsel %vm858_vm6, %v3203_v60, %v3204_v58 }
 0x3d2   : > { %v1525_v34 = vsel %vm760_vm8, %v3183_v24, %v3184_v59  ;;  %v1526_v45 = vsel %vm760_vm8, %v3184_v59, %v3838_v47 }
 0x3d3   : > { %v1505_v31 = vsel %vm715_vm2, %v3179_v26, %v3745_v8  ;;  %v1504_v33 = vsel %vm715_vm2, %v3178_v27, %v3179_v26  ;;  %v1560_v8 = vperm.slane %v1558_v43, 1  ;;  %v1529_v46 = vsel %vm3901_vm1, %v1525_v34, -1e+30  ;;  %v1711_v43 = vld [vmem:[#allocation2] sm:$0xf]  ;;  %v1700_v34 = vpop.permute.xlu2 %1699 }
 0x3d4   : > { %v1509_v63 = vsel %vm3893_vm0, %v1505_v31, -1e+30  ;;  %v1508_v37 = vsel %vm3885_vm4, %v1504_v33, -1e+30  ;;  %v1530_v47 = vsel %vm3920_vm15, %v1526_v45, -1e+30  ;;  %1720 = vrot.lane.b32.xlu2 %v1711_v43, %s3280_s5 }
 0x3d5   : > { %v1510_v39 = vmax.f32 %v1489_v32, %v1508_v37  ;;  %v1511_v42 = vmax.f32 %v1490_v36, %v1509_v63  ;;  %vm1561_vm2 = vcmp.eq.s32.totalorder %v1559_v41, 1  ;;  %vm3935_vm5 = vcmp.eq.s32.totalorder %v1560_v8, 1  ;;  %v1753_v43 = vld [vmem:[%s4699_s15 + $0x2] sm:$0x1] }
 0x3d6   : > { %vm1603_vm4 = vcmp.eq.s32.totalorder %v1601_v53, 1 }
 0x3d7   : > { %v1531_v51 = vmax.f32 %v1510_v39, %v1529_v46  ;;  %v3197_v52 = vpop.permute.xlu0 %3196  ;;  %v1532_v4 = vmax.f32 %v1511_v42, %v1530_v47  ;;  %v1615_v12 = vsel %vm1603_vm4, %v1611_v16, -1e+30  ;;  %v1798_v16 = vld [vmem:[%s4699_s15 + $0x5] sm:$0x1] }
 0x3d8   : > { %v3192_v54 = vpop.permute.xlu1 %3191  ;;  %v3199_v61 = vunpack.i.h.bf16 %v3197_v52  ;;  %v3198_v62 = vunpack.i.l.bf16 %v3197_v52 }
 0x3d9   : > { %v3194_v0 = vunpack.i.h.bf16 %v3192_v54  ;;  %v3193_v3 = vunpack.i.l.bf16 %v3192_v54  ;;  %v1554_v11 = vmax.f32 %v1531_v51, %v1552_v49  ;;  %v1555_v19 = vmax.f32 %v1532_v4, %v1553_v17  ;;  %v1731_v4 = vld [vmem:[%s4699_s15 + $0x1] sm:$0x1] }
 0x3da   : > { %v1590_v55 = vsel %vm843_vm3, %v3198_v62, %v3199_v61  ;;  %v1825_v62 = vld [vmem:[%s4699_s15 + $0x7] sm:$0x1]  ;;  %vm1732_vm1 = vcmp.ne.f32.partialorder %v1731_v4, 0.0 }
 0x3db   : > { %v1570_v9 = vsel %vm828_vm9, %v3194_v0, %v3726_v14  ;;  %v1569_v10 = vsel %vm828_vm9, %v3193_v3, %v3194_v0  ;;  %v1594_v14 = vsel %vm3939_vm12, %v1590_v55, -1e+30  ;;  %vm1583_vm9 = vcmp.eq.s32.totalorder %v1581_v7, 1 }
 0x3dc   : > { %v1573_v13 = vsel %vm1561_vm2, %v1569_v10, -1e+30  ;;  %v1574_v18 = vsel %vm3935_vm5, %v1570_v9, -1e+30  ;;  %vm1826_vm0 = vcmp.ne.f32.partialorder %v1825_v62, 0.0  ;;  %v1733_v7 = vsel %vm1732_vm1, 1, %v3252_v1 }
 0x3dd   : > { %v1575_v15 = vmax.f32 %v1554_v11, %v1573_v13  ;;  %v1576_v23 = vmax.f32 %v1555_v19, %v1574_v18  ;;  %v1827_v0 = vsel %vm1826_vm0, 1, %v3252_v1  ;;  %vm1749_vm2 = vcmask 400388   ;;  %v1840_v13 = vld [vmem:[%s4699_s15 + $0x8] sm:$0x1]  ;;  %v4031_v62 = vld [vmem:[#allocation2] sm:$0xff] }
 0x3de   : > { %v1828_v3 = vperm.slane %v1827_v0, 0  ;;  %v1734_v10 = vperm.slane %v1733_v7, 0  ;;  %vm1742_vm5 = vcmask 56320   ;;  %vm1841_vm4 = vcmp.ne.f32.partialorder %v1840_v13, 0.0 }
 0x3df   : > { %v1610_v20 = vpop.permute.xlu0 %1609  ;;  %v1596_v22 = vmax.f32 %v1575_v15, %v1594_v14  ;;  %v1842_v14 = vsel %vm1841_vm4, 1, %v3252_v1  ;;  %vm1724_vm4 = vcmask 64512  }
 0x3e0   : > { %v1589_v57 = vpop.permute.xlu1 %1588  ;;  %v1612_v24 = vsel %vm858_vm6, %v3204_v58, %v1610_v20  ;;  %vm1791_vm6 = vcmp.ne.f32.partialorder %v1790_v38, 0.0  ;;  %v1751_v58 = vld [vmem:[#allocation2] sm:$0xf]  ;;  %vm1829_vm15 = vcmp.eq.s32.totalorder %v1828_v3, 1  ;;  %vm1735_vm12 = vcmp.eq.s32.totalorder %v1734_v10, 1 }
 0x3e1   : > { %v1591_v59 = vsel %vm843_vm3, %v3199_v61, %v1589_v57  ;;  %v1617_v25 = vmax.f32 %v1596_v22, %v1615_v12  ;;  %v1616_v28 = vsel %vm1604_vm13, %v1612_v24, -1e+30  ;;  %v1792_v41 = vsel %vm1791_vm6, 1, %v3252_v1  ;;  %v1879_v61 = vld [vmem:[%s4691_s7] sm:$0xff] }
 0x3e2   : > { %v1595_v26 = vsel %vm1583_vm9, %v1591_v59, -1e+30  ;;  %v1793_v42 = vperm.slane %v1792_v41, 0  ;;  %vm1799_vm9 = vcmp.ne.f32.partialorder %v1798_v16, 0.0  ;;  %v1813_v20 = vld [vmem:[%s4699_s15 + $0x6] sm:$0x1] }
 0x3e3   : > { %v1597_v27 = vmax.f32 %v1576_v23, %v1595_v26  ;;  %1667 = vmatmul.f32.vlgmr.msra.gmra.mxu0 %v1617_v25  ;;  %v1800_v19 = vsel %vm1799_vm9, 1, %v3252_v1  ;;  %v1843_v22 = vperm.slane %v1842_v14, 0  ;;  %v1771_v12 = vld [vmem:[%s4699_s15 + $0x3] sm:$0x1]  ;;  %vm1814_vm13 = vcmp.ne.f32.partialorder %v1813_v20, 0.0 }
 0x3e4   : > { %vm1794_vm14 = vcmp.eq.s32.totalorder %v1793_v42, 1  ;;  %v1801_v57 = vperm.slane %v1800_v19, 0  ;;  %v1815_v23 = vsel %vm1814_vm13, 1, %v3252_v1  ;;  %vm1764_vm9 = vcmask 48128   ;;  %v1968_v10 = vld [vmem:[%s4699_s15 + $0x4] sm:$0x1] }
 0x3e5   : > { %v1618_v44 = vmax.f32 %v1597_v27, %v1616_v28  ;;  %vm1844_vm6 = vcmp.eq.s32.totalorder %v1843_v22, 1  ;;  %v1816_v28 = vperm.slane %v1815_v23, 0  ;;  %v1976_v20 = vld [vmem:[%s4699_s15 + $0x5] sm:$0x1] }
 0x3e7   : > { %1687 = vmatmul.f32.vlgmr.msrb.gmra.mxu1 %v1618_v44  ;;  %v1713_v44 = vld [vmem:[%s4699_s15] sm:$0x1]  ;;  %vm1817_vm1 = vcmp.eq.s32.totalorder %v1816_v28, 1 }
 0x3e8   : > { %v1695_v30 = vpop.permute.xlu1 %1694  ;;  %vm1714_vm0 = vcmp.ne.f32.partialorder %v1713_v44, 0.0  ;;  %v2000_v44 = vld [vmem:[%s4699_s15 + $0x7] sm:$0x1] }
 0x42e   : > { %v3982_v47 = vpop.permute.xlu2 %1720 }
 0x433   : > { %v1739_v11 = vpop.permute.xlu1 %1738 }
 0x442   : > { %v1779_v18 = vpop.permute.xlu0 %1778 }
 0x460   : > { %v1668_v31 = vpop.f32.mrf.mxu0 }
 0x464   : > { %v1688_v32 = vpop.f32.mrf.mxu1 }
 0x465   : > { %v1689_v33 = vadd.f32 %v1688_v32, %v1668_v31  ;;  %v1715_v31 = vsel %vm1714_vm0, 1, %v3252_v1 }
 0x466   : > { %v1716_v38 = vperm.slane %v1715_v31, 0 }
 0x467   : > { %v1697_v35 = vmul.f32 %v1695_v30, %v1689_v33 }
 0x468   : > { %vm1717_vm13 = vcmp.eq.s32.totalorder %v1716_v38, 1  ;;  %v1935_v38 = vld [vmem:[%s4699_s15 + $0x2] sm:$0x1] }
 0x469   : > { %v1702_v63 = vadd.f32 %v1700_v34, %v1697_v35 }
 0x46b   : > { %v1704_v36 = vmin.f32 %v1702_v63, 0.0  ;;  %vm1703_vm3 = vcmp.gt.f32.partialorder %v1702_v63, 0.0 }
 0x46d   : > { %v1705_v37 = vmul.f32 1.442695, %v1704_v36 }
 0x46f   : > { %3226 = vpow2.f32 %v1705_v37 }
 0x475   : > { %v3227_v39 = vpop.eup %3226 }
 0x476   : > { %v3070_v40 = vadd.f32 -1.0, %v3227_v39 }
 0x478   : > { %v1708_v8 = vsel %vm1703_vm3, %v1702_v63, %v3070_v40  ;;  %vm1772_vm3 = vcmp.ne.f32.partialorder %v1771_v12, 0.0 }
 0x479   : > { %1710 = vst.msk [vmem:[#allocation2 + $0x8] sm:$0xf] %vm1709_vm7, %v1708_v8  ;;  %v1773_v26 = vsel %vm1772_vm3, 1, %v3252_v1 }
 0x47a   : > { %v1774_v29 = vperm.slane %v1773_v26, 0 }
 0x480   : > { %v1839_v45 = vld [vmem:[#allocation2 + $0x8] sm:$0xf] }
 0x481   : > { %v1824_v46 = vld [vmem:[#allocation2 + $0x8] sm:$0xf]  ;;  %1846 = vrot.lane.b32.xlu0 %v1839_v45, %s3281_s30 }
 0x482   : > { %v1797_v48 = vld [vmem:[#allocation2 + $0x8] sm:$0xf]  ;;  %1831 = vrot.lane.b32.xlu2 %v1824_v46, %s4716_s1 }
 0x483   : > { %1804 = vrot.lane.b32.xlu1 %v1797_v48, %s4719_s4  ;;  %v1789_v49 = vld [vmem:[#allocation2 + $0x8] sm:$0xf] }
 0x484   : > { %v1795_v50 = vsel %vm1794_vm14, %v1789_v49, 0.0  ;;  %v1812_v51 = vld [vmem:[#allocation2 + $0x8] sm:$0xf]  ;;  %vm1802_vm14 = vcmp.eq.s32.totalorder %v1801_v57, 1 }
 0x485   : > { %1796 = vst.msk [vmem:[#allocation3 + $0x20] sm:$0xf] %vm1709_vm7, %v1795_v50  ;;  %v1730_v52 = vld [vmem:[#allocation2 + $0x8] sm:$0xf] }
 0x486   : > { %v1770_v53 = vld [vmem:[#allocation2 + $0x8] sm:$0xf] }
 0x487   : > { %v1752_v60 = vld [vmem:[#allocation2 + $0x8] sm:$0xf] }
 0x488   : > { %v1712_v54 = vld [vmem:[#allocation2 + $0x8] sm:$0xf] }
 0x489   : > { %1819 = vrot.lane.b32.xlu0 %v1812_v51, %s3283_s26 }
 0x48a   : > { %1740 = vrot.lane.b32.xlu2 %v1730_v52, %s4714_s23 }
 0x48b   : > { %1780 = vrot.lane.b32.xlu1 %v1770_v53, %s4721_s27 }
 0x491   : > { %1722 = vrot.lane.b32.xlu0 %v1712_v54, %s3280_s5 }
 0x492   : > { %1762 = vrot.lane.b32.xlu2 %v1752_v60, %s3284_s28 }
 0x493   : > { %1760 = vrot.lane.b32.xlu1 %v1751_v58, %s3284_s28 }
 0x499   : > { %1882 = vperm.xlu0 %3163, %v1879_v61  }
 0x49a   : > { %1959 = vrot.lane.b32.xlu2 %v4031_v62, %s4721_s27 }
 0x49b   : > { %1887 = vperm.xlu1 %3207, %v1879_v61   ;;  %v1859_v61 = vld [vmem:[%s4690_s6] sm:$0xf] }
 0x4a1   : > { %3209 = vset.pattern.permute.xlu0 %v3253_v2 }
 0x4a2   : > { %1942 = vrot.lane.b32.xlu0 %v4031_v62, %s3284_s28 }
 0x4a3   : > { %1908 = vrot.lane.b32.xlu1 %v4031_v62, %s3280_s5 }
 0x4dc   : > { %v1832_v5 = vpop.permute.xlu2 %1831 }
 0x4dd   : > { %v1834_v6 = vsel %vm1829_vm15, %v1832_v5, 0.0  ;;  %vm1754_vm15 = vcmp.ne.f32.partialorder %v1753_v43, 0.0  ;;  %v1988_v43 = vld [vmem:[%s4699_s15 + $0x6] sm:$0x1] }
 0x4de   : > { %v1836_v9 = vrot.slane %v1834_v6, 4  ;;  %v1755_v35 = vsel %vm1754_vm15, 1, %v3252_v1 }
 0x4df   : > { %v1756_v8 = vperm.slane %v1755_v35, 0 }
 0x4e0   : > { %1838 = vst.msk [vmem:[#allocation3 + $0x30] sm:$0xf0] %vm1749_vm2, %v1836_v9 }
 0x4e4   : > { %v1741_v55 = vpop.permute.xlu2 %1740 }
 0x4e5   : > { %v1743_v56 = vsel %vm1742_vm5, %v1739_v11, %v1741_v55 }
 0x4e6   : > { %v1745_v15 = vsel %vm1735_vm12, %v1743_v56, 0.0  ;;  %vm1775_vm12 = vcmp.eq.s32.totalorder %v1774_v29, 1 }
 0x4e7   : > { %v1747_v17 = vrot.slane %v1745_v15, 4 }
 0x4e9   : > { %1750 = vst.msk [vmem:[#allocation3] sm:$0xf0] %vm1749_vm2, %v1747_v17 }
 0x4ec   : > { %v1763_v42 = vpop.permute.xlu2 %1762 }
 0x4f3   : > { %v1847_v59 = vpop.permute.xlu0 %1846 }
 0x4f4   : > { %v1849_v24 = vsel %vm1844_vm6, %v1847_v59, 0.0  ;;  %vm1757_vm6 = vcmp.eq.s32.totalorder %v1756_v8, 1  ;;  %v4064_v14 = vpop.permute.xlu2 %1959 }
 0x4f5   : > { %v1805_v25 = vpop.permute.xlu1 %1804  ;;  %1850 = vst.msk [vmem:[#allocation3 + $0x40] sm:$0xf] %vm1709_vm7, %v1849_v24  ;;  %v1901_v24 = vld [vmem:[%s4699_s15] sm:$0x1] }
 0x4f6   : > { %v1807_v27 = vsel %vm1802_vm14, %v1805_v25, 0.0  ;;  %vm1977_vm14 = vcmp.ne.f32.partialorder %v1976_v20, 0.0 }
 0x4f7   : > { %v1809_v21 = vrot.slane %v1807_v27, 4  ;;  %v1978_v57 = vsel %vm1977_vm14, 1, %v3252_v1 }
 0x4f8   : > { %v1979_v59 = vperm.slane %v1978_v57, 0 }
 0x4f9   : > { %1811 = vst.msk [vmem:[#allocation3 + $0x20] sm:$0xf0] %vm1749_vm2, %v1809_v21 }
 0x4fa   : > { %vm1980_vm15 = vcmp.eq.s32.totalorder %v1979_v59, 1 }
 0x4fb   : > { %v1820_v30 = vpop.permute.xlu0 %1819 }
 0x4fc   : > { %v1822_v32 = vsel %vm1817_vm1, %v1820_v30, 0.0  ;;  %v1855_v34 = vld [vmem:[#allocation3 + $0x40] sm:$0xf]  ;;  %vm1902_vm1 = vcmp.ne.f32.partialorder %v1901_v24, 0.0  ;;  %v2159_v24 = vld [vmem:[%s4702_s18 + $0x20] sm:$0xff] }
 0x4fd   : > { %v1781_v33 = vpop.permute.xlu1 %1780  ;;  %1823 = vst.msk [vmem:[#allocation3 + $0x30] sm:$0xf] %vm1709_vm7, %v1822_v32  ;;  %v1858_v36 = vpack.c.bf16 %v1855_v34, %v1855_v34  ;;  %v1903_v26 = vsel %vm1902_vm1, 1, %v3252_v1 }
 0x4fe   : > { %v1782_v63 = vsel %vm760_vm8, %v1779_v18, %v1781_v33  ;;  %v2012_v18 = vld [vmem:[%s4699_s15 + $0x8] sm:$0x1]  ;;  %v1904_v29 = vperm.slane %v1903_v26, 0  ;;  %v2061_v26 = vld [vmem:[%s4699_s15] sm:$0x1] }
 0x4ff   : > { %v1784_v37 = vsel %vm1775_vm12, %v1782_v63, 0.0  ;;  %v1864_v40 = vsel %vm1408_vm11, %v1858_v36, 0  ;;  %vm1969_vm11 = vcmp.ne.f32.partialorder %v1968_v10, 0.0  ;;  %vm2013_vm3 = vcmp.ne.f32.partialorder %v2012_v18, 0.0 }
 0x500   : > { %v1786_v39 = vrot.slane %v1784_v37, 4  ;;  %1871 = vmatpush.bf16.msra.mxu2 %v1864_v40  ;;  %v1853_v48 = vld [vmem:[#allocation3 + $0x20] sm:$0xff]  ;;  %v1970_v56 = vsel %vm1969_vm11, 1, %v3252_v1  ;;  %v2014_v19 = vsel %vm2013_vm3, 1, %v3252_v1  ;;  %vm4766_vm12 = vcmask 1043456  }
 0x501   : > { %v1971_v15 = vperm.slane %v1970_v56, 0  ;;  %v2015_v22 = vperm.slane %v2014_v19, 0  ;;  %vm1905_vm11 = vcmp.eq.s32.totalorder %v1904_v29, 1  ;;  %v1952_v40 = vld [vmem:[%s4699_s15 + $0x3] sm:$0x1] }
 0x502   : > { %1788 = vst.msk [vmem:[#allocation3 + $0x10] sm:$0xf0] %vm1749_vm2, %v1786_v39  ;;  %vm1953_vm3 = vcmp.ne.f32.partialorder %v1952_v40, 0.0  ;;  %v2037_v19 = vld [vmem:[%s4692_s8] sm:$0xf] }
 0x503   : > { %v1723_v41 = vpop.permute.xlu0 %1722  ;;  %vm1972_vm2 = vcmp.eq.s32.totalorder %v1971_v15, 1  ;;  %vm2016_vm0 = vcmp.eq.s32.totalorder %v2015_v22, 1  ;;  %v2189_v29 = vld [vmem:[%s4693_s9] sm:$0xff] }
 0x504   : > { %v1725_v46 = vsel %vm1724_vm4, %v3982_v47, %v1723_v41  ;;  %v1854_v49 = vld [vmem:[#allocation3 + $0x30] sm:$0xff] }
 0x505   : > { %v1761_v45 = vpop.permute.xlu1 %1760  ;;  %v1727_v51 = vsel %vm1717_vm13, %v1725_v46, 0.0  ;;  %v1857_v52 = vpack.c.bf16 %v1854_v49, %v1853_v48  ;;  %vm2001_vm13 = vcmp.ne.f32.partialorder %v2000_v44, 0.0  ;;  %v1954_v46 = vsel %vm1953_vm3, 1, %v3252_v1  ;;  %v2156_v44 = vld [vmem:[%s4702_s18 + $0x8] sm:$0xff] }
 0x506   : > { %v1765_v50 = vsel %vm1764_vm9, %v1761_v45, %v1763_v42  ;;  %1728 = vst.msk [vmem:[#allocation3] sm:$0xf] %vm1709_vm7, %v1727_v51  ;;  %v2002_v33 = vsel %vm2001_vm13, 1, %v3252_v1  ;;  %v1955_v51 = vperm.slane %v1954_v46, 0  ;;  %vm2038_vm13 = vcmask 588800  }
 0x507   : > { %v1767_v53 = vsel %vm1757_vm6, %v1765_v50, 0.0  ;;  %1872 = vmatpush.bf16.msra.mxu2 %v1857_v52  ;;  %vm1989_vm6 = vcmp.ne.f32.partialorder %v1988_v43, 0.0  ;;  %v2003_v37 = vperm.slane %v2002_v33, 0  ;;  %v1918_v50 = vld [vmem:[%s4699_s15 + $0x1] sm:$0x1] }
 0x508   : > { %1768 = vst.msk [vmem:[#allocation3 + $0x10] sm:$0xf] %vm1709_vm7, %v1767_v53  ;;  %v1990_v35 = vsel %vm1989_vm6, 1, %v3252_v1  ;;  %vm2165_vm6 = vcmask 1040384   ;;  %v2155_v43 = vld [vmem:[%s4702_s18] sm:$0xff] }
 0x509   : > { %v1991_v39 = vperm.slane %v1990_v35, 0  ;;  %v2102_v35 = vld [vmem:[%s4699_s15 + $0x3] sm:$0x1] }
 0x50a   : > { %vm2103_vm3 = vcmp.ne.f32.partialorder %v2102_v35, 0.0 }
 0x50b   : > { %v1883_v47 = vpop.permute.xlu0 %1882  ;;  %vm1992_vm14 = vcmp.eq.s32.totalorder %v1991_v39, 1 }
 0x50d   : > { %v1851_v58 = vld [vmem:[#allocation3] sm:$0xff]  ;;  %v1888_v3 = vpop.permute.xlu1 %1887 }
 0x50f   : > { %v1852_v60 = vld [vmem:[#allocation3 + $0x10] sm:$0xff] }
 0x510   : > { %v1856_v54 = vpack.c.bf16 %v1852_v60, %v1851_v58 }
 0x512   : > { %1873 = vmatpush.bf16.msra.mxu2 %v1856_v54 }
 0x514   : > { %v1943_v32 = vpop.permute.xlu0 %1942 }
 0x515   : > { %3071 = vmatmul.msk.bf16.vlgmr.msra.gmra.mxu2 %vm1404_vm10, %v1859_v61  ;;  %vm1897_vm10 = vcmask 400384   ;;  %v1909_v31 = vpop.permute.xlu1 %1908 }
 0x598   : > { %v1875_v0 = vpop.f32.mrf.mxu2 }
 0x599   : > { %v1885_v4 = vmul.f32 %v1883_v47, %v1875_v0 }
 0x59b   : > { %v1890_v5 = vadd.f32 %v1888_v3, %v1885_v4 }
 0x59d   : > { %v1892_v7 = vmin.f32 %v1890_v5, 0.0  ;;  %vm1891_vm7 = vcmp.gt.f32.partialorder %v1890_v5, 0.0 }
 0x59f   : > { %v1893_v6 = vmul.f32 1.442695, %v1892_v7 }
 0x5a0   : > { %v1877_v9 = vpop.f32.mrf.mxu2 }
 0x5a1   : > { %3228 = vpow2.f32 %v1893_v6 }
 0x5a7   : > { %v3229_v11 = vpop.eup %3228 }
 0x5a8   : > { %v3072_v55 = vadd.f32 -1.0, %v3229_v11 }
 0x5aa   : > { %v1896_v13 = vsel %vm1891_vm7, %v1890_v5, %v3072_v55  ;;  %vm1936_vm7 = vcmp.ne.f32.partialorder %v1935_v38, 0.0  ;;  %v2125_v38 = vld [vmem:[%s4699_s15 + $0x6] sm:$0x1] }
 0x5ab   : > { %1898 = vst.msk [vmem:[#allocation2 + $0x8] sm:$0xff] %vm1897_vm10, %v1896_v13  ;;  %v1937_v41 = vsel %vm1936_vm7, 1, %v3252_v1 }
 0x5ac   : > { %v1938_v49 = vperm.slane %v1937_v41, 0 }
 0x5ae   : > { %vm1939_vm1 = vcmp.eq.s32.totalorder %v1938_v49, 1 }
 0x5b2   : > { %v2011_v16 = vld [vmem:[#allocation2 + $0x8] sm:$0xff] }
 0x5b3   : > { %2018 = vrot.lane.b32.xlu2 %v2011_v16, %s3281_s30  ;;  %2006 = vrot.lane.b32.xlu1 %v2011_v16, %s4716_s1  ;;  %v1973_v17 = vsel %vm1972_vm2, %v2011_v16, 0.0  ;;  %vm2004_vm2 = vcmp.eq.s32.totalorder %v2003_v37, 1  ;;  %v2115_v37 = vld [vmem:[%s4699_s15 + $0x5] sm:$0x1]  ;;  %s4788_s1 = smov 123  }
 0x5b4   : > { %1994 = vrot.lane.b32.xlu0 %v2011_v16, %s3283_s26  ;;  %1974 = vst.msk [vmem:[#allocation3 + $0x40] sm:$0xff] %vm1897_vm10, %v1973_v17 }
 0x5bb   : > { %1982 = vrot.lane.b32.xlu2 %v2011_v16, %s4719_s4  ;;  %1944 = vrot.lane.b32.xlu1 %v2011_v16, %s3284_s28  ;;  %v2027_v6 = vld [vmem:[#allocation3 + $0x40] sm:$0xff] }
 0x5bc   : > { %1961 = vrot.lane.b32.xlu0 %v2011_v16, %s4721_s27 }
 0x5c3   : > { %1927 = vrot.lane.b32.xlu1 %v2011_v16, %s4765_s22  ;;  %1910 = vrot.lane.b32.xlu2 %v2011_v16, %s3280_s5 }
 0x5c4   : > { %1925 = vrot.lane.b32.xlu0 %v4031_v62, %s4765_s22 }
 0x5cb   : > { %2081 = vrot.lane.b32.xlu1 %v4031_v62, %s4765_s22  ;;  %2068 = vrot.lane.b32.xlu2 %v4031_v62, %s3280_s5 }
 0x5cc   : > { %2094 = vrot.lane.b32.xlu0 %v4031_v62, %s3284_s28 }
 0x60d   : > { %v2019_v12 = vpop.permute.xlu2 %2018 }
 0x60e   : > { %v2021_v23 = vsel %vm2016_vm0, %v2019_v12, 0.0  ;;  %vm1919_vm0 = vcmp.ne.f32.partialorder %v1918_v50, 0.0  ;;  %v2161_v12 = vld [vmem:[%s4702_s18 + $0x30] sm:$0x1]  ;;  %v2135_v50 = vld [vmem:[%s4699_s15 + $0x7] sm:$0x1] }
 0x60f   : > { %2022 = vst.msk [vmem:[#allocation3 + $0x80] sm:$0xff] %vm1897_vm10, %v2021_v23  ;;  %v1920_v54 = vsel %vm1919_vm0, 1, %v3252_v1  ;;  %v2160_v23 = vld [vmem:[%s4702_s18 + $0x28] sm:$0xff]  ;;  %3074 = vmatpush.msk.msrb.mxu2 %vm2165_vm6, %v2161_v12  ;;  %vm2116_vm0 = vcmp.ne.f32.partialorder %v2115_v37, 0.0  ;;  %v2300_v37 = vld [vmem:[%s4700_s16 + $0x6] sm:$0x1] }
 0x610   : > { %v1921_v7 = vperm.slane %v1920_v54, 0 }
 0x611   : > { %2179 = vmatpush.msrb.mxu2 %v2160_v23 }
 0x613   : > { %2180 = vmatpush.msrb.mxu2 %v2159_v24 }
 0x615   : > { %v1983_v25 = vpop.permute.xlu2 %1982 }
 0x616   : > { %v1985_v27 = vsel %vm1980_vm15, %v1983_v25, 0.0  ;;  %v2031_v28 = vld [vmem:[#allocation3 + $0x80] sm:$0xff]  ;;  %vm1956_vm15 = vcmp.eq.s32.totalorder %v1955_v51, 1  ;;  %v2158_v25 = vld [vmem:[%s4702_s18 + $0x18] sm:$0xff] }
 0x617   : > { %1986 = vst.msk [vmem:[#allocation3 + $0x50] sm:$0xff] %vm1897_vm10, %v1985_v27  ;;  %v2036_v21 = vpack.c.bf16 %v2031_v28, %v2031_v28  ;;  %2181 = vmatpush.msrb.mxu2 %v2158_v25  ;;  %v2076_v27 = vld [vmem:[%s4699_s15 + $0x1] sm:$0x1]  ;;  %v2157_v28 = vld [vmem:[%s4702_s18 + $0x10] sm:$0xff] }
 0x618   : > { %vm2077_vm7 = vcmp.ne.f32.partialorder %v2076_v27, 0.0 }
 0x619   : > { %v2043_v30 = vsel %vm4766_vm12, %v2036_v21, 0  ;;  %vm1922_vm12 = vcmp.eq.s32.totalorder %v1921_v7, 1  ;;  %2182 = vmatpush.msrb.mxu2 %v2157_v28 }
 0x61a   : > { %2048 = vmatpush.bf16.msrb.mxu3 %v2043_v30 }
 0x61b   : > { %2183 = vmatpush.msrb.mxu2 %v2156_v44 }
 0x61d   : > { %v1911_v34 = vpop.permute.xlu2 %1910  ;;  %2184 = vmatpush.msrb.mxu2 %v2155_v43 }
 0x61e   : > { %v1912_v63 = vsel %vm1724_vm4, %v1909_v31, %v1911_v34  ;;  %v2028_v5 = vld [vmem:[#allocation3 + $0x50] sm:$0xff]  ;;  %v2078_v34 = vsel %vm2077_vm7, 1, %v3252_v1 }
 0x61f   : > { %v1914_v36 = vsel %vm1905_vm11, %v1912_v63, 0.0  ;;  %v2034_v9 = vpack.c.bf16 %v2028_v5, %v2027_v6  ;;  %vm2062_vm11 = vcmp.ne.f32.partialorder %v2061_v26, 0.0 }
 0x620   : > { %1915 = vst.msk [vmem:[#allocation3] sm:$0xff] %vm1897_vm10, %v1914_v36  ;;  %v2063_v33 = vsel %vm2062_vm11, 1, %v3252_v1  ;;  %v2079_v36 = vperm.slane %v2078_v34, 0 }
 0x621   : > { %v2064_v63 = vperm.slane %v2063_v33, 0 }
 0x625   : > { %v2007_v8 = vpop.permute.xlu1 %2006  ;;  %v2069_v59 = vpop.permute.xlu2 %2068 }
 0x626   : > { %v2009_v42 = vsel %vm2004_vm2, %v2007_v8, 0.0  ;;  %v1995_v45 = vpop.permute.xlu0 %1994 }
 0x627   : > { %2010 = vst.msk [vmem:[#allocation3 + $0x70] sm:$0xff] %vm1897_vm10, %v2009_v42  ;;  %v1997_v48 = vsel %vm1992_vm14, %v1995_v45, 0.0  ;;  %v2023_v17 = vld [vmem:[#allocation3] sm:$0xff]  ;;  %vm2065_vm14 = vcmp.eq.s32.totalorder %v2064_v63, 1  ;;  %v2104_v42 = vsel %vm2103_vm3, 1, %v3252_v1 }
 0x628   : > { %1998 = vst.msk [vmem:[#allocation3 + $0x60] sm:$0xff] %vm1897_vm10, %v1997_v48 }
 0x62d   : > { %v1945_v52 = vpop.permute.xlu1 %1944 }
 0x62e   : > { %v1946_v53 = vsel %vm1764_vm9, %v1943_v32, %v1945_v52  ;;  %v1962_v58 = vpop.permute.xlu0 %1961  ;;  %v2030_v60 = vld [vmem:[#allocation3 + $0x70] sm:$0xff]  ;;  %v2117_v52 = vsel %vm2116_vm0, 1, %v3252_v1  ;;  %vm4770_vm0 = vcmask 130048  }
 0x62f   : > { %v1948_v61 = vsel %vm1939_vm1, %v1946_v53, 0.0  ;;  %v1963_v47 = vsel %vm760_vm8, %v4064_v14, %v1962_v58  ;;  %v2029_v0 = vld [vmem:[#allocation3 + $0x60] sm:$0xff]  ;;  %v2089_v32 = vld [vmem:[%s4699_s15 + $0x2] sm:$0x1]  ;;  %vm4174_vm1 = vcmp.eq.s32.totalorder %v2079_v36, 1  ;;  %v2105_v58 = vperm.slane %v2104_v42, 0 }
 0x630   : > { %1949 = vst.msk [vmem:[#allocation3 + $0x20] sm:$0xff] %vm1897_vm10, %v1948_v61  ;;  %v1965_v3 = vsel %vm1956_vm15, %v1963_v47, 0.0  ;;  %v2035_v4 = vpack.c.bf16 %v2030_v60, %v2029_v0  ;;  %vm2090_vm2 = vcmp.ne.f32.partialorder %v2089_v32, 0.0  ;;  %vm2126_vm15 = vcmp.ne.f32.partialorder %v2125_v38, 0.0  ;;  %v2145_v60 = vld [vmem:[%s4699_s15 + $0x8] sm:$0x1] }
 0x631   : > { %1966 = vst.msk [vmem:[#allocation3 + $0x30] sm:$0xff] %vm1897_vm10, %v1965_v3  ;;  %v2091_v39 = vsel %vm2090_vm2, 1, %v3252_v1  ;;  %v2127_v61 = vsel %vm2126_vm15, 1, %v3252_v1  ;;  %v2118_v3 = vperm.slane %v2117_v52, 0  ;;  %vm2106_vm11 = vcmp.eq.s32.totalorder %v2105_v58, 1  ;;  %vm4772_vm15 = vmmov %vm4770_vm0  ;;  %v2376_v36 = vld [vmem:[%s4695_s11] sm:$0xff] }
 0x632   : > { %2049 = vmatpush.bf16.msrb.mxu3 %v2035_v4  ;;  %v2092_v48 = vperm.slane %v2091_v39, 0  ;;  %v2128_v4 = vperm.slane %v2127_v61, 0 }
 0x633   : > { %vm2119_vm7 = vcmp.eq.s32.totalorder %v2118_v3, 1  ;;  %v2312_v3 = vld [vmem:[%s4700_s16 + $0x7] sm:$0x1] }
 0x634   : > { %vm2129_vm2 = vcmp.eq.s32.totalorder %v2128_v4, 1 }
 0x635   : > { %v1928_v10 = vpop.permute.xlu1 %1927 }
 0x636   : > { %2050 = vmatpush.bf16.msrb.mxu3 %v2034_v9  ;;  %v1926_v11 = vpop.permute.xlu0 %1925 }
 0x637   : > { %v1929_v55 = vsel %vm1742_vm5, %v1926_v11, %v1928_v10  ;;  %v2025_v56 = vld [vmem:[#allocation3 + $0x20] sm:$0xff] }
 0x638   : > { %v1931_v13 = vsel %vm1922_vm12, %v1929_v55, 0.0  ;;  %v2026_v15 = vld [vmem:[#allocation3 + $0x30] sm:$0xff]  ;;  %vm2146_vm12 = vcmp.ne.f32.partialorder %v2145_v60, 0.0 }
 0x639   : > { %1932 = vst.msk [vmem:[#allocation3 + $0x10] sm:$0xff] %vm1897_vm10, %v1931_v13  ;;  %v2033_v16 = vpack.c.bf16 %v2026_v15, %v2025_v56  ;;  %v2147_v55 = vsel %vm2146_vm12, 1, %v3252_v1 }
 0x63b   : > { %2051 = vmatpush.bf16.msrb.mxu3 %v2033_v16 }
 0x63d   : > { %v2082_v30 = vpop.permute.xlu1 %2081 }
 0x63e   : > { %v2095_v21 = vpop.permute.xlu0 %2094 }
 0x640   : > { %v2024_v18 = vld [vmem:[#allocation3 + $0x10] sm:$0xff] }
 0x641   : > { %v2032_v14 = vpack.c.bf16 %v2024_v18, %v2023_v17  ;;  %v2148_v18 = vperm.slane %v2147_v55, 0 }
 0x643   : > { %2052 = vmatpush.bf16.msrb.mxu3 %v2032_v14  ;;  %vm2149_vm3 = vcmp.eq.s32.totalorder %v2148_v18, 1  ;;  %v2377_v18 = vld [vmem:[%s4695_s11 + $0x8] sm:$0xff] }
 0x646   : > { %3073 = vmatmul.msk.bf16.vlgmr.msrb.gmra.mxu3 %vm2038_vm13, %v2037_v19 }
 0x6c9   : > { %v4113_v20 = vpop.f32.mrf.mxu3 }
 0x6ca   : > { %2058 = vst.msk [vmem:[#allocation2 + $0x8] sm:$0xff] %vm1897_vm10, %v4113_v20 }
 0x6d1   : > { %v2056_v22 = vpop.f32.mrf.mxu3  ;;  %v2060_v57 = vld [vmem:[#allocation2 + $0x8] sm:$0xff] }
 0x6d2   : > { %2096 = vrot.lane.b32.xlu1 %v2060_v57, %s3284_s28  ;;  %2083 = vrot.lane.b32.xlu2 %v2060_v57, %s4765_s22  ;;  %s4771_s22 = smov 125  }
 0x6d3   : > { %2070 = vrot.lane.b32.xlu0 %v2060_v57, %s3280_s5  ;;  %s4717_s5 = smov 123  }
 0x6da   : > { %2120 = vrot.lane.b32.xlu1 %v2060_v57, %s4719_s4  ;;  %2107 = vrot.lane.b32.xlu2 %v4031_v62, %s4721_s27 }
 0x6db   : > { %2109 = vrot.lane.b32.xlu0 %v2060_v57, %s4721_s27 }
 0x6e2   : > { %2150 = vrot.lane.b32.xlu1 %v2060_v57, %s3281_s30  ;;  %2130 = vrot.lane.b32.xlu2 %v2060_v57, %s3283_s26  ;;  %s3289_s30 = smov 4  }
 0x6e3   : > { %2140 = vrot.lane.b32.xlu0 %v2060_v57, %s4767_s0  ;;  %s3285_s0 = smov 5  }
 0x6ea   : > { %2192 = vperm.xlu2 %3208, %v2189_v29   ;;  %2217 = vrot.lane.b32.xlu1 %v4031_v62, %s3285_s0 }
 0x6eb   : > { %2197 = vperm.xlu0 %3209, %v2189_v29   ;;  %v2280_v29 = vld [vmem:[%s4700_s16 + $0x4] sm:$0x1] }
 0x6f2   : > { %2271 = vrot.lane.b32.xlu2 %v4031_v62, %s4721_s27 }
 0x6f3   : > { %3210 = vset.pattern.permute.xlu0 %v3252_v1 }
 0x6f4   : > { %2253 = vrot.lane.b32.xlu0 %v4031_v62, %s3286_s3 }
 0x72c   : > { %v2084_v31 = vpop.permute.xlu2 %2083 }
 0x72d   : > { %v2085_v45 = vsel %vm1742_vm5, %v2082_v30, %v2084_v31  ;;  %vm2136_vm5 = vcmp.ne.f32.partialorder %v2135_v50, 0.0 }
 0x72e   : > { %v2087_v54 = vsel %vm4174_vm1, %v2085_v45, -1e+30  ;;  %v2137_v7 = vsel %vm2136_vm5, 1, %v3252_v1  ;;  %vm2301_vm5 = vcmp.ne.f32.partialorder %v2300_v37, 0.0 }
 0x72f   : > { %v2138_v13 = vperm.slane %v2137_v7, 0  ;;  %v2302_v39 = vsel %vm2301_vm5, 1, %v3252_v1 }
 0x730   : > { %v2303_v8 = vperm.slane %v2302_v39, 0  ;;  %v3109_v39 = vld [vmem:[%s4694_s10] sm:$0xff] }
 0x732   : > { %vm2304_vm12 = vcmp.eq.s32.totalorder %v2303_v8, 1 }
 0x734   : > { %v2108_v46 = vpop.permute.xlu2 %2107 }
 0x73c   : > { %v2131_v15 = vpop.permute.xlu2 %2130 }
 0x73d   : > { %v2133_v19 = vsel %vm2129_vm2, %v2131_v15, -1e+30 }
 0x744   : > { %v2097_v40 = vpop.permute.xlu1 %2096  ;;  %v2193_v25 = vpop.permute.xlu2 %2192 }
 0x745   : > { %v2071_v41 = vpop.permute.xlu0 %2070  ;;  %v2098_v47 = vsel %vm1764_vm9, %v2095_v21, %v2097_v40  ;;  %vm2139_vm9 = vcmp.eq.s32.totalorder %v2138_v13, 1  ;;  %v2288_v40 = vld [vmem:[%s4700_s16 + $0x5] sm:$0x1]  ;;  %v2246_v13 = vld [vmem:[%s4700_s16 + $0x2] sm:$0x1] }
 0x746   : > { %v2072_v49 = vsel %vm1724_vm4, %v2069_v59, %v2071_v41  ;;  %vm2093_vm4 = vcmp.eq.s32.totalorder %v2092_v48, 1 }
 0x747   : > { %v2074_v51 = vsel %vm2065_vm14, %v2072_v49, -1e+30  ;;  %v2100_v6 = vsel %vm2093_vm4, %v2098_v47, -1e+30  ;;  %vm2289_vm4 = vcmp.ne.f32.partialorder %v2288_v40, 0.0  ;;  %v4280_v40 = vld [vmem:[#allocation2 + $0x20] sm:$0xff] }
 0x748   : > { %v2075_v53 = vmax.f32 %v4113_v20, %v2074_v51  ;;  %v2324_v51 = vld [vmem:[%s4700_s16 + $0x8] sm:$0x1] }
 0x74a   : > { %v2088_v0 = vmax.f32 %v2075_v53, %v2087_v54  ;;  %v2264_v53 = vld [vmem:[%s4700_s16 + $0x3] sm:$0x1] }
 0x74c   : > { %v2121_v5 = vpop.permute.xlu1 %2120  ;;  %v2101_v10 = vmax.f32 %v2088_v0, %v2100_v6  ;;  %v2272_v38 = vpop.permute.xlu2 %2271 }
 0x74d   : > { %v2110_v9 = vpop.permute.xlu0 %2109  ;;  %v2123_v17 = vsel %vm2119_vm7, %v2121_v5, -1e+30 }
 0x74e   : > { %v2111_v11 = vsel %vm760_vm8, %v2108_v46, %v2110_v9  ;;  %v2210_v46 = vld [vmem:[%s4700_s16] sm:$0x1] }
 0x74f   : > { %v2113_v56 = vsel %vm2106_vm11, %v2111_v11, -1e+30  ;;  %vm4773_vm11 = vmmov %vm4770_vm0  ;;  %vm2211_vm7 = vcmp.ne.f32.partialorder %v2210_v46, 0.0 }
 0x750   : > { %v2114_v16 = vmax.f32 %v2101_v10, %v2113_v56  ;;  %v2212_v49 = vsel %vm2211_vm7, 1, %v3252_v1  ;;  %vm2247_vm7 = vcmp.ne.f32.partialorder %v2246_v13, 0.0  ;;  %v2543_v13 = vld [vmem:[%s4700_s16 + $0x5] sm:$0x1] }
 0x751   : > { %v2213_v52 = vperm.slane %v2212_v49, 0 }
 0x752   : > { %v2124_v14 = vmax.f32 %v2114_v16, %v2123_v17  ;;  %v2248_v17 = vsel %vm2247_vm7, 1, %v3252_v1 }
 0x754   : > { %v2134_v20 = vmax.f32 %v2124_v14, %v2133_v19  ;;  %v2151_v22 = vpop.permute.xlu1 %2150 }
 0x755   : > { %v2141_v57 = vpop.permute.xlu0 %2140  ;;  %v2153_v59 = vsel %vm2149_vm3, %v2151_v22, -1e+30  ;;  %vm2325_vm3 = vcmp.ne.f32.partialorder %v2324_v51, 0.0  ;;  %v2228_v22 = vld [vmem:[%s4700_s16 + $0x1] sm:$0x1] }
 0x756   : > { %v2143_v12 = vsel %vm2139_vm9, %v2141_v57, -1e+30  ;;  %vm4774_vm9 = vmmov %vm4770_vm0  ;;  %v2326_v54 = vsel %vm2325_vm3, 1, %v3252_v1  ;;  %v2249_v57 = vperm.slane %v2248_v17, 0  ;;  %vm4779_vm3 = vcmask 1043456  }
 0x757   : > { %v2144_v23 = vmax.f32 %v2134_v20, %v2143_v12  ;;  %v2327_v5 = vperm.slane %v2326_v54, 0  ;;  %v2505_v17 = vld [vmem:[%s4700_s16 + $0x3] sm:$0x1] }
 0x759   : > { %v2154_v24 = vmax.f32 %v2144_v23, %v2153_v59  ;;  %vm2328_vm5 = vcmp.eq.s32.totalorder %v2327_v5, 1 }
 0x75b   : > { %3075 = vmatmul.msk.f32.vlgmr.msrb.gmra.mxu2 %vm1897_vm10, %v2154_v24  ;;  %vm2281_vm10 = vcmp.ne.f32.partialorder %v2280_v29, 0.0 }
 0x75c   : > { %v2282_v32 = vsel %vm2281_vm10, 1, %v3252_v1  ;;  %v2218_v58 = vpop.permute.xlu1 %2217  ;;  %vm2221_vm10 = vcmask 39936  }
 0x75d   : > { %v2198_v27 = vpop.permute.xlu0 %2197  ;;  %v2283_v34 = vperm.slane %v2282_v32, 0 }
 0x75f   : > { %vm2284_vm1 = vcmp.eq.s32.totalorder %v2283_v34, 1 }
 0x766   : > { %v2254_v60 = vpop.permute.xlu0 %2253 }
 0x7de   : > { %v2186_v26 = vpop.f32.mrf.mxu2 }
 0x7df   : > { %v2195_v28 = vmul.f32 %v2193_v25, %v2186_v26 }
 0x7e1   : > { %v2200_v44 = vadd.f32 %v2198_v27, %v2195_v28 }
 0x7e3   : > { %v2202_v21 = vmin.f32 %v2200_v44, 0.0  ;;  %vm2201_vm14 = vcmp.gt.f32.partialorder %v2200_v44, 0.0 }
 0x7e5   : > { %v2203_v43 = vmul.f32 1.442695, %v2202_v21 }
 0x7e7   : > { %3230 = vpow2.f32 %v2203_v43 }
 0x7ed   : > { %v3231_v30 = vpop.eup %3230 }
 0x7ee   : > { %v3076_v31 = vadd.f32 -1.0, %v3231_v30 }
 0x7f0   : > { %v2206_v33 = vsel %vm2201_vm14, %v2200_v44, %v3076_v31  ;;  %vm2265_vm14 = vcmp.ne.f32.partialorder %v2264_v53, 0.0 }
 0x7f1   : > { %2207 = vst.msk [vmem:[#allocation2 + $0x8] sm:$0xff] %vm4770_vm0, %v2206_v33  ;;  %vm2214_vm0 = vcmp.eq.s32.totalorder %v2213_v52, 1  ;;  %v2266_v0 = vsel %vm2265_vm14, 1, %v3252_v1  ;;  %vm2229_vm14 = vcmp.ne.f32.partialorder %v2228_v22, 0.0  ;;  %v2581_v22 = vld [vmem:[%s4700_s16 + $0x7] sm:$0x1] }
 0x7f2   : > { %v2267_v7 = vperm.slane %v2266_v0, 0  ;;  %v2230_v59 = vsel %vm2229_vm14, 1, %v3252_v1 }
 0x7f3   : > { %v2231_v21 = vperm.slane %v2230_v59, 0 }
 0x7f8   : > { %v2279_v35 = vld [vmem:[#allocation2 + $0x8] sm:$0xff] }
 0x7f9   : > { %2330 = vrot.lane.b32.xlu1 %v2279_v35, %s4717_s5  ;;  %2306 = vrot.lane.b32.xlu2 %v2279_v35, %s4771_s22  ;;  %v2285_v63 = vsel %vm2284_vm1, %v2279_v35, 0.0  ;;  %vm4775_vm1 = vmmov %vm4774_vm9 }
 0x7fa   : > { %2273 = vrot.lane.b32.xlu0 %v2279_v35, %s4721_s27  ;;  %2286 = vst.msk [vmem:[#allocation3 + $0x40] sm:$0xff] %vm4772_vm15, %v2285_v63  ;;  %vm2313_vm15 = vcmp.ne.f32.partialorder %v2312_v3, 0.0 }
 0x7fb   : > { %v2314_v6 = vsel %vm2313_vm15, 1, %v3252_v1 }
 0x7fc   : > { %v2315_v56 = vperm.slane %v2314_v6, 0 }
 0x801   : > { %2318 = vrot.lane.b32.xlu1 %v2279_v35, %s4723_s24  ;;  %2294 = vrot.lane.b32.xlu2 %v2279_v35, %s4719_s4  ;;  %v2339_v43 = vld [vmem:[#allocation3 + $0x40] sm:$0xff] }
 0x802   : > { %2235 = vrot.lane.b32.xlu0 %v4031_v62, %s3289_s30 }
 0x809   : > { %2255 = vrot.lane.b32.xlu1 %v2279_v35, %s3286_s3  ;;  %2219 = vrot.lane.b32.xlu2 %v2279_v35, %s3285_s0 }
 0x80a   : > { %2385 = vperm.xlu0 %3210, %v2377_v18  }
 0x811   : > { %2237 = vrot.lane.b32.xlu1 %v2279_v35, %s3289_s30  ;;  %2380 = vperm.xlu2 %3208, %v2376_v36  }
 0x812   : > { %2518 = vrot.lane.b32.xlu0 %v4280_v40, %s4721_s27 }
 0x819   : > { %2391 = vperm.xlu1 %3207, %v2376_v36   ;;  %3211 = vset.pattern.permute.xlu2 %v3253_v2  ;;  %v2290_v2 = vsel %vm2289_vm4, 1, %v3252_v1  ;;  %vm2268_vm4 = vcmp.eq.s32.totalorder %v2267_v7, 1 }
 0x81a   : > { %v2291_v45 = vperm.slane %v2290_v2, 0  ;;  %2395 = vperm.xlu2 %3211, %v2377_v18   ;;  %2456 = vrot.lane.b32.xlu0 %v4031_v62, %s3289_s30 }
 0x81c   : > { %vm2292_vm2 = vcmp.eq.s32.totalorder %v2291_v45, 1 }
 0x821   : > { %2514 = vrot.lane.b32.xlu1 %v4031_v62, %s4721_s27 }
 0x822   : > { %3212 = vset.pattern.permute.xlu1 %v3252_v1  ;;  %2485 = vrot.lane.b32.xlu2 %v4031_v62, %s3286_s3 }
 0x829   : > { %2489 = vrot.lane.b32.xlu1 %v4280_v40, %s3286_s3 }
 0x853   : > { %v2307_v41 = vpop.permute.xlu2 %2306 }
 0x854   : > { %v2309_v42 = vsel %vm2304_vm12, %v2307_v41, 0.0  ;;  %vm4776_vm12 = vmmov %vm4775_vm1 }
 0x855   : > { %2310 = vst.msk [vmem:[#allocation3 + $0x60] sm:$0xff] %vm4773_vm11, %v2309_v42  ;;  %vm4777_vm11 = vmmov %vm4775_vm1 }
 0x85b   : > { %v2295_v48 = vpop.permute.xlu2 %2294 }
 0x85c   : > { %v2297_v50 = vsel %vm2292_vm2, %v2295_v48, 0.0  ;;  %vm2316_vm2 = vcmp.eq.s32.totalorder %v2315_v56, 1  ;;  %v2341_v25 = vld [vmem:[#allocation3 + $0x60] sm:$0xff] }
 0x85d   : > { %2298 = vst.msk [vmem:[#allocation3 + $0x50] sm:$0xff] %vm4774_vm9, %v2297_v50  ;;  %vm4778_vm9 = vmmov %vm4775_vm1 }
 0x85e   : > { %vm4780_vm15 = vmmov %vm4778_vm9 }
 0x85f   : > { %vm4782_vm7 = vmmov %vm4778_vm9 }
 0x863   : > { %v2220_v61 = vpop.permute.xlu2 %2219 }
 0x864   : > { %v2222_v47 = vsel %vm2221_vm10, %v2218_v58, %v2220_v61  ;;  %v2340_v44 = vld [vmem:[#allocation3 + $0x50] sm:$0xff] }
 0x865   : > { %v2224_v4 = vsel %vm2214_vm0, %v2222_v47, 0.0  ;;  %vm2257_vm0 = vcmask 23552   ;;  %v2346_v29 = vpack.c.bf16 %v2340_v44, %v2339_v43  ;;  %v2532_v58 = vld [vmem:[%s4700_s16 + $0x4] sm:$0x1] }
 0x866   : > { %2225 = vst.msk [vmem:[#allocation3] sm:$0xff] %vm4775_vm1, %v2224_v4  ;;  %vm2250_vm1 = vcmp.eq.s32.totalorder %v2249_v57, 1 }
 0x86b   : > { %v2331_v9 = vpop.permute.xlu1 %2330  ;;  %v2381_v8 = vpop.permute.xlu2 %2380 }
 0x86c   : > { %v2333_v10 = vsel %vm2328_vm5, %v2331_v9, 0.0  ;;  %v2274_v11 = vpop.permute.xlu0 %2273  ;;  %vm2239_vm5 = vcmask 31744  }
 0x86d   : > { %2334 = vst.msk [vmem:[#allocation3 + $0x80] sm:$0xff] %vm4776_vm12, %v2333_v10  ;;  %v2275_v55 = vsel %vm760_vm8, %v2272_v38, %v2274_v11  ;;  %vm4781_vm12 = vmmov %vm4778_vm9  ;;  %v2335_v36 = vld [vmem:[#allocation3] sm:$0xff] }
 0x86e   : > { %v2277_v15 = vsel %vm2268_vm4, %v2275_v55, 0.0  ;;  %vm2232_vm4 = vcmp.eq.s32.totalorder %v2231_v21, 1 }
 0x86f   : > { %2278 = vst.msk [vmem:[#allocation3 + $0x30] sm:$0xff] %vm4777_vm11, %v2277_v15 }
 0x873   : > { %v2319_v16 = vpop.permute.xlu1 %2318 }
 0x874   : > { %v2321_v14 = vsel %vm2316_vm2, %v2319_v16, 0.0  ;;  %v2343_v19 = vld [vmem:[#allocation3 + $0x80] sm:$0xff]  ;;  %v2236_v30 = vpop.permute.xlu0 %2235  ;;  %v2396_v51 = vpop.permute.xlu2 %2395 }
 0x875   : > { %2322 = vst.msk [vmem:[#allocation3 + $0x70] sm:$0xff] %vm4778_vm9, %v2321_v14  ;;  %v2348_v20 = vpack.c.bf16 %v2343_v19, %v2343_v19 }
 0x876   : > { %v2338_v35 = vld [vmem:[#allocation3 + $0x30] sm:$0xff] }
 0x877   : > { %v2360_v12 = vsel %vm4779_vm3, %v2348_v20, 0  ;;  %vm4785_vm3 = vmmov %vm4782_vm7 }
 0x878   : > { %2365 = vmatpush.bf16.msra.mxu3 %v2360_v12  ;;  %vm4786_vm14 = vmmov %vm4785_vm3 }
 0x87b   : > { %v2256_v23 = vpop.permute.xlu1 %2255 }
 0x87c   : > { %v2258_v24 = vsel %vm2257_vm0, %v2254_v60, %v2256_v23  ;;  %v2342_v26 = vld [vmem:[#allocation3 + $0x70] sm:$0xff]  ;;  %v2386_v48 = vpop.permute.xlu0 %2385 }
 0x87d   : > { %v2260_v27 = vsel %vm2250_vm1, %v2258_v24, 0.0  ;;  %v2347_v28 = vpack.c.bf16 %v2342_v26, %v2341_v25  ;;  %vm4787_vm1 = vmmov %vm4785_vm3  ;;  %v2562_v26 = vld [vmem:[%s4700_s16 + $0x6] sm:$0x1] }
 0x87e   : > { %2261 = vst.msk [vmem:[#allocation3 + $0x20] sm:$0xff] %vm4780_vm15, %v2260_v27  ;;  %vm2544_vm15 = vcmp.ne.f32.partialorder %v2543_v13, 0.0 }
 0x87f   : > { %2366 = vmatpush.bf16.msra.mxu3 %v2347_v28  ;;  %v2545_v15 = vsel %vm2544_vm15, 1, %v3252_v1 }
 0x880   : > { %v2546_v16 = vperm.slane %v2545_v15, 0 }
 0x883   : > { %2367 = vmatpush.bf16.msra.mxu3 %v2346_v29  ;;  %v2238_v31 = vpop.permute.xlu1 %2237 }
 0x884   : > { %v2240_v32 = vsel %vm2239_vm5, %v2236_v30, %v2238_v31  ;;  %v4346_v23 = vpop.permute.xlu0 %2518 }
 0x885   : > { %v2242_v33 = vsel %vm2232_vm4, %v2240_v32, 0.0  ;;  %v2337_v34 = vld [vmem:[#allocation3 + $0x20] sm:$0xff]  ;;  %vm2506_vm4 = vcmp.ne.f32.partialorder %v2505_v17, 0.0 }
 0x886   : > { %2243 = vst.msk [vmem:[#allocation3 + $0x10] sm:$0xff] %vm4781_vm12, %v2242_v33  ;;  %v2345_v63 = vpack.c.bf16 %v2338_v35, %v2337_v34  ;;  %vm4335_vm12 = vcmp.eq.s32.totalorder %v2546_v16, 1  ;;  %v2507_v19 = vsel %vm2506_vm4, 1, %v3252_v1  ;;  %v2447_v34 = vld [vmem:[%s4700_s16 + $0x1] sm:$0x1]  ;;  %v2688_v17 = vld [vmem:[#allocation2] sm:$0xff] }
 0x887   : > { %v2508_v12 = vperm.slane %v2507_v19, 0  ;;  %v2476_v35 = vld [vmem:[%s4700_s16 + $0x2] sm:$0x1] }
 0x888   : > { %2368 = vmatpush.bf16.msra.mxu3 %v2345_v63  ;;  %vm2477_vm15 = vcmp.ne.f32.partialorder %v2476_v35, 0.0 }
 0x88b   : > { %v2392_v42 = vpop.permute.xlu1 %2391 }
 0x88c   : > { %v2457_v43 = vpop.permute.xlu0 %2456 }
 0x88d   : > { %v2336_v37 = vld [vmem:[#allocation3 + $0x10] sm:$0xff] }
 0x88e   : > { %v2344_v38 = vpack.c.bf16 %v2336_v37, %v2335_v36 }
 0x890   : > { %2369 = vmatpush.bf16.msra.mxu3 %v2344_v38 }
 0x893   : > { %3081 = vmatmul.msk.bf16.vlgmr.msra.gmra.mxu3 %vm2038_vm13, %v3109_v39  ;;  %vm2533_vm13 = vcmp.ne.f32.partialorder %v2532_v58, 0.0  ;;  %v2515_v57 = vpop.permute.xlu1 %2514  ;;  %v2478_v39 = vsel %vm2477_vm15, 1, %v3252_v1 }
 0x894   : > { %v2534_v0 = vsel %vm2533_vm13, 1, %v3252_v1  ;;  %vm4791_vm13 = vmmov %vm4787_vm1 }
 0x895   : > { %v2535_v4 = vperm.slane %v2534_v0, 0 }
 0x897   : > { %vm4293_vm2 = vcmp.eq.s32.totalorder %v2535_v4, 1 }
 0x89b   : > { %v2490_v21 = vpop.permute.xlu1 %2489 }
 0x916   : > { %v2371_v2 = vpop.f32.mrf.mxu3 }
 0x917   : > { %v2388_v41 = vmul.f32 %v2381_v8, %v2371_v2 }
 0x919   : > { %v2398_v45 = vadd.f32 %v2392_v42, %v2388_v41 }
 0x91b   : > { %v2402_v46 = vmin.f32 %v2398_v45, 0.0  ;;  %vm2400_vm11 = vcmp.gt.f32.partialorder %v2398_v45, 0.0 }
 0x91d   : > { %v2404_v49 = vmul.f32 1.442695, %v2402_v46  ;;  %v3110_v46 = vld [vmem:[%s4696_s12 + $0x4] sm:$0xf] }
 0x91e   : > { %v2373_v50 = vpop.f32.mrf.mxu3 }
 0x91f   : > { %3232 = vpow2.f32 %v2404_v49  ;;  %v2389_v52 = vmul.f32 %v2386_v48, %v2373_v50  ;;  %v3088_v48 = vld [vmem:[%s4696_s12 + $0x8] sm:$0xf0] }
 0x921   : > { %v2399_v53 = vadd.f32 %v2396_v51, %v2389_v52 }
 0x923   : > { %v2403_v60 = vmin.f32 %v2399_v53, 0.0  ;;  %vm2401_vm9 = vcmp.gt.f32.partialorder %v2399_v53, 0.0 }
 0x925   : > { %v3233_v54 = vpop.eup %3232  ;;  %v2406_v61 = vmul.f32 1.442695, %v2403_v60 }
 0x926   : > { %v3082_v47 = vadd.f32 -1.0, %v3233_v54 }
 0x927   : > { %3234 = vpow2.f32 %v2406_v61 }
 0x928   : > { %v2410_v3 = vsel %vm2400_vm11, %v2398_v45, %v3082_v47  ;;  %vm2582_vm11 = vcmp.ne.f32.partialorder %v2581_v22, 0.0  ;;  %v2479_v45 = vperm.slane %v2478_v39, 0 }
 0x929   : > { %2412 = vst.msk [vmem:[#allocation2 + $0x8] sm:$0xff] %vm4782_vm7, %v2410_v3  ;;  %vm4348_vm7 = vcmp.eq.s32.totalorder %v2508_v12, 1  ;;  %v2583_v24 = vsel %vm2582_vm11, 1, %v3252_v1  ;;  %v2600_v3 = vld [vmem:[%s4700_s16 + $0x8] sm:$0x1] }
 0x92a   : > { %v2584_v44 = vperm.slane %v2583_v24, 0  ;;  %vm2601_vm15 = vcmp.ne.f32.partialorder %v2600_v3, 0.0 }
 0x92b   : > { %v2602_v6 = vsel %vm2601_vm15, 1, %v3252_v1 }
 0x92d   : > { %v3235_v5 = vpop.eup %3234 }
 0x92e   : > { %v3083_v7 = vadd.f32 -1.0, %v3235_v5 }
 0x930   : > { %v2411_v9 = vsel %vm2401_vm9, %v2399_v53, %v3083_v7  ;;  %v2579_v10 = vld [vmem:[#allocation2 + $0x8] sm:$0xff]  ;;  %vm2563_vm9 = vcmp.ne.f32.partialorder %v2562_v26, 0.0 }
 0x931   : > { %2413 = vst.msk [vmem:[#allocation2 + $0x28] sm:$0xff] %vm4785_vm3, %v2411_v9  ;;  %2588 = vrot.lane.b32.xlu1 %v2579_v10, %s4723_s24  ;;  %2569 = vrot.lane.b32.xlu0 %v2579_v10, %s4771_s22  ;;  %v2537_v11 = vsel %vm4293_vm2, %v2579_v10, 0.0  ;;  %vm4360_vm3 = vcmp.eq.s32.totalorder %v2584_v44, 1  ;;  %v2564_v30 = vsel %vm2563_vm9, 1, %v3252_v1  ;;  %vm4392_vm9 = vcmp.eq.s32.totalorder %v2479_v45, 1 }
 0x932   : > { %2550 = vrot.lane.b32.xlu2 %v2579_v10, %s4719_s4  ;;  %2539 = vst.msk [vmem:[#allocation3 + $0x80] sm:$0xff] %vm4786_vm14, %v2537_v11  ;;  %v2565_v33 = vperm.slane %v2564_v30, 0  ;;  %vm4797_vm14 = vmmov %vm4787_vm1 }
 0x934   : > { %vm4374_vm4 = vcmp.eq.s32.totalorder %v2565_v33, 1 }
 0x938   : > { %v2580_v55 = vld [vmem:[#allocation2 + $0x28] sm:$0xff] }
 0x939   : > { %2487 = vrot.lane.b32.xlu0 %v2579_v10, %s3286_s3  ;;  %2458 = vrot.lane.b32.xlu1 %v2579_v10, %s3289_s30  ;;  %v2538_v56 = vsel %vm4293_vm2, %v2580_v55, 0.0  ;;  %vm4794_vm2 = vmmov %vm4787_vm1  ;;  %v2625_v29 = vld [vmem:[#allocation3 + $0x80] sm:$0xff] }
 0x93a   : > { %2516 = vrot.lane.b32.xlu2 %v2579_v10, %s4721_s27  ;;  %2540 = vst.msk [vmem:[#allocation3 + $0x90] sm:$0xff] %vm4787_vm1, %v2538_v56  ;;  %vm2448_vm1 = vcmp.ne.f32.partialorder %v2447_v34, 0.0  ;;  %vm4801_vm11 = vmmov %vm4794_vm2  ;;  %v2603_v56 = vperm.slane %v2602_v6, 0 }
 0x93b   : > { %v2449_v38 = vsel %vm2448_vm1, 1, %v3252_v1 }
 0x93c   : > { %v2450_v42 = vperm.slane %v2449_v38, 0 }
 0x941   : > { %2571 = vrot.lane.b32.xlu1 %v2580_v55, %s4771_s22  ;;  %2552 = vrot.lane.b32.xlu0 %v2580_v55, %s4719_s4  ;;  %v2626_v59 = vld [vmem:[#allocation3 + $0x90] sm:$0xff]  ;;  %s4823_s4 = smov 124  }
 0x942   : > { %2590 = vrot.lane.b32.xlu2 %v2580_v55, %s4723_s24  ;;  %s4825_s24 = smov 127  }
 0x949   : > { %2431 = vrot.lane.b32.xlu0 %v4280_v40, %s3285_s0  ;;  %2520 = vrot.lane.b32.xlu1 %v2580_v55, %s4721_s27 }
 0x94a   : > { %2460 = vrot.lane.b32.xlu2 %v4280_v40, %s3289_s30 }
 0x951   : > { %2427 = vrot.lane.b32.xlu1 %v4031_v62, %s3285_s0  ;;  %2462 = vrot.lane.b32.xlu0 %v2580_v55, %s3289_s30  ;;  %v2486_v62 = vpop.permute.xlu2 %2485 }
 0x952   : > { %2491 = vrot.lane.b32.xlu2 %v2580_v55, %s3286_s3 }
 0x959   : > { %2609 = vrot.lane.b32.xlu0 %v2580_v55, %s4788_s1  ;;  %2433 = vrot.lane.b32.xlu1 %v2580_v55, %s3285_s0  ;;  %v2418_v55 = vld [vmem:[%s4700_s16] sm:$0x1] }
 0x95a   : > { %2429 = vrot.lane.b32.xlu2 %v2579_v10, %s3285_s0 }
 0x961   : > { %2705 = vrot.lane.b32.xlu0 %v4280_v40, %s3285_s0  ;;  %2701 = vrot.lane.b32.xlu1 %v2688_v17, %s3285_s0 }
 0x962   : > { %2607 = vrot.lane.b32.xlu2 %v2579_v10, %s4788_s1 }
 0x969   : > { %2743 = vrot.lane.b32.xlu0 %v2688_v17, %s3286_s3  ;;  %2726 = vrot.lane.b32.xlu1 %v4280_v40, %s3289_s30 }
 0x96a   : > { %2722 = vrot.lane.b32.xlu2 %v2688_v17, %s3289_s30 }
 0x971   : > { %2768 = vrot.lane.b32.xlu0 %v4280_v40, %s4721_s27  ;;  %2764 = vrot.lane.b32.xlu1 %v2688_v17, %s4721_s27  ;;  %s4824_s27 = smov 1   ;;  %v2692_v17 = vld [vmem:[%s4700_s16] sm:$0x1] }
 0x972   : > { %2747 = vrot.lane.b32.xlu2 %v4280_v40, %s3286_s3 }
 0x98c   : > { %v2551_v14 = vpop.permute.xlu2 %2550 }
 0x98d   : > { %v2556_v20 = vsel %vm4335_vm12, %v2551_v14, 0.0 }
 0x98e   : > { %2558 = vst.msk [vmem:[#allocation3 + $0xa0] sm:$0xff] %vm4791_vm13, %v2556_v20  ;;  %vm4800_vm13 = vmmov %vm4794_vm2 }
 0x994   : > { %v2517_v25 = vpop.permute.xlu2 %2516 }
 0x995   : > { %v2522_v27 = vsel %vm760_vm8, %v2515_v57, %v2517_v25  ;;  %v2627_v25 = vld [vmem:[#allocation3 + $0xa0] sm:$0xff] }
 0x996   : > { %v2526_v28 = vsel %vm4348_vm7, %v2522_v27, 0.0  ;;  %v3291_v27 = vmov 8  }
 0x997   : > { %2528 = vst.msk [vmem:[#allocation3 + $0x60] sm:$0xff] %vm4794_vm2, %v2526_v28  ;;  %vm4388_vm2 = vcmp.eq.s32.totalorder %v2450_v42, 1  ;;  %3214 = vset.pattern.permute.xlu2 %v3291_v27 }
 0x99c   : > { %v2591_v31 = vpop.permute.xlu2 %2590 }
 0x99d   : > { %v2595_v32 = vsel %vm4360_vm3, %v2591_v31, 0.0 }
 0x99e   : > { %2597 = vst.msk [vmem:[#allocation3 + $0xf0] sm:$0xff] %vm4797_vm14, %v2595_v32  ;;  %v2639_v32 = vpack.c.bf16 %v2626_v59, %v2625_v29  ;;  %v2623_v34 = vld [vmem:[#allocation3 + $0x60] sm:$0xff] }
 0x9a3   : > { %v2589_v36 = vpop.permute.xlu1 %2588  ;;  %v2570_v37 = vpop.permute.xlu0 %2569 }
 0x9a4   : > { %v2594_v8 = vsel %vm4360_vm3, %v2589_v36, 0.0  ;;  %v4382_v2 = vpop.permute.xlu2 %2460  ;;  %v2575_v41 = vsel %vm4374_vm4, %v2570_v37, 0.0  ;;  %vm4806_vm3 = vmmov %vm4801_vm11 }
 0x9a5   : > { %2596 = vst.msk [vmem:[#allocation3 + $0xe0] sm:$0xff] %vm4800_vm13, %v2594_v8  ;;  %v2632_v60 = vld [vmem:[#allocation3 + $0xf0] sm:$0xff]  ;;  %vm4807_vm14 = vmmov %vm4806_vm3 }
 0x9a6   : > { %2577 = vst.msk [vmem:[#allocation3 + $0xc0] sm:$0xff] %vm4801_vm11, %v2575_v41  ;;  %vm4808_vm1 = vmmov %vm4806_vm3 }
 0x9a7   : > { %vm4809_vm13 = vmmov %vm4808_vm1 }
 0x9a8   : > { %vm4810_vm11 = vmmov %vm4808_vm1 }
 0x9a9   : > { %vm4819_vm15 = vmmov %vm4808_vm1 }
 0x9ab   : > { %v2459_v49 = vpop.permute.xlu1 %2458  ;;  %v2488_v50 = vpop.permute.xlu0 %2487 }
 0x9ac   : > { %v2464_v51 = vsel %vm2239_vm5, %v2457_v43, %v2459_v49  ;;  %v2492_v52 = vpop.permute.xlu2 %2491  ;;  %v2493_v53 = vsel %vm2257_vm0, %v2486_v62, %v2488_v50  ;;  %v2631_v58 = vld [vmem:[#allocation3 + $0xe0] sm:$0xff]  ;;  %v3086_v49 = vld [vmem:[%s4696_s12] sm:$0xf] }
 0x9ad   : > { %v2468_v54 = vsel %vm4388_vm2, %v2464_v51, 0.0  ;;  %v2494_v61 = vsel %vm2257_vm0, %v2490_v21, %v2492_v52  ;;  %v2497_v47 = vsel %vm4392_vm9, %v2493_v53, 0.0  ;;  %v2642_v0 = vpack.c.bf16 %v2632_v60, %v2631_v58  ;;  %v2629_v19 = vld [vmem:[#allocation3 + $0xc0] sm:$0xff]  ;;  %v3111_v52 = vld [vmem:[%s4696_s12 + $0x4] sm:$0xf0] }
 0x9ae   : > { %2470 = vst.msk [vmem:[#allocation3 + $0x20] sm:$0xff] %vm4806_vm3, %v2468_v54  ;;  %v2498_v4 = vsel %vm4392_vm9, %v2494_v61, 0.0  ;;  %vm2419_vm9 = vcmp.ne.f32.partialorder %v2418_v55, 0.0  ;;  %vm4421_vm3 = vcmp.eq.s32.totalorder %v2603_v56, 1  ;;  %v3091_v61 = vor.u32 %v3110_v46, %v3088_v48  ;;  %v2825_v48 = vld [vmem:[%s4700_s16 + $0x8] sm:$0x1] }
 0x9af   : > { %2500 = vst.msk [vmem:[#allocation3 + $0x50] sm:$0xff] %vm4807_vm14, %v2498_v4  ;;  %2658 = vmatpush.bf16.msrb.mxu0 %v2642_v0  ;;  %v2420_v16 = vsel %vm2419_vm9, 1, %v3252_v1  ;;  %vm4822_vm9 = vmmov %vm4808_vm1 }
 0x9b0   : > { %2499 = vst.msk [vmem:[#allocation3 + $0x40] sm:$0xff] %vm4808_vm1, %v2497_v47  ;;  %v2421_v24 = vperm.slane %v2420_v16, 0  ;;  %v3087_v47 = vor.u32 %v3111_v52, %v3086_v49 }
 0x9b2   : > { %vm4437_vm14 = vcmp.eq.s32.totalorder %v2421_v24, 1  ;;  %v2780_v24 = vld [vmem:[%s4700_s16 + $0x5] sm:$0x1] }
 0x9b3   : > { %v2572_v5 = vpop.permute.xlu1 %2571  ;;  %v2553_v7 = vpop.permute.xlu0 %2552 }
 0x9b4   : > { %v2576_v9 = vsel %vm4374_vm4, %v2572_v5, 0.0  ;;  %v2430_v10 = vpop.permute.xlu2 %2429  ;;  %v2557_v11 = vsel %vm4335_vm12, %v2553_v7, 0.0  ;;  %vm4813_vm12 = vmmov %vm4808_vm1 }
 0x9b5   : > { %2578 = vst.msk [vmem:[#allocation3 + $0xd0] sm:$0xff] %vm4809_vm13, %v2576_v9  ;;  %vm4814_vm4 = vmmov %vm4808_vm1  ;;  %v2619_v42 = vld [vmem:[#allocation3 + $0x20] sm:$0xff] }
 0x9b6   : > { %2559 = vst.msk [vmem:[#allocation3 + $0xb0] sm:$0xff] %vm4810_vm11, %v2557_v11  ;;  %v2622_v36 = vld [vmem:[#allocation3 + $0x50] sm:$0xff]  ;;  %vm4820_vm13 = vmmov %vm4808_vm1 }
 0x9b7   : > { %v2621_v63 = vld [vmem:[#allocation3 + $0x40] sm:$0xff]  ;;  %vm4821_vm11 = vmmov %vm4808_vm1 }
 0x9bb   : > { %v2521_v62 = vpop.permute.xlu1 %2520  ;;  %v2432_v15 = vpop.permute.xlu0 %2431 }
 0x9bc   : > { %v2523_v18 = vsel %vm760_vm8, %v4346_v23, %v2521_v62  ;;  %v2608_v14 = vpop.permute.xlu2 %2607  ;;  %v2630_v20 = vld [vmem:[#allocation3 + $0xd0] sm:$0xff] }
 0x9bd   : > { %v2527_v22 = vsel %vm4348_vm7, %v2523_v18, 0.0  ;;  %v2613_v57 = vsel %vm4421_vm3, %v2608_v14, 0.0  ;;  %v2641_v12 = vpack.c.bf16 %v2630_v20, %v2629_v19  ;;  %v2628_v23 = vld [vmem:[#allocation3 + $0xb0] sm:$0xff]  ;;  %vm4817_vm7 = vmmov %vm4808_vm1 }
 0x9be   : > { %2529 = vst.msk [vmem:[#allocation3 + $0x70] sm:$0xff] %vm4813_vm12, %v2527_v22  ;;  %v2640_v26 = vpack.c.bf16 %v2628_v23, %v2627_v25  ;;  %v2717_v14 = vld [vmem:[%s4700_s16 + $0x1] sm:$0x1]  ;;  %v2738_v20 = vld [vmem:[%s4700_s16 + $0x2] sm:$0x1] }
 0x9bf   : > { %2615 = vst.msk [vmem:[#allocation3 + $0x100] sm:$0xff] %vm4814_vm4, %v2613_v57  ;;  %2659 = vmatpush.bf16.msrb.mxu0 %v2641_v12  ;;  %v2759_v22 = vld [vmem:[%s4700_s16 + $0x3] sm:$0x1]  ;;  %vm2718_vm12 = vcmp.ne.f32.partialorder %v2717_v14, 0.0  ;;  %vm2739_vm4 = vcmp.ne.f32.partialorder %v2738_v20, 0.0 }
 0x9c0   : > { %v2719_v25 = vsel %vm2718_vm12, 1, %v3252_v1  ;;  %vm2826_vm12 = vcmp.ne.f32.partialorder %v2825_v48, 0.0 }
 0x9c3   : > { %v2428_v28 = vpop.permute.xlu1 %2427  ;;  %2660 = vmatpush.bf16.msrb.mxu0 %v2640_v26  ;;  %v2463_v44 = vpop.permute.xlu0 %2462  ;;  %v3290_v26 = vmov 2  }
 0x9c4   : > { %v2435_v21 = vsel %vm2221_vm10, %v2428_v28, %v2430_v10  ;;  %v2465_v43 = vsel %vm2239_vm5, %v4382_v2, %v2463_v44  ;;  %v2637_v2 = vpack.c.bf16 %v2622_v36, %v2621_v63  ;;  %v2723_v11 = vpop.permute.xlu2 %2722  ;;  %3213 = vset.pattern.permute.xlu0 %v3290_v26  ;;  %v2740_v28 = vsel %vm2739_vm4, 1, %v3252_v1  ;;  %v2795_v44 = vld [vmem:[%s4700_s16 + $0x6] sm:$0x1] }
 0x9c5   : > { %v2439_v30 = vsel %vm4437_vm14, %v2435_v21, 0.0  ;;  %v2469_v31 = vsel %vm4388_vm2, %v2465_v43, 0.0  ;;  %v2624_v33 = vld [vmem:[#allocation3 + $0x70] sm:$0xff]  ;;  %vm4818_vm2 = vmmov %vm4808_vm1 }
 0x9c6   : > { %2441 = vst.msk [vmem:[#allocation3] sm:$0xff] %vm4817_vm7, %v2439_v30  ;;  %v2638_v35 = vpack.c.bf16 %v2624_v33, %v2623_v34  ;;  %v2633_v50 = vld [vmem:[#allocation3 + $0x100] sm:$0xff]  ;;  %vm2781_vm7 = vcmp.ne.f32.partialorder %v2780_v24, 0.0  ;;  %v2720_v30 = vperm.slane %v2719_v25, 0 }
 0x9c7   : > { %2471 = vst.msk [vmem:[#allocation3 + $0x30] sm:$0xff] %vm4808_vm1, %v2469_v31  ;;  %2661 = vmatpush.bf16.msrb.mxu0 %v2639_v32  ;;  %v2782_v31 = vsel %vm2781_vm7, 1, %v3252_v1  ;;  %v2741_v32 = vperm.slane %v2740_v28, 0 }
 0x9c8   : > { %v2783_v63 = vperm.slane %v2782_v31, 0 }
 0x9cb   : > { %v2434_v37 = vpop.permute.xlu1 %2433  ;;  %2662 = vmatpush.bf16.msrb.mxu0 %v2638_v35  ;;  %v2610_v38 = vpop.permute.xlu0 %2609 }
 0x9cc   : > { %v2436_v39 = vsel %vm2221_vm10, %v2432_v15, %v2434_v37  ;;  %v2614_v8 = vsel %vm4421_vm3, %v2610_v38, 0.0  ;;  %v4501_v55 = vpop.permute.xlu2 %2747  ;;  %vm2693_vm3 = vcmp.ne.f32.partialorder %v2692_v17, 0.0 }
 0x9cd   : > { %v2440_v40 = vsel %vm4437_vm14, %v2436_v39, 0.0  ;;  %2616 = vst.msk [vmem:[#allocation3 + $0x110] sm:$0xff] %vm4818_vm2, %v2614_v8  ;;  %v2617_v58 = vld [vmem:[#allocation3] sm:$0xff]  ;;  %v2694_v19 = vsel %vm2693_vm3, 1, %v3252_v1  ;;  %vm2760_vm14 = vcmp.ne.f32.partialorder %v2759_v22, 0.0  ;;  %vm2796_vm2 = vcmp.ne.f32.partialorder %v2795_v44, 0.0 }
 0x9ce   : > { %2442 = vst.msk [vmem:[#allocation3 + $0x10] sm:$0xff] %vm4819_vm15, %v2440_v40  ;;  %v2620_v41 = vld [vmem:[#allocation3 + $0x30] sm:$0xff]  ;;  %v2695_v12 = vperm.slane %v2694_v19, 0  ;;  %v2761_v29 = vsel %vm2760_vm14, 1, %v3252_v1  ;;  %vm4541_vm15 = vcmp.eq.s32.totalorder %v2720_v30, 1  ;;  %v2797_v38 = vsel %vm2796_vm2, 1, %v3252_v1 }
 0x9cf   : > { %2663 = vmatpush.bf16.msrb.mxu0 %v2637_v2  ;;  %v2636_v45 = vpack.c.bf16 %v2620_v41, %v2619_v42  ;;  %v2762_v34 = vperm.slane %v2761_v29, 0  ;;  %v2810_v39 = vld [vmem:[%s4700_s16 + $0x7] sm:$0x1]  ;;  %vm4568_vm3 = vcmp.eq.s32.totalorder %v2783_v63, 1 }
 0x9d0   : > { %vm4532_vm1 = vcmp.eq.s32.totalorder %v2695_v12, 1 }
 0x9d3   : > { %2664 = vmatpush.bf16.msrb.mxu0 %v2636_v45  ;;  %v4503_v56 = vpop.permute.xlu0 %2705  ;;  %v2702_v13 = vpop.permute.xlu1 %2701 }
 0x9d4   : > { %v2634_v51 = vld [vmem:[#allocation3 + $0x110] sm:$0xff] }
 0x9d5   : > { %v2643_v53 = vpack.c.bf16 %v2634_v51, %v2633_v50  ;;  %v2618_v60 = vld [vmem:[#allocation3 + $0x10] sm:$0xff]  ;;  %v2798_v51 = vperm.slane %v2797_v38, 0 }
 0x9d6   : > { %v2635_v54 = vpack.c.bf16 %v2618_v60, %v2617_v58 }
 0x9d7   : > { %2679 = vmatpush.bf16.msra.mxu1 %v2643_v53  ;;  %vm4575_vm4 = vcmp.eq.s32.totalorder %v2798_v51, 1  ;;  %v3096_v53 = vld [vmem:[%s4703_s19 + $0x38] sm:$0xff] }
 0x9d8   : > { %2665 = vmatpush.bf16.msrb.mxu0 %v2635_v54 }
 0x9da   : > { %3092 = vmatmul.msk.bf16.vlgmr.msra.gmra.mxu1 %vm4820_vm13, %v3091_v61  ;;  %vm4550_vm13 = vcmp.eq.s32.totalorder %v2741_v32, 1  ;;  %v2843_v61 = vld [vmem:[%s4703_s19 + $0x18] sm:$0xff] }
 0x9db   : > { %2666 = vmatmul.bf16.vlgmr.msrb.gmra.mxu0 %v3087_v47  ;;  %v2744_v15 = vpop.permute.xlu0 %2743  ;;  %v4505_v16 = vpop.permute.xlu1 %2726 }
 0x9e3   : > { %v4520_v57 = vpop.permute.xlu0 %2768  ;;  %v2765_v23 = vpop.permute.xlu1 %2764 }
 0xa57   : > { %v2681_v0 = vpop.f32.mrf.mxu1 }
 0xa58   : > { %v2667_v3 = vpop.f32.mrf.mxu0 }
 0xa59   : > { %v4477_v4 = vadd.f32 %v2681_v0, %v2667_v3 }
 0xa5b   : > { %2686 = vst.msk [vmem:[#allocation2 + $0x8] sm:$0xff] %vm4821_vm11, %v4477_v4  ;;  %vm4556_vm11 = vcmp.eq.s32.totalorder %v2762_v34, 1  ;;  %v3292_v34 = vmov 10  }
 0xa5f   : > { %v2683_v5 = vpop.f32.mrf.mxu1 }
 0xa60   : > { %v2669_v7 = vpop.f32.mrf.mxu0 }
 0xa61   : > { %v4481_v6 = vadd.f32 %v2683_v5, %v2669_v7  ;;  %v2827_v5 = vsel %vm2826_vm12, 1, %v3252_v1 }
 0xa62   : > { %v2689_v9 = vld [vmem:[#allocation2 + $0x8] sm:$0xff] }
 0xa63   : > { %2687 = vst.msk [vmem:[#allocation2 + $0x28] sm:$0xff] %vm4822_vm9, %v4481_v6  ;;  %2745 = vrot.lane.b32.xlu1 %v2689_v9, %s3286_s3  ;;  %2724 = vrot.lane.b32.xlu0 %v2689_v9, %s3289_s30  ;;  %vm2811_vm9 = vcmp.ne.f32.partialorder %v2810_v39, 0.0 }
 0xa64   : > { %2703 = vrot.lane.b32.xlu2 %v2689_v9, %s3285_s0  ;;  %v2812_v54 = vsel %vm2811_vm9, 1, %v3252_v1 }
 0xa6a   : > { %v2691_v10 = vld [vmem:[#allocation2 + $0x28] sm:$0xff] }
 0xa6b   : > { %2800 = vrot.lane.b32.xlu1 %v2689_v9, %s4771_s22  ;;  %2815 = vrot.lane.b32.xlu0 %v2689_v9, %s4823_s4 }
 0xa6c   : > { %2766 = vrot.lane.b32.xlu2 %v2689_v9, %s4824_s27 }
 0xa73   : > { %2707 = vrot.lane.b32.xlu1 %v2691_v10, %s3285_s0  ;;  %2749 = vrot.lane.b32.xlu0 %v2691_v10, %s3286_s3  ;;  %s649_s0 = scalar_lea.vmem %s4705_s21, %s4843_s25 }
 0xa74   : > { %2785 = vrot.lane.b32.xlu2 %v2689_v9, %s4825_s24 }
 0xa7b   : > { %2770 = vrot.lane.b32.xlu1 %v2691_v10, %s4824_s27  ;;  %2787 = vrot.lane.b32.xlu0 %v2691_v10, %s4825_s24 }
 0xa7c   : > { %2728 = vrot.lane.b32.xlu2 %v2691_v10, %s3289_s30 }
 0xa83   : > { %2817 = vrot.lane.b32.xlu1 %v2691_v10, %s4823_s4  ;;  %2832 = vrot.lane.b32.xlu0 %v2691_v10, %s4788_s1 }
 0xa84   : > { %2802 = vrot.lane.b32.xlu2 %v2691_v10, %s4771_s22  ;;  %v2813_v10 = vperm.slane %v2812_v54, 0  ;;  %v2842_v54 = vld [vmem:[%s4703_s19 + $0x10] sm:$0xff] }
 0xa86   : > { %vm4584_vm14 = vcmp.eq.s32.totalorder %v2813_v10, 1 }
 0xa8c   : > { %2830 = vrot.lane.b32.xlu2 %v2689_v9, %s4788_s1 }
 0xabe   : > { %v2704_v62 = vpop.permute.xlu2 %2703 }
 0xabf   : > { %v2709_v43 = vsel %vm2221_vm10, %v2702_v13, %v2704_v62  ;;  %v2828_v13 = vperm.slane %v2827_v5, 0 }
 0xac0   : > { %v2713_v33 = vsel %vm4532_vm1, %v2709_v43, -1e+30 }
 0xac1   : > { %v2715_v8 = vmax.f32 %v4477_v4, %v2713_v33  ;;  %vm4588_vm7 = vcmp.eq.s32.totalorder %v2828_v13, 1  ;;  %v3099_v13 = vld [vmem:[%s4703_s19 + $0x50] sm:$0xff] }
 0xac6   : > { %v2767_v18 = vpop.permute.xlu2 %2766 }
 0xac7   : > { %v2772_v49 = vsel %vm760_vm8, %v2765_v23, %v2767_v18 }
 0xac8   : > { %v2776_v60 = vsel %vm4556_vm11, %v2772_v49, -1e+30 }
 0xace   : > { %v2786_v59 = vpop.permute.xlu2 %2785 }
 0xacf   : > { %v2791_v0 = vsel %vm4568_vm3, %v2786_v59, -1e+30 }
 0xad5   : > { %v2746_v36 = vpop.permute.xlu1 %2745  ;;  %v2725_v37 = vpop.permute.xlu0 %2724 }
 0xad6   : > { %v2751_v2 = vsel %vm2257_vm0, %v2744_v15, %v2746_v36  ;;  %v2729_v41 = vpop.permute.xlu2 %2728  ;;  %v2730_v42 = vsel %vm2239_vm5, %v2723_v11, %v2725_v37 }
 0xad7   : > { %v2734_v46 = vsel %vm4541_vm15, %v2730_v42, -1e+30  ;;  %v2755_v52 = vsel %vm4550_vm13, %v2751_v2, -1e+30  ;;  %v2731_v20 = vsel %vm2239_vm5, %v4505_v16, %v2729_v41  ;;  %v2840_v2 = vld [vmem:[%s4703_s19] sm:$0xff]  ;;  %v2841_v41 = vld [vmem:[%s4703_s19 + $0x8] sm:$0xff] }
 0xad8   : > { %v2736_v50 = vmax.f32 %v2715_v8, %v2734_v46  ;;  %v2735_v44 = vsel %vm4541_vm15, %v2731_v20, -1e+30  ;;  %v3093_v42 = vld [vmem:[%s4703_s19 + $0x20] sm:$0xff] }
 0xada   : > { %v2757_v58 = vmax.f32 %v2736_v50, %v2755_v52  ;;  %v3095_v52 = vld [vmem:[%s4703_s19 + $0x30] sm:$0xff] }
 0xadc   : > { %v2778_v47 = vmax.f32 %v2757_v58, %v2776_v60  ;;  %v3097_v58 = vld [vmem:[%s4703_s19 + $0x40] sm:$0xff]  ;;  %v3098_v60 = vld [vmem:[%s4703_s19 + $0x48] sm:$0xff] }
 0xadd   : > { %v2801_v3 = vpop.permute.xlu1 %2800  ;;  %v2816_v4 = vpop.permute.xlu0 %2815 }
 0xade   : > { %v2793_v7 = vmax.f32 %v2778_v47, %v2791_v0  ;;  %v2803_v9 = vpop.permute.xlu2 %2802  ;;  %v2806_v11 = vsel %vm4575_vm4, %v2801_v3, -1e+30  ;;  %v2821_v18 = vsel %vm4584_vm14, %v2816_v4, -1e+30  ;;  %v3101_v3 = vld [vmem:[%s4703_s19 + $0x60] sm:$0xff]  ;;  %v3102_v4 = vld [vmem:[%s4703_s19 + $0x68] sm:$0xff] }
 0xadf   : > { %v2807_v35 = vsel %vm4575_vm4, %v2803_v9, -1e+30 }
 0xae0   : > { %v2808_v62 = vmax.f32 %v2793_v7, %v2806_v11 }
 0xae2   : > { %v2823_v22 = vmax.f32 %v2808_v62, %v2821_v18  ;;  %v3100_v62 = vld [vmem:[%s4703_s19 + $0x58] sm:$0xff] }
 0xae5   : > { %v2708_v14 = vpop.permute.xlu1 %2707  ;;  %v2750_v19 = vpop.permute.xlu0 %2749 }
 0xae6   : > { %v2710_v12 = vsel %vm2221_vm10, %v4503_v56, %v2708_v14  ;;  %v2831_v24 = vpop.permute.xlu2 %2830  ;;  %v2752_v16 = vsel %vm2257_vm0, %v4501_v55, %v2750_v19  ;;  %vm2969_vm0 = vcmask 0  }
 0xae7   : > { %v2714_v23 = vsel %vm4532_vm1, %v2710_v12, -1e+30  ;;  %v2836_v25 = vsel %vm4588_vm7, %v2831_v24, -1e+30  ;;  %v2756_v56 = vsel %vm4550_vm13, %v2752_v16, -1e+30 }
 0xae8   : > { %v2716_v59 = vmax.f32 %v4481_v6, %v2714_v23  ;;  %v2838_v28 = vmax.f32 %v2823_v22, %v2836_v25  ;;  %v3103_v22 = vld [vmem:[%s4703_s19 + $0x70] sm:$0xff]  ;;  %v3104_v12 = vld [vmem:[%s4703_s19 + $0x78] sm:$0xff] }
 0xaea   : > { %v2737_v43 = vmax.f32 %v2716_v59, %v2735_v44  ;;  %2889 = vperm.xlu2 %3214, %v2838_v28   ;;  %2868 = vperm.xlu0 %3213, %v2838_v28  }
 0xaeb   : > { %2846 = vperm.xlu1 %3212, %v2838_v28  }
 0xaec   : > { %v2758_v30 = vmax.f32 %v2737_v43, %v2756_v56 }
 0xaed   : > { %v2771_v21 = vpop.permute.xlu1 %2770  ;;  %v2788_v29 = vpop.permute.xlu0 %2787 }
 0xaee   : > { %v2773_v6 = vsel %vm760_vm8, %v4520_v57, %v2771_v21  ;;  %v2792_v33 = vsel %vm4568_vm3, %v2788_v29, -1e+30 }
 0xaef   : > { %v2777_v31 = vsel %vm4556_vm11, %v2773_v6, -1e+30 }
 0xaf0   : > { %v2779_v32 = vmax.f32 %v2758_v30, %v2777_v31 }
 0xaf2   : > { %v2794_v55 = vmax.f32 %v2779_v32, %v2792_v33  ;;  %3215 = vset.pattern.permute.xlu2 %v3252_v1  ;;  %3219 = vset.pattern.permute.xlu0 %v3292_v34 }
 0xaf3   : > { %3216 = vset.pattern.permute.xlu1 %v3290_v26 }
 0xaf4   : > { %v2809_v63 = vmax.f32 %v2794_v55, %v2807_v35 }
 0xaf5   : > { %v2818_v36 = vpop.permute.xlu1 %2817  ;;  %v2833_v57 = vpop.permute.xlu0 %2832 }
 0xaf6   : > { %v2822_v37 = vsel %vm4584_vm14, %v2818_v36, -1e+30  ;;  %v2837_v39 = vsel %vm4588_vm7, %v2833_v57, -1e+30 }
 0xaf7   : > { %v2824_v38 = vmax.f32 %v2809_v63, %v2822_v37 }
 0xaf9   : > { %v2839_v8 = vmax.f32 %v2824_v38, %v2837_v39 }
 0xafb   : > { %2914 = vperm.xlu0 %3219, %v2839_v8   ;;  %2872 = vperm.xlu1 %3216, %v2839_v8  }
 0xafc   : > { %2851 = vperm.xlu2 %3215, %v2839_v8  }
 0xb03   : > { %3217 = vset.pattern.permute.xlu1 %v3291_v27  ;;  %v3094_v27 = vld [vmem:[%s4703_s19 + $0x28] sm:$0xff] }
 0xb04   : > { %3218 = vset.pattern.permute.xlu2 %v3292_v34  ;;  %2893 = vperm.xlu1 %3217, %v2839_v8  }
 0xb05   : > { %2910 = vperm.xlu2 %3218, %v2838_v28  }
 0xb44   : > { %v2890_v1 = vpop.permute.xlu2 %2889 }
 0xb45   : > { %v2896_v10 = vmul.f32 %v3097_v58, %v2890_v1  ;;  %v2897_v11 = vmul.f32 %v3098_v60, %v2890_v1 }
 0xb56   : > { %v2852_v40 = vpop.permute.xlu2 %2851 }
 0xb57   : > { %v2856_v15 = vmul.f32 %v2852_v40, %v2842_v54  ;;  %v2857_v17 = vmul.f32 %v2852_v40, %v2843_v61 }
 0xb5c   : > { %v2869_v45 = vpop.permute.xlu0 %2868 }
 0xb5d   : > { %v2847_v26 = vpop.permute.xlu1 %2846  ;;  %v2875_v50 = vmul.f32 %v3093_v42, %v2869_v45  ;;  %v2876_v51 = vmul.f32 %v3094_v27, %v2869_v45  ;;  %v2951_v27 = vld [vmem:[%s4704_s20] sm:$0x3] }
 0xb5e   : > { %v2854_v48 = vmul.f32 %v2847_v26, %v2840_v2  ;;  %v2855_v49 = vmul.f32 %v2847_v26, %v2841_v41 }
 0xb5f   : > { %v2911_v5 = vpop.permute.xlu2 %2910 }
 0xb60   : > { %v2879_v47 = vadd.f32 %v2875_v50, %v2854_v48  ;;  %v2880_v0 = vadd.f32 %v2876_v51, %v2855_v49  ;;  %v2917_v19 = vmul.f32 %v3101_v3, %v2911_v5  ;;  %v2918_v20 = vmul.f32 %v3102_v4, %v2911_v5 }
 0xb61   : > { %v2954_v50 = vperm.slane %v2951_v27, 1 }
 0xb62   : > { %v2900_v18 = vadd.f32 %v2896_v10, %v2879_v47  ;;  %v2901_v14 = vadd.f32 %v2897_v11, %v2880_v0 }
 0xb64   : > { %v2921_v29 = vadd.f32 %v2917_v19, %v2900_v18  ;;  %v2922_v30 = vadd.f32 %v2918_v20, %v2901_v14 }
 0xb6d   : > { %v2873_v46 = vpop.permute.xlu1 %2872  ;;  %v2915_v24 = vpop.permute.xlu0 %2914 }
 0xb6e   : > { %v2877_v7 = vmul.f32 %v3095_v52, %v2873_v46  ;;  %v2878_v9 = vmul.f32 %v3096_v53, %v2873_v46  ;;  %v2919_v43 = vmul.f32 %v3103_v22, %v2915_v24  ;;  %v2920_v16 = vmul.f32 %v3104_v12, %v2915_v24 }
 0xb6f   : > { %v2953_v46 = vperm.slane %v2951_v27, 0 }
 0xb70   : > { %v2881_v25 = vadd.f32 %v2877_v7, %v2856_v15  ;;  %v2882_v59 = vadd.f32 %v2878_v9, %v2857_v17 }
 0xb76   : > { %v2894_v23 = vpop.permute.xlu1 %2893 }
 0xb77   : > { %v2898_v28 = vmul.f32 %v3099_v13, %v2894_v23  ;;  %v2899_v44 = vmul.f32 %v3100_v62, %v2894_v23 }
 0xb79   : > { %v2902_v56 = vadd.f32 %v2898_v28, %v2881_v25  ;;  %v2903_v21 = vadd.f32 %v2899_v44, %v2882_v59 }
 0xb7b   : > { %v2923_v6 = vadd.f32 %v2919_v43, %v2902_v56  ;;  %v2924_v31 = vadd.f32 %v2920_v16, %v2903_v21 }
 0xb7d   : > { %v2925_v32 = vadd.f32 %v2923_v6, %v2921_v29  ;;  %v2932_v33 = vadd.f32 %v2924_v31, %v2922_v30 }
 0xb7f   : > { %v2926_v55 = vrot.slane %v2925_v32, 4  ;;  %v2933_v34 = vrot.slane %v2932_v33, 4 }
 0xb81   : > { %v2927_v35 = vadd.f32 %v2926_v55, %v2925_v32  ;;  %v2934_v63 = vadd.f32 %v2933_v34, %v2932_v33 }
 0xb83   : > { %v2928_v36 = vrot.slane %v2927_v35, 2  ;;  %v2935_v57 = vrot.slane %v2934_v63, 2 }
 0xb85   : > { %v2929_v37 = vadd.f32 %v2928_v36, %v2927_v35  ;;  %v2936_v38 = vadd.f32 %v2935_v57, %v2934_v63 }
 0xb87   : > { %v2930_v39 = vrot.slane %v2929_v37, 1  ;;  %v2937_v8 = vrot.slane %v2936_v38, 1 }
 0xb89   : > { %v2931_v1 = vadd.f32 %v2930_v39, %v2929_v37  ;;  %v2938_v26 = vadd.f32 %v2937_v8, %v2936_v38 }
 0xb8b   : > { %v2941_v40 = vmin.f32 %v2931_v1, 0.0  ;;  %v2942_v2 = vmin.f32 %v2938_v26, 0.0  ;;  %vm2939_vm8 = vcmp.gt.f32.partialorder %v2931_v1, 0.0  ;;  %vm2940_vm10 = vcmp.gt.f32.partialorder %v2938_v26, 0.0 }
 0xb8d   : > { %v2943_v41 = vmul.f32 1.442695, %v2941_v40  ;;  %v2945_v42 = vmul.f32 1.442695, %v2942_v2 }
 0xb8f   : > { %3236 = vpow2.f32 %v2943_v41 }
 0xb90   : > { %3238 = vpow2.f32 %v2945_v42 }
 0xb95   : > { %v3237_v45 = vpop.eup %3236 }
 0xb96   : > { %v3239_v48 = vpop.eup %3238  ;;  %v3105_v49 = vadd.f32 -1.0, %v3237_v45 }
 0xb97   : > { %v3106_v51 = vadd.f32 -1.0, %v3239_v48 }
 0xb98   : > { %v2949_v52 = vsel %vm2939_vm8, %v2931_v1, %v3105_v49 }
 0xb99   : > { %v2950_v53 = vsel %vm2940_vm10, %v2938_v26, %v3106_v51  ;;  %v2957_v58 = vmul.f32 %v2953_v46, %v2949_v52 }
 0xb9a   : > { %v2958_v60 = vmul.f32 %v2954_v50, %v2950_v53 }
 0xb9b   : > { %v2959_v54 = vsel %vm2165_vm6, %v2957_v58, 0.0 }
 0xb9c   : > { %v2960_v61 = vsel %vm2165_vm6, %v2958_v60, 0.0 }
 0xb9d   : > { %v2961_v47 = vadd.f32 %v2960_v61, %v2959_v54 }
 0xb9f   : > { %2962 = vadd.xlane.f32.xlu1 %v2961_v47 }
 0xc12   : > { %v2963_v0 = vpop.xlane.xlu1 %2962 }
 0xc13   : > { %v2964_v3 = vsub.f32 0.0, %v2963_v0 }
 0xc15   : > { %v2965_v4 = vmul.f32 1.442695, %v2964_v3 }
 0xc17   : > { %3240 = vpow2.f32 %v2965_v4 }
 0xc1d   : > { %v3241_v5 = vpop.eup %3240 }
 0xc1e   : > { %v2967_v7 = vadd.f32 1.0, %v3241_v5 }
 0xc20   : > { %3242 = vrcp.f32 %v2967_v7 }
 0xc26   : > { %v3243_v9 = vpop.eup %3242 }
 0xc27   : > { %2970 = vst.msk [vmem:[%s649_s0] sm:$0x1] %vm2969_vm0, %v3243_v9 }
 0xc28 PF: > { %s31_s2 = sadd.s32 1, %s3250_s2  }
 0xc29   : > { %p28_p4 = scmp.ge.s32.totalorder %s31_s2, 4  }
 0xc2b   :  { %30 = sbr.rel (!%p28_p4) target bundleno = 7 (0x7), region = 194 }

</bundles_post_ra>
